<compile_context>
chip_gen: v7x
topology: tpu7x:2x2x1
jax: 0.10.0
libtpu: 0.0.40
codegen_flags: <defaults>
</compile_context>

<pallas_src>
import jax
import jax.numpy as jnp
from jax.experimental import pallas as pl
from jax.experimental.pallas import tpu as pltpu

IN_FEATURES = 3 * 28 * 28          # 2352 (8-aligned; Mosaic lane-pads to 2432 in VMEM)
HIDDEN = 512
OUT_FEATURES = 1
TM_MAX = 256                       # batch tile upper bound; sweep 256/512 on v6e/v7x


def _mlp_kernel(x_ref, w1_ref, b1_ref, w2_ref, b2_ref, w3_ref, b3_ref, o_ref):
    # x_ref : (tm, 2352) f32     w1_ref: (2352, 512) bf16   b1_ref: (1, 512) f32
    # w2_ref: (512, 512) bf16    b2_ref: (1, 512) f32
    # w3_ref: (1, 512)   f32     b3_ref: (1, 1)   f32       o_ref : (1, tm) f32
    x = x_ref[...].astype(jnp.bfloat16)            # cast in VMEM; x streams as raw f32
    h1 = jnp.dot(x, w1_ref[...], preferred_element_type=jnp.float32)      # (tm, 512)
    h1 = jnp.maximum(h1 + b1_ref[...], 0.0)                               # ReLU, f32
    h2 = jnp.dot(h1.astype(jnp.bfloat16), w2_ref[...],
                 preferred_element_type=jnp.float32)                      # (tm, 512)
    h2 = jnp.maximum(h2 + b2_ref[...], 0.0)                               # ReLU, f32
    # Final Linear(512, 1) as a (1,512) x (tm,512)^T contraction -> (1, tm):
    # the result is lane-dense, so the per-step store is an unmasked full-lane vst.
    row = jax.lax.dot_general(w3_ref[...], h2, (((1,), (1,)), ((), ())),
                              preferred_element_type=jnp.float32)         # (1, tm)
    o_ref[...] = row + b3_ref[...]


def _resident(shape):
    # Constant block index + single buffering: fetched once, stays VMEM-resident
    # for every grid step (no wasted second buffer for a block that never changes).
    return pl.BlockSpec(shape, lambda i: (0, 0), pipeline_mode=pl.Buffered(1))


def prepare_params(params):
    """One-time weight prep, hoisted out of the forward pass (bf16 MXU operands,
    (1,512) f32 row for the final layer, f32 biases)."""
    w1, b1, w2, b2, w3, b3 = params
    return (
        w1.astype(jnp.bfloat16),                                   # (2352, 512)
        b1.astype(jnp.float32).reshape(1, HIDDEN),                 # (1, 512)
        w2.astype(jnp.bfloat16),                                   # (512, 512)
        b2.astype(jnp.float32).reshape(1, HIDDEN),                 # (1, 512)
        w3.astype(jnp.float32).reshape(HIDDEN, OUT_FEATURES).T,    # (1, 512)
        b3.astype(jnp.float32).reshape(1, OUT_FEATURES),           # (1, 1)
    )


def net_forward(x_nchw, prepared):
    """Forward pass equivalent to Net.forward.
    x_nchw: (B, 3, 28, 28) f32; prepared = prepare_params(params)."""
    w1_bf, b1_f, w2_bf, b2_f, w3_row, b3_f = prepared
    B = x_nchw.shape[0]

    # Batch tile: fill the MXU when the batch allows it, otherwise an 8-aligned
    # tile just covering B (B=4 -> tm=8, no 32x wasted rows).  For B > TM_MAX the
    # grid has >= 2 tiles, so the "parallel" axis shards across v7x's 2 TCs.
    tm = min(TM_MAX, ((B + 7) // 8) * 8)
    num_tiles = pl.cdiv(B, tm)
    b_pad = num_tiles * tm

    x2d = x_nchw.reshape(B, IN_FEATURES)           # free metadata reshape, stays f32
    if b_pad != B:
        x2d = jnp.pad(x2d, ((0, b_pad - B), (0, 0)))

    flops = 2 * b_pad * (IN_FEATURES * HIDDEN + HIDDEN * HIDDEN
                         + HIDDEN * OUT_FEATURES)
    bytes_accessed = (x2d.size * 4 + w1_bf.size * 2 + w2_bf.size * 2
                      + (b1_f.size + b2_f.size + w3_row.size + b3_f.size) * 4
                      + b_pad * 4)

    logits_row = pl.pallas_call(
        _mlp_kernel,
        out_shape=jax.ShapeDtypeStruct((1, b_pad), jnp.float32),
        grid_spec=pltpu.PrefetchScalarGridSpec(
            num_scalar_prefetch=0,
            grid=(num_tiles,),
            in_specs=[
                pl.BlockSpec((tm, IN_FEATURES), lambda i: (i, 0)),  # x streams (dbl-buffered)
                _resident((IN_FEATURES, HIDDEN)),                   # W1 resident
                _resident((1, HIDDEN)),                             # b1 resident
                _resident((HIDDEN, HIDDEN)),                        # W2 resident
                _resident((1, HIDDEN)),                             # b2 resident
                _resident((1, HIDDEN)),                             # w3 row resident
                _resident((1, 1)),                                  # b3 resident
            ],
            out_specs=pl.BlockSpec((1, tm), lambda i: (0, i)),      # lane-dense row
        ),
        compiler_params=pltpu.CompilerParams(
            dimension_semantics=("parallel",),
            vmem_limit_bytes=32 << 20,
        ),
        cost_estimate=pl.CostEstimate(
            flops=flops, transcendentals=0, bytes_accessed=bytes_accessed),
    )(x2d, w1_bf, b1_f, w2_bf, b2_f, w3_row, b3_f)

    return logits_row[0, :B]                       # .flatten(), padded rows dropped


def init_params(key):
    """Deterministic init mimicking PyTorch's default Linear init
    (uniform(-1/sqrt(fan_in), 1/sqrt(fan_in))).  Stored as (in, out) f32."""
    def linear(key, fan_in, fan_out):
        kw, kb = jax.random.split(key)
        bound = 1.0 / jnp.sqrt(jnp.float32(fan_in))
        w = jax.random.uniform(kw, (fan_in, fan_out), jnp.float32, -bound, bound)
        b = jax.random.uniform(kb, (1, fan_out), jnp.float32, -bound, bound)
        return w, b

    k1, k2, k3 = jax.random.split(key, 3)
    w1, b1 = linear(k1, IN_FEATURES, HIDDEN)
    w2, b2 = linear(k2, HIDDEN, HIDDEN)
    w3, b3 = linear(k3, HIDDEN, OUT_FEATURES)
    return (w1, b1, w2, b2, w3, b3)


if __name__ == "__main__":
    key = jax.random.PRNGKey(0)
    kx, kp = jax.random.split(key)

    B = 4
    x = jax.random.normal(kx, (B, 3, 28, 28), dtype=jnp.float32)
    params = init_params(kp)
    prepped = prepare_params(params)               # one-time prep (hoisted out of forward)

    fwd = jax.jit(net_forward)
    logits = fwd(x, prepped)
    jax.block_until_ready(logits)

    # sanity: full-f32 reference in plain JAX (kernel uses bf16 matmul operands
    # with f32 accumulation, so use a modest tolerance).
    w1, b1, w2, b2, w3, b3 = params
    xf = x.reshape(B, IN_FEATURES)
    ref = jnp.maximum(xf @ w1 + b1, 0.0)
    ref = jnp.maximum(ref @ w2 + b2, 0.0)
    ref = (ref @ w3 + b3).reshape(-1)

    assert logits.shape == (B,)
    assert jnp.allclose(logits, ref, atol=3e-2, rtol=3e-2), (
        f"max abs diff {jnp.max(jnp.abs(logits - ref))}")

    print("KERNEL_OK")
</pallas_src>

<mosaic_0001>
module attributes {stable_mosaic.version = 11 : i64} {
  func.func @_mlp_kernel(%arg0: i32, %arg1: memref<8x2352xf32, #tpu.memory_space<vmem>>, %arg2: memref<2352x512xbf16, #tpu.memory_space<vmem>>, %arg3: memref<1x512xf32, #tpu.memory_space<vmem>>, %arg4: memref<512x512xbf16, #tpu.memory_space<vmem>>, %arg5: memref<1x512xf32, #tpu.memory_space<vmem>>, %arg6: memref<1x512xf32, #tpu.memory_space<vmem>>, %arg7: memref<1x1xf32, #tpu.memory_space<vmem>>, %arg8: memref<1x8xf32, #tpu.memory_space<vmem>>) attributes {dimension_semantics = [#tpu.dimension_semantics<parallel>], iteration_bounds = array<i64: 1>, scalar_prefetch = 0 : i64, scratch_operands = 0 : i64, tpu.core_type = #tpu.core_type<tc>, window_params = [{transform_indices = @transform_0, window_bounds = array<i64: 8, 2352>}, {pipeline_mode = #tpu.pipeline_mode<synchronous>, transform_indices = @transform_1, window_bounds = array<i64: 2352, 512>}, {pipeline_mode = #tpu.pipeline_mode<synchronous>, transform_indices = @transform_2, window_bounds = array<i64: 1, 512>}, {pipeline_mode = #tpu.pipeline_mode<synchronous>, transform_indices = @transform_3, window_bounds = array<i64: 512, 512>}, {pipeline_mode = #tpu.pipeline_mode<synchronous>, transform_indices = @transform_4, window_bounds = array<i64: 1, 512>}, {pipeline_mode = #tpu.pipeline_mode<synchronous>, transform_indices = @transform_5, window_bounds = array<i64: 1, 512>}, {pipeline_mode = #tpu.pipeline_mode<synchronous>, transform_indices = @transform_6, window_bounds = array<i64: 1, 1>}, {transform_indices = @transform_7, window_bounds = array<i64: 1, 8>}]} {
    %c0 = arith.constant 0 : index
    %c0_0 = arith.constant 0 : index
    %0 = vector.load %arg1[%c0, %c0_0] : memref<8x2352xf32, #tpu.memory_space<vmem>>, vector<8x2352xf32>
    %1 = arith.truncf %0 : vector<8x2352xf32> to vector<8x2352xbf16>
    %c0_1 = arith.constant 0 : index
    %c0_2 = arith.constant 0 : index
    %2 = vector.load %arg2[%c0_1, %c0_2] : memref<2352x512xbf16, #tpu.memory_space<vmem>>, vector<2352x512xbf16>
    %cst = arith.constant dense<0.000000e+00> : vector<8x512xf32>
    %3 = tpu.matmul %1, %2, %cst {dimension_numbers = #tpu.dot_dimension_numbers<[1], [0], [0], [1], [0, 0, 1, 1], [], []>} : vector<8x2352xbf16>, vector<2352x512xbf16>, vector<8x512xf32> -> vector<8x512xf32>
    %c0_3 = arith.constant 0 : index
    %c0_4 = arith.constant 0 : index
    %4 = vector.load %arg3[%c0_3, %c0_4] : memref<1x512xf32, #tpu.memory_space<vmem>>, vector<1x512xf32>
    %5 = vector.broadcast %4 : vector<1x512xf32> to vector<8x512xf32>
    %6 = arith.addf %3, %5 : vector<8x512xf32>
    %cst_5 = arith.constant 0.000000e+00 : f32
    %7 = vector.broadcast %cst_5 : f32 to vector<8x512xf32>
    %8 = arith.maximumf %6, %7 : vector<8x512xf32>
    %9 = arith.truncf %8 : vector<8x512xf32> to vector<8x512xbf16>
    %c0_6 = arith.constant 0 : index
    %c0_7 = arith.constant 0 : index
    %10 = vector.load %arg4[%c0_6, %c0_7] : memref<512x512xbf16, #tpu.memory_space<vmem>>, vector<512x512xbf16>
    %cst_8 = arith.constant dense<0.000000e+00> : vector<8x512xf32>
    %11 = tpu.matmul %9, %10, %cst_8 {dimension_numbers = #tpu.dot_dimension_numbers<[1], [0], [0], [1], [0, 0, 1, 1], [], []>} : vector<8x512xbf16>, vector<512x512xbf16>, vector<8x512xf32> -> vector<8x512xf32>
    %c0_9 = arith.constant 0 : index
    %c0_10 = arith.constant 0 : index
    %12 = vector.load %arg5[%c0_9, %c0_10] : memref<1x512xf32, #tpu.memory_space<vmem>>, vector<1x512xf32>
    %13 = vector.broadcast %12 : vector<1x512xf32> to vector<8x512xf32>
    %14 = arith.addf %11, %13 : vector<8x512xf32>
    %cst_11 = arith.constant 0.000000e+00 : f32
    %15 = vector.broadcast %cst_11 : f32 to vector<8x512xf32>
    %16 = arith.maximumf %14, %15 : vector<8x512xf32>
    %c0_12 = arith.constant 0 : index
    %c0_13 = arith.constant 0 : index
    %17 = vector.load %arg6[%c0_12, %c0_13] : memref<1x512xf32, #tpu.memory_space<vmem>>, vector<1x512xf32>
    %cst_14 = arith.constant dense<0.000000e+00> : vector<1x8xf32>
    %18 = tpu.matmul %17, %16, %cst_14 {dimension_numbers = #tpu.dot_dimension_numbers<[1], [1], [0], [0], [0, 0, 1, 0], [], []>} : vector<1x512xf32>, vector<8x512xf32>, vector<1x8xf32> -> vector<1x8xf32>
    %c0_15 = arith.constant 0 : index
    %c0_16 = arith.constant 0 : index
    %19 = vector.load %arg7[%c0_15, %c0_16] : memref<1x1xf32, #tpu.memory_space<vmem>>, vector<1x1xf32>
    %20 = vector.broadcast %19 : vector<1x1xf32> to vector<1x8xf32>
    %21 = arith.addf %18, %20 : vector<1x8xf32>
    %c0_17 = arith.constant 0 : index
    %c0_18 = arith.constant 0 : index
    %22 = vector.load %arg8[%c0_17, %c0_18] : memref<1x8xf32, #tpu.memory_space<vmem>>, vector<1x8xf32>
    tpu.vector_store %arg8[%c0_17, %c0_18], %21 {strides = array<i32>} : memref<1x8xf32, #tpu.memory_space<vmem>>, vector<1x8xf32>,
    return
  }
  func.func @transform_0(%arg0: i32) -> (i32, i32) {
    %c0_i32 = arith.constant 0 : i32
    %c0_i32_0 = arith.constant 0 : i32
    return %arg0, %c0_i32 : i32, i32
  }
  func.func @transform_1(%arg0: i32) -> (i32, i32) {
    %c0_i32 = arith.constant 0 : i32
    %c0_i32_0 = arith.constant 0 : i32
    %c0_i32_1 = arith.constant 0 : i32
    return %c0_i32, %c0_i32_0 : i32, i32
  }
  func.func @transform_2(%arg0: i32) -> (i32, i32) {
    %c0_i32 = arith.constant 0 : i32
    %c0_i32_0 = arith.constant 0 : i32
    %c0_i32_1 = arith.constant 0 : i32
    return %c0_i32, %c0_i32_0 : i32, i32
  }
  func.func @transform_3(%arg0: i32) -> (i32, i32) {
    %c0_i32 = arith.constant 0 : i32
    %c0_i32_0 = arith.constant 0 : i32
    %c0_i32_1 = arith.constant 0 : i32
    return %c0_i32, %c0_i32_0 : i32, i32
  }
  func.func @transform_4(%arg0: i32) -> (i32, i32) {
    %c0_i32 = arith.constant 0 : i32
    %c0_i32_0 = arith.constant 0 : i32
    %c0_i32_1 = arith.constant 0 : i32
    return %c0_i32, %c0_i32_0 : i32, i32
  }
  func.func @transform_5(%arg0: i32) -> (i32, i32) {
    %c0_i32 = arith.constant 0 : i32
    %c0_i32_0 = arith.constant 0 : i32
    %c0_i32_1 = arith.constant 0 : i32
    return %c0_i32, %c0_i32_0 : i32, i32
  }
  func.func @transform_6(%arg0: i32) -> (i32, i32) {
    %c0_i32 = arith.constant 0 : i32
    %c0_i32_0 = arith.constant 0 : i32
    %c0_i32_1 = arith.constant 0 : i32
    return %c0_i32, %c0_i32_0 : i32, i32
  }
  func.func @transform_7(%arg0: i32) -> (i32, i32) {
    %c0_i32 = arith.constant 0 : i32
    %c0_i32_0 = arith.constant 0 : i32
    return %c0_i32, %arg0 : i32, i32
  }
}

</mosaic_0001>

<bundles_post_ra>
// kernel: net_forward.1
= control target key start
LH: loop header
LB: loop body
LE: loop exit
PB: predicated region body
PF: predicated region fallthrough
CT: control target
= control target key end

     0   :  { %s7867_s0 = inlined_call_operand.vmem [shape: f32[8,2352], index: 0, kind: input, shape index: {}]   ;;  %s7868_s1 = inlined_call_operand.hbm [shape: bf16[2352,512], index: 1, kind: input, shape index: {}]   ;;  %s7869_s2 = inlined_call_operand.hbm [shape: f32[1,512], index: 2, kind: input, shape index: {}]   ;;  %s7870_s3 = inlined_call_operand.hbm [shape: bf16[512,512], index: 3, kind: input, shape index: {}]   ;;  %s7871_s4 = inlined_call_operand.hbm [shape: f32[1,512], index: 4, kind: input, shape index: {}]   ;;  %s7872_s5 = inlined_call_operand.hbm [shape: f32[1,512], index: 5, kind: input, shape index: {}]   ;;  %s7873_s6 = inlined_call_operand.<no memory space> [shape: f32[1,1], index: 6, kind: input, shape index: {}]   ;;  %s7874_s7 = inlined_call_operand.vmem [shape: f32[1,8], index: 7, kind: output, shape index: {}]  }
   0x1   :  { %v12_v0 = vstv %s7873_s6 }
   0x2   :  { %13 = vst [vmem:[#allocation2] sm:$0x1] %v12_v0 }
   0x3   :  { %14 = vsyncpa [#allocation4], 0 }
   0x4   :  { %15 = vsyncpa [#allocation6], 0 }
   0x5   :  { %16 = vsyncpa [#allocation9], 0  ;;  %s7657_s26 = smov [#allocation5]   ;;  %s7658_s28 = smov [#allocation8]  }
   0x6   :  { %s37_s27 = sshll.u32 %s7657_s26, 4  ;;  %s59_s29 = sshll.u32 %s7658_s28, 4  ;;  %s38_s27 = int_to_ptr.vmem [resolvable:$true] %s37_s27  ;;  %s60_s29 = int_to_ptr.vmem [resolvable:$true] %s59_s29 }
   0x7   :  { %s7541_s9 = scalar_lea.hbm %s7869_s2, 64 }
   0x8   :  { %p7542_p0 = scmp.ne.s32.totalorder %s7869_s2, %s7541_s9  ;;  %p7545_p1 = scmp.lt.u32.totalorder %s7541_s9, %s7869_s2 }
   0xa   :  { %p7547_p2 = pnand %p7545_p1, %p7542_p0 }
   0xc   :  { %7550 = shalt.err (!%p7547_p2)
}
   0xd   :  { %s7551_s13 = scalar_lea.vmem %s38_s27, 64  ;;  %p7556_p4 = scmp.lt.s32.totalorder %s38_s27, %s38_s27 }
   0xe   :  { %p7552_p3 = scmp.ne.s32.totalorder %s38_s27, %s7551_s13  ;;  %p7557_p5 = scmp.lt.s32.totalorder %s7551_s13, %s7551_s13 }
  0x10   :  { %p7558_p6 = por %p7557_p5, %p7556_p4 }
  0x12   :  { %p7559_p7 = pnand %p7558_p6, %p7552_p3 }
  0x14   :  { %7562 = shalt.err (!%p7559_p7)
}
  0x15   :  { %40 = dma.hbm_to_vmem [thread:$0]  %s7869_s2, 64, %s38_s27, [#allocation6]  }
  0x16   :  { %s7563_s18 = scalar_lea.hbm %s7871_s4, 64 }
  0x17   :  { %p7564_p8 = scmp.ne.s32.totalorder %s7871_s4, %s7563_s18  ;;  %p7567_p9 = scmp.lt.u32.totalorder %s7563_s18, %s7871_s4 }
  0x19   :  { %p7569_p10 = pnand %p7567_p9, %p7564_p8 }
  0x1b   :  { %7572 = shalt.err (!%p7569_p10)
}
  0x1c   :  { %s7573_s23 = scalar_lea.vmem %s60_s29, 64  ;;  %p7578_p12 = scmp.lt.s32.totalorder %s60_s29, %s60_s29 }
  0x1d   :  { %p7574_p11 = scmp.ne.s32.totalorder %s60_s29, %s7573_s23  ;;  %p7579_p13 = scmp.lt.s32.totalorder %s7573_s23, %s7573_s23 }
  0x1f   :  { %p7580_p0 = por %p7579_p13, %p7578_p12 }
  0x21   :  { %p7581_p1 = pnand %p7580_p0, %p7574_p11 }
  0x23   :  { %7584 = shalt.err (!%p7581_p1)
}
  0x24   :  { %62 = dma.hbm_to_vmem [thread:$0]  %s7871_s4, 64, %s60_s29, [#allocation9]  }
  0x25   :  { %s7659_s25 = smov [#allocation3]   ;;  %s7585_s30 = scalar_lea.hbm %s7868_s1, 75264 }
  0x26   :  { %s24_s26 = sshll.u32 %s7659_s25, 4  ;;  %p7586_p2 = scmp.ne.s32.totalorder %s7868_s1, %s7585_s30  ;;  %s25_s26 = int_to_ptr.vmem [resolvable:$true] %s24_s26 }
  0x27   :  { %p7589_p3 = scmp.lt.u32.totalorder %s7585_s30, %s7868_s1 }
  0x29   :  { %p7591_p4 = pnand %p7589_p3, %p7586_p2 }
  0x2b   :  { %7594 = shalt.err (!%p7591_p4)
}
  0x2c   :  { %s7595_s12 = scalar_lea.vmem %s25_s26, 75264  ;;  %p7600_p6 = scmp.lt.s32.totalorder %s25_s26, %s25_s26 }
  0x2d   :  { %p7596_p5 = scmp.ne.s32.totalorder %s25_s26, %s7595_s12  ;;  %p7601_p7 = scmp.lt.s32.totalorder %s7595_s12, %s7595_s12 }
  0x2f   :  { %p7602_p8 = por %p7601_p7, %p7600_p6 }
  0x31   :  { %p7603_p9 = pnand %p7602_p8, %p7596_p5 }
  0x33   :  { %7606 = shalt.err (!%p7603_p9)
}
  0x34   :  { %s7660_s4 = smov 256   ;;  %s7661_s29 = smov 16  }
  0x35   :  { %30 = dma.hbm_to_vmem [thread:$0]  %s7868_s1, 75264, %s25_s26, [#allocation4], %s7660_s4, %s7660_s4, %s7661_s29  }
  0x36   :  { %s7662_s14 = smov [#allocation7]   ;;  %s7663_s16 = smov [#allocation10]  }
  0x37   :  { %s46_s15 = sshll.u32 %s7662_s14, 4  ;;  %s69_s17 = sshll.u32 %s7663_s16, 4  ;;  %s47_s15 = int_to_ptr.vmem [resolvable:$true] %s46_s15  ;;  %s70_s17 = int_to_ptr.vmem [resolvable:$true] %s69_s17 }
  0x38   :  { %s7607_s20 = scalar_lea.hbm %s7870_s3, 16384 }
  0x39   :  { %p7608_p10 = scmp.ne.s32.totalorder %s7870_s3, %s7607_s20  ;;  %p7611_p11 = scmp.lt.u32.totalorder %s7607_s20, %s7870_s3 }
  0x3b   :  { %p7613_p12 = pnand %p7611_p11, %p7608_p10 }
  0x3d   :  { %7616 = shalt.err (!%p7613_p12)
}
  0x3e   :  { %s7617_s1 = scalar_lea.vmem %s47_s15, 16384  ;;  %p7622_p0 = scmp.lt.s32.totalorder %s47_s15, %s47_s15 }
  0x3f   :  { %p7618_p13 = scmp.ne.s32.totalorder %s47_s15, %s7617_s1  ;;  %p7623_p1 = scmp.lt.s32.totalorder %s7617_s1, %s7617_s1 }
  0x41   :  { %p7624_p2 = por %p7623_p1, %p7622_p0 }
  0x43   :  { %p7625_p3 = pnand %p7624_p2, %p7618_p13 }
  0x45   :  { %7628 = shalt.err (!%p7625_p3)
}
  0x46   :  { %52 = dma.hbm_to_vmem [thread:$0]  %s7870_s3, 16384, %s47_s15, [#allocation6], %s7660_s4, %s7660_s4, %s7661_s29  }
  0x47   :  { %s7629_s28 = scalar_lea.hbm %s7872_s5, 64 }
  0x48   :  { %p7630_p4 = scmp.ne.s32.totalorder %s7872_s5, %s7629_s28  ;;  %p7633_p5 = scmp.lt.u32.totalorder %s7629_s28, %s7872_s5 }
  0x4a   :  { %p7635_p6 = pnand %p7633_p5, %p7630_p4 }
  0x4c   :  { %7638 = shalt.err (!%p7635_p6)
}
  0x4d   :  { %s7639_s11 = scalar_lea.vmem %s70_s17, 64  ;;  %p7644_p8 = scmp.lt.s32.totalorder %s70_s17, %s70_s17 }
  0x4e   :  { %p7640_p7 = scmp.ne.s32.totalorder %s70_s17, %s7639_s11  ;;  %p7645_p9 = scmp.lt.s32.totalorder %s7639_s11, %s7639_s11 }
  0x50   :  { %p7646_p10 = por %p7645_p9, %p7644_p8 }
  0x52   :  { %p7647_p11 = pnand %p7646_p10, %p7640_p7 }
  0x54   :  { %7650 = shalt.err (!%p7647_p11)
}
  0x55   :  { %72 = dma.hbm_to_vmem [thread:$0]  %s7872_s5, 64, %s70_s17, [#allocation9]  }
  0x56   :  { %7651 = dma.done.wait [#allocation4], 75264  }
  0x57   :  { %7652 = vsyncadd [#allocation4], 4294892032 }
  0x58   :  { %7653 = dma.done.wait [#allocation6], 16448  }
  0x59   :  { %7654 = vsyncadd [#allocation6], 4294950848 }
  0x5a   :  { %7655 = dma.done.wait [#allocation9], 128  }
  0x5b   :  { %7656 = vsyncadd [#allocation9], 4294967168  ;;  %v6467_v1 = vld [vmem:[#allocation3 + $0x4] ss:$16 sps:$4 sm:$0xff]   ;;  %v6469_v2 = vld [vmem:[#allocation3 + $0xc] ss:$16 sps:$4 sm:$0xff]  }
  0x5c   :  { %3683 = vmatprep.subr.bf16.mxu0 %v6467_v1  ;;  %v6471_v3 = vld [vmem:[#allocation3] ss:$16 sps:$4 sm:$0xff]   ;;  %v6472_v4 = vld [vmem:[#allocation3 + $0x8] ss:$16 sps:$4 sm:$0xff]   ;;  %4093 = vmatprep.subr.bf16.mxu1 %v6469_v2  ;;  %v6473_v5 = vld [vmem:[#allocation3 + $0x24] ss:$16 sps:$4 sm:$0xff]  }
  0x5d   :  { %3684 = vmatpush1.bf16.msra.mxu0 %v6471_v3  ;;  %4094 = vmatpush1.bf16.msra.mxu1 %v6472_v4  ;;  %v6475_v6 = vld [vmem:[#allocation3 + $0x2c] ss:$16 sps:$4 sm:$0xff]   ;;  %v6477_v7 = vld [vmem:[#allocation3 + $0x20] ss:$16 sps:$4 sm:$0xff]   ;;  %v6478_v8 = vld [vmem:[#allocation3 + $0x28] ss:$16 sps:$4 sm:$0xff]  }
  0x5e   :  { %3685 = vmatprep.subr.bf16.mxu0 %v6473_v5  ;;  %4095 = vmatprep.subr.bf16.mxu1 %v6475_v6  ;;  %v6479_v9 = vld [vmem:[#allocation3 + $0x44] ss:$16 sps:$4 sm:$0xff]   ;;  %v6481_v10 = vld [vmem:[#allocation3 + $0x4c] ss:$16 sps:$4 sm:$0xff]   ;;  %v6483_v11 = vld [vmem:[#allocation3 + $0x40] ss:$16 sps:$4 sm:$0xff]  }
  0x5f   :  { %v6484_v12 = vld [vmem:[#allocation3 + $0x48] ss:$16 sps:$4 sm:$0xff]   ;;  %v6485_v13 = vld [vmem:[#allocation3 + $0x64] ss:$16 sps:$4 sm:$0xff]   ;;  %v6487_v14 = vld [vmem:[#allocation3 + $0x6c] ss:$16 sps:$4 sm:$0xff]  }
  0x60   :  { %v6489_v15 = vld [vmem:[#allocation3 + $0x60] ss:$16 sps:$4 sm:$0xff]   ;;  %v6490_v16 = vld [vmem:[#allocation3 + $0x68] ss:$16 sps:$4 sm:$0xff]   ;;  %v6491_v17 = vld [vmem:[#allocation3 + $0x84] ss:$16 sps:$4 sm:$0xff]  }
  0x61   :  { %3686 = vmatpush1.bf16.msra.mxu0 %v6477_v7  ;;  %4096 = vmatpush1.bf16.msra.mxu1 %v6478_v8  ;;  %v6493_v18 = vld [vmem:[#allocation3 + $0x8c] ss:$16 sps:$4 sm:$0xff]   ;;  %v6495_v19 = vld [vmem:[#allocation3 + $0x80] ss:$16 sps:$4 sm:$0xff]   ;;  %v6496_v20 = vld [vmem:[#allocation3 + $0x88] ss:$16 sps:$4 sm:$0xff]  }
  0x62   :  { %3687 = vmatprep.subr.bf16.mxu0 %v6479_v9  ;;  %4097 = vmatprep.subr.bf16.mxu1 %v6481_v10  ;;  %v6497_v21 = vld [vmem:[#allocation3 + $0xa4] ss:$16 sps:$4 sm:$0xff]   ;;  %v6499_v22 = vld [vmem:[#allocation3 + $0xac] ss:$16 sps:$4 sm:$0xff]   ;;  %v6501_v23 = vld [vmem:[#allocation3 + $0xa0] ss:$16 sps:$4 sm:$0xff]  }
  0x63   :  { %v6502_v24 = vld [vmem:[#allocation3 + $0xa8] ss:$16 sps:$4 sm:$0xff]   ;;  %v6503_v25 = vld [vmem:[#allocation3 + $0xc4] ss:$16 sps:$4 sm:$0xff]   ;;  %v6505_v26 = vld [vmem:[#allocation3 + $0xcc] ss:$16 sps:$4 sm:$0xff]  }
  0x64   :  { %v6507_v27 = vld [vmem:[#allocation3 + $0xc0] ss:$16 sps:$4 sm:$0xff]   ;;  %v6508_v28 = vld [vmem:[#allocation3 + $0xc8] ss:$16 sps:$4 sm:$0xff]   ;;  %v6509_v29 = vld [vmem:[#allocation3 + $0xe4] ss:$16 sps:$4 sm:$0xff]  }
  0x65   :  { %3688 = vmatpush1.bf16.msra.mxu0 %v6483_v11  ;;  %4098 = vmatpush1.bf16.msra.mxu1 %v6484_v12  ;;  %v6511_v30 = vld [vmem:[#allocation3 + $0xec] ss:$16 sps:$4 sm:$0xff]   ;;  %v6513_v31 = vld [vmem:[#allocation3 + $0xe0] ss:$16 sps:$4 sm:$0xff]   ;;  %v6514_v32 = vld [vmem:[#allocation3 + $0xe8] ss:$16 sps:$4 sm:$0xff]  }
  0x66   :  { %3689 = vmatprep.subr.bf16.mxu0 %v6485_v13  ;;  %4099 = vmatprep.subr.bf16.mxu1 %v6487_v14  ;;  %v6515_v33 = vld [vmem:[#allocation3 + $0x104] ss:$16 sps:$4 sm:$0xff]   ;;  %v6517_v34 = vld [vmem:[#allocation3 + $0x10c] ss:$16 sps:$4 sm:$0xff]   ;;  %v6519_v35 = vld [vmem:[#allocation3 + $0x100] ss:$16 sps:$4 sm:$0xff]  }
  0x67   :  { %v6520_v36 = vld [vmem:[#allocation3 + $0x108] ss:$16 sps:$4 sm:$0xff]   ;;  %v6521_v37 = vld [vmem:[#allocation3 + $0x124] ss:$16 sps:$4 sm:$0xff]   ;;  %v6523_v38 = vld [vmem:[#allocation3 + $0x12c] ss:$16 sps:$4 sm:$0xff]  }
  0x68   :  { %v6525_v39 = vld [vmem:[#allocation3 + $0x120] ss:$16 sps:$4 sm:$0xff]   ;;  %v6526_v40 = vld [vmem:[#allocation3 + $0x128] ss:$16 sps:$4 sm:$0xff]   ;;  %v6527_v41 = vld [vmem:[#allocation3 + $0x144] ss:$16 sps:$4 sm:$0xff]  }
  0x69   :  { %3690 = vmatpush1.bf16.msra.mxu0 %v6489_v15  ;;  %4100 = vmatpush1.bf16.msra.mxu1 %v6490_v16  ;;  %v6529_v42 = vld [vmem:[#allocation3 + $0x14c] ss:$16 sps:$4 sm:$0xff]   ;;  %v6531_v43 = vld [vmem:[#allocation3 + $0x140] ss:$16 sps:$4 sm:$0xff]   ;;  %v6532_v44 = vld [vmem:[#allocation3 + $0x148] ss:$16 sps:$4 sm:$0xff]  }
  0x6a   :  { %3691 = vmatprep.subr.bf16.mxu0 %v6491_v17  ;;  %4101 = vmatprep.subr.bf16.mxu1 %v6493_v18  ;;  %v6533_v45 = vld [vmem:[#allocation3 + $0x164] ss:$16 sps:$4 sm:$0xff]   ;;  %v6535_v46 = vld [vmem:[#allocation3 + $0x16c] ss:$16 sps:$4 sm:$0xff]   ;;  %v6537_v48 = vld [vmem:[#allocation3 + $0x160] ss:$16 sps:$4 sm:$0xff]  }
  0x6b   :  { %v92_v47 = vld [vmem:[%s7867_s0 + $0x8] sm:$0xff]  ;;  %v6543_v53 = vld [vmem:[#allocation3 + $0x180] ss:$16 sps:$4 sm:$0xff]   ;;  %vm3679_vm0 = vcmask 392192   ;;  %vm5641_vm1 = vcmask 57344  }
  0x6c   :  { %v111_v49 = vpack.c.bf16 %v92_v47, %v92_v47  ;;  %v6538_v50 = vld [vmem:[#allocation3 + $0x168] ss:$16 sps:$4 sm:$0xff]   ;;  %v6539_v51 = vld [vmem:[#allocation3 + $0x184] ss:$16 sps:$4 sm:$0xff]   ;;  %v6541_v52 = vld [vmem:[#allocation3 + $0x18c] ss:$16 sps:$4 sm:$0xff]  }
  0x6d   :  { %3692 = vmatpush1.bf16.msra.mxu0 %v6495_v19  ;;  %4102 = vmatpush1.bf16.msra.mxu1 %v6496_v20  ;;  %v6544_v54 = vld [vmem:[#allocation3 + $0x188] ss:$16 sps:$4 sm:$0xff]   ;;  %v6545_v55 = vld [vmem:[#allocation3 + $0x1a4] ss:$16 sps:$4 sm:$0xff]   ;;  %v6547_v56 = vld [vmem:[#allocation3 + $0x1ac] ss:$16 sps:$4 sm:$0xff]  }
  0x6e   :  { %3693 = vmatprep.subr.bf16.mxu0 %v6497_v21  ;;  %4103 = vmatprep.subr.bf16.mxu1 %v6499_v22  ;;  %v6549_v57 = vld [vmem:[#allocation3 + $0x1a0] ss:$16 sps:$4 sm:$0xff]   ;;  %v6550_v58 = vld [vmem:[#allocation3 + $0x1a8] ss:$16 sps:$4 sm:$0xff]   ;;  %v6551_v59 = vld [vmem:[#allocation3 + $0x1c4] ss:$16 sps:$4 sm:$0xff]  }
  0x6f   :  { %3715 = vmatprep.mubr.bf16.mxu0 %v111_v49  ;;  %4125 = vmatprep.mubr.bf16.mxu1 %v111_v49  ;;  %v6553_v60 = vld [vmem:[#allocation3 + $0x1cc] ss:$16 sps:$4 sm:$0xff]   ;;  %v6555_v61 = vld [vmem:[#allocation3 + $0x1c0] ss:$16 sps:$4 sm:$0xff]   ;;  %v6556_v62 = vld [vmem:[#allocation3 + $0x1c8] ss:$16 sps:$4 sm:$0xff]  }
  0x70   :  { %v6557_v63 = vld [vmem:[#allocation3 + $0x1e4] ss:$16 sps:$4 sm:$0xff]   ;;  %v6559_v0 = vld [vmem:[#allocation3 + $0x1ec] ss:$16 sps:$4 sm:$0xff]   ;;  %v6561_v1 = vld [vmem:[#allocation3 + $0x1e0] ss:$16 sps:$4 sm:$0xff]  }
  0x71   :  { %3694 = vmatpush1.bf16.msra.mxu0 %v6501_v23  ;;  %4104 = vmatpush1.bf16.msra.mxu1 %v6502_v24  ;;  %v6562_v2 = vld [vmem:[#allocation3 + $0x1e8] ss:$16 sps:$4 sm:$0xff]   ;;  %v91_v3 = vld [vmem:[%s7867_s0] sm:$0xff] }
  0x72   :  { %3695 = vmatprep.subr.bf16.mxu0 %v6503_v25  ;;  %4105 = vmatprep.subr.bf16.mxu1 %v6505_v26  ;;  %v6565_v4 = vld [vmem:[#allocation3 + $0x204] ss:$16 sps:$4 sm:$0xff]   ;;  %v6568_v5 = vld [vmem:[#allocation3 + $0x20c] ss:$16 sps:$4 sm:$0xff]   ;;  %v110_v6 = vpack.c.bf16 %v91_v3, %v91_v3  ;;  %v6563_v7 = vld [vmem:[#allocation3 + $0x200] ss:$16 sps:$4 sm:$0xff]  }
  0x73   :  { %v6566_v8 = vld [vmem:[#allocation3 + $0x208] ss:$16 sps:$4 sm:$0xff]   ;;  %v6571_v9 = vld [vmem:[#allocation3 + $0x224] ss:$16 sps:$4 sm:$0xff]   ;;  %v6574_v10 = vld [vmem:[#allocation3 + $0x22c] ss:$16 sps:$4 sm:$0xff]  }
  0x74   :  { %v6569_v11 = vld [vmem:[#allocation3 + $0x220] ss:$16 sps:$4 sm:$0xff]   ;;  %v6572_v12 = vld [vmem:[#allocation3 + $0x228] ss:$16 sps:$4 sm:$0xff]   ;;  %v6577_v13 = vld [vmem:[#allocation3 + $0x244] ss:$16 sps:$4 sm:$0xff]  }
  0x75   :  { %3696 = vmatpush1.bf16.msra.mxu0 %v6507_v27  ;;  %4106 = vmatpush1.bf16.msra.mxu1 %v6508_v28  ;;  %v6580_v14 = vld [vmem:[#allocation3 + $0x24c] ss:$16 sps:$4 sm:$0xff]   ;;  %v6575_v15 = vld [vmem:[#allocation3 + $0x240] ss:$16 sps:$4 sm:$0xff]   ;;  %v6578_v16 = vld [vmem:[#allocation3 + $0x248] ss:$16 sps:$4 sm:$0xff]  }
  0x76   :  { %3697 = vmatprep.subr.bf16.mxu0 %v6509_v29  ;;  %4107 = vmatprep.subr.bf16.mxu1 %v6511_v30  ;;  %v6583_v17 = vld [vmem:[#allocation3 + $0x264] ss:$16 sps:$4 sm:$0xff]   ;;  %v6586_v18 = vld [vmem:[#allocation3 + $0x26c] ss:$16 sps:$4 sm:$0xff]   ;;  %v6581_v19 = vld [vmem:[#allocation3 + $0x260] ss:$16 sps:$4 sm:$0xff]  }
  0x77   :  { %v6584_v20 = vld [vmem:[#allocation3 + $0x268] ss:$16 sps:$4 sm:$0xff]   ;;  %v6589_v21 = vld [vmem:[#allocation3 + $0x284] ss:$16 sps:$4 sm:$0xff]   ;;  %v6592_v22 = vld [vmem:[#allocation3 + $0x28c] ss:$16 sps:$4 sm:$0xff]  }
  0x78   :  { %v6587_v23 = vld [vmem:[#allocation3 + $0x280] ss:$16 sps:$4 sm:$0xff]   ;;  %v6590_v24 = vld [vmem:[#allocation3 + $0x288] ss:$16 sps:$4 sm:$0xff]   ;;  %v6595_v25 = vld [vmem:[#allocation3 + $0x2a4] ss:$16 sps:$4 sm:$0xff]  }
  0x79   :  { %3698 = vmatpush1.bf16.msra.mxu0 %v6513_v31  ;;  %4108 = vmatpush1.bf16.msra.mxu1 %v6514_v32  ;;  %v6598_v26 = vld [vmem:[#allocation3 + $0x2ac] ss:$16 sps:$4 sm:$0xff]   ;;  %v6593_v27 = vld [vmem:[#allocation3 + $0x2a0] ss:$16 sps:$4 sm:$0xff]   ;;  %v6596_v28 = vld [vmem:[#allocation3 + $0x2a8] ss:$16 sps:$4 sm:$0xff]  }
  0x7a   :  { %3699 = vmatprep.subr.bf16.mxu0 %v6515_v33  ;;  %4109 = vmatprep.subr.bf16.mxu1 %v6517_v34  ;;  %v6601_v29 = vld [vmem:[#allocation3 + $0x2c4] ss:$16 sps:$4 sm:$0xff]   ;;  %v6604_v30 = vld [vmem:[#allocation3 + $0x2cc] ss:$16 sps:$4 sm:$0xff]   ;;  %v6599_v32 = vld [vmem:[#allocation3 + $0x2c0] ss:$16 sps:$4 sm:$0xff]  }
  0x7b   :  { %v94_v31 = vld [vmem:[%s7867_s0 + $0x18] sm:$0xff]  ;;  %v6623_v49 = vld [vmem:[#allocation3 + $0x340] ss:$16 sps:$4 sm:$0xff]  }
  0x7c   :  { %v113_v33 = vpack.c.bf16 %v94_v31, %v94_v31  ;;  %v6602_v34 = vld [vmem:[#allocation3 + $0x2c8] ss:$16 sps:$4 sm:$0xff]   ;;  %v6625_v47 = vld [vmem:[#allocation3 + $0x344] ss:$16 sps:$4 sm:$0xff]  }
  0x7d   :  { %3700 = vmatpush1.bf16.msra.mxu0 %v6519_v35  ;;  %4110 = vmatpush1.bf16.msra.mxu1 %v6520_v36  ;;  %v6607_v35 = vld [vmem:[#allocation3 + $0x2e4] ss:$16 sps:$4 sm:$0xff]   ;;  %v6610_v36 = vld [vmem:[#allocation3 + $0x2ec] ss:$16 sps:$4 sm:$0xff]  }
  0x7e   :  { %3701 = vmatprep.subr.bf16.mxu0 %v6521_v37  ;;  %4111 = vmatprep.subr.bf16.mxu1 %v6523_v38  ;;  %v6605_v37 = vld [vmem:[#allocation3 + $0x2e0] ss:$16 sps:$4 sm:$0xff]   ;;  %v6608_v38 = vld [vmem:[#allocation3 + $0x2e8] ss:$16 sps:$4 sm:$0xff]   ;;  %v6655_v3 = vld [vmem:[#allocation3 + $0x3e4] ss:$16 sps:$4 sm:$0xff]  }
  0x7f   :  { %v6691_v31 = vld [vmem:[#allocation3 + $0x4a4] ss:$16 sps:$4 sm:$0xff]  }
  0x81   :  { %3702 = vmatpush1.bf16.msra.mxu0 %v6525_v39  ;;  %4112 = vmatpush1.bf16.msra.mxu1 %v6526_v40  ;;  %v6613_v39 = vld [vmem:[#allocation3 + $0x304] ss:$16 sps:$4 sm:$0xff]   ;;  %v6616_v40 = vld [vmem:[#allocation3 + $0x30c] ss:$16 sps:$4 sm:$0xff]  }
  0x82   :  { %3703 = vmatprep.subr.bf16.mxu0 %v6527_v41  ;;  %4113 = vmatprep.subr.bf16.mxu1 %v6529_v42  ;;  %v6611_v41 = vld [vmem:[#allocation3 + $0x300] ss:$16 sps:$4 sm:$0xff]   ;;  %v6614_v42 = vld [vmem:[#allocation3 + $0x308] ss:$16 sps:$4 sm:$0xff]  }
  0x85   :  { %3704 = vmatpush1.bf16.msra.mxu0 %v6531_v43  ;;  %4114 = vmatpush1.bf16.msra.mxu1 %v6532_v44  ;;  %v6619_v43 = vld [vmem:[#allocation3 + $0x324] ss:$16 sps:$4 sm:$0xff]   ;;  %v6622_v44 = vld [vmem:[#allocation3 + $0x32c] ss:$16 sps:$4 sm:$0xff]  }
  0x86   :  { %3705 = vmatprep.subr.bf16.mxu0 %v6533_v45  ;;  %4115 = vmatprep.subr.bf16.mxu1 %v6535_v46  ;;  %v6617_v45 = vld [vmem:[#allocation3 + $0x320] ss:$16 sps:$4 sm:$0xff]   ;;  %v6620_v46 = vld [vmem:[#allocation3 + $0x328] ss:$16 sps:$4 sm:$0xff]  }
  0x89   :  { %3706 = vmatpush1.bf16.msra.mxu0 %v6537_v48  ;;  %4116 = vmatpush1.bf16.msra.mxu1 %v6538_v50  ;;  %v6628_v48 = vld [vmem:[#allocation3 + $0x34c] ss:$16 sps:$4 sm:$0xff]   ;;  %v6626_v50 = vld [vmem:[#allocation3 + $0x348] ss:$16 sps:$4 sm:$0xff]  }
  0x8a   :  { %3707 = vmatprep.subr.bf16.mxu0 %v6539_v51  ;;  %4117 = vmatprep.subr.bf16.mxu1 %v6541_v52  ;;  %v6631_v51 = vld [vmem:[#allocation3 + $0x364] ss:$16 sps:$4 sm:$0xff]   ;;  %v6634_v52 = vld [vmem:[#allocation3 + $0x36c] ss:$16 sps:$4 sm:$0xff]  }
  0x8d   :  { %3708 = vmatpush1.bf16.msra.mxu0 %v6543_v53  ;;  %4118 = vmatpush1.bf16.msra.mxu1 %v6544_v54  ;;  %v6629_v53 = vld [vmem:[#allocation3 + $0x360] ss:$16 sps:$4 sm:$0xff]   ;;  %v6632_v54 = vld [vmem:[#allocation3 + $0x368] ss:$16 sps:$4 sm:$0xff]  }
  0x8e   :  { %3709 = vmatprep.subr.bf16.mxu0 %v6545_v55  ;;  %4119 = vmatprep.subr.bf16.mxu1 %v6547_v56  ;;  %v6637_v55 = vld [vmem:[#allocation3 + $0x384] ss:$16 sps:$4 sm:$0xff]   ;;  %v6640_v56 = vld [vmem:[#allocation3 + $0x38c] ss:$16 sps:$4 sm:$0xff]  }
  0x91   :  { %3710 = vmatpush1.bf16.msra.mxu0 %v6549_v57  ;;  %4120 = vmatpush1.bf16.msra.mxu1 %v6550_v58  ;;  %v6635_v57 = vld [vmem:[#allocation3 + $0x380] ss:$16 sps:$4 sm:$0xff]   ;;  %v6638_v58 = vld [vmem:[#allocation3 + $0x388] ss:$16 sps:$4 sm:$0xff]  }
  0x92   :  { %3711 = vmatprep.subr.bf16.mxu0 %v6551_v59  ;;  %4121 = vmatprep.subr.bf16.mxu1 %v6553_v60  ;;  %v6643_v59 = vld [vmem:[#allocation3 + $0x3a4] ss:$16 sps:$4 sm:$0xff]   ;;  %v6646_v60 = vld [vmem:[#allocation3 + $0x3ac] ss:$16 sps:$4 sm:$0xff]  }
  0x95   :  { %3712 = vmatpush1.bf16.msra.mxu0 %v6555_v61  ;;  %4122 = vmatpush1.bf16.msra.mxu1 %v6556_v62  ;;  %v6641_v61 = vld [vmem:[#allocation3 + $0x3a0] ss:$16 sps:$4 sm:$0xff]   ;;  %v6644_v62 = vld [vmem:[#allocation3 + $0x3a8] ss:$16 sps:$4 sm:$0xff]  }
  0x96   :  { %3713 = vmatprep.subr.bf16.mxu0 %v6557_v63  ;;  %4123 = vmatprep.subr.bf16.mxu1 %v6559_v0  ;;  %v6649_v63 = vld [vmem:[#allocation3 + $0x3c4] ss:$16 sps:$4 sm:$0xff]   ;;  %v6652_v0 = vld [vmem:[#allocation3 + $0x3cc] ss:$16 sps:$4 sm:$0xff]  }
  0x99   :  { %3714 = vmatpush1.bf16.msra.mxu0 %v6561_v1  ;;  %4124 = vmatpush1.bf16.msra.mxu1 %v6562_v2  ;;  %v6647_v1 = vld [vmem:[#allocation3 + $0x3c0] ss:$16 sps:$4 sm:$0xff]   ;;  %v6650_v2 = vld [vmem:[#allocation3 + $0x3c8] ss:$16 sps:$4 sm:$0xff]  }
  0x9a   :  { %3724 = vmatprep.subr.bf16.mxu0 %v6565_v4  ;;  %4134 = vmatprep.subr.bf16.mxu1 %v6568_v5  ;;  %v6658_v4 = vld [vmem:[#allocation3 + $0x3ec] ss:$16 sps:$4 sm:$0xff]   ;;  %v6653_v5 = vld [vmem:[#allocation3 + $0x3e0] ss:$16 sps:$4 sm:$0xff]  }
  0x9c   :  { %3716 = vmatmul.mubr.bf16.vlgmr.msra.gmra.mrb[0].mxu0 %v110_v6  ;;  %4126 = vmatmul.mubr.bf16.vlgmr.msra.gmra.mrb[0].mxu1 %v110_v6  ;;  %v6656_v6 = vld [vmem:[#allocation3 + $0x3e8] ss:$16 sps:$4 sm:$0xff]  }
  0x9d   :  { %3725 = vmatpush1.bf16.msra.mxu0 %v6563_v7  ;;  %4135 = vmatpush1.bf16.msra.mxu1 %v6566_v8  ;;  %v6661_v7 = vld [vmem:[#allocation3 + $0x404] ss:$16 sps:$4 sm:$0xff]  }
  0x9e   :  { %3726 = vmatprep.subr.bf16.mxu0 %v6571_v9  ;;  %4136 = vmatprep.subr.bf16.mxu1 %v6574_v10  ;;  %v93_v8 = vld [vmem:[%s7867_s0 + $0x10] sm:$0xff] }
  0x9f   :  { %3756 = vmatprep.mubr.bf16.mxu0 %v113_v33  ;;  %4166 = vmatprep.mubr.bf16.mxu1 %v113_v33  ;;  %v6664_v9 = vld [vmem:[#allocation3 + $0x40c] ss:$16 sps:$4 sm:$0xff]   ;;  %v6659_v10 = vld [vmem:[#allocation3 + $0x400] ss:$16 sps:$4 sm:$0xff]  }
  0xa0   :  { %v6689_v33 = vld [vmem:[#allocation3 + $0x4a0] ss:$16 sps:$4 sm:$0xff]  }
  0xa1   :  { %3727 = vmatpush1.bf16.msra.mxu0 %v6569_v11  ;;  %4137 = vmatpush1.bf16.msra.mxu1 %v6572_v12  ;;  %v6662_v11 = vld [vmem:[#allocation3 + $0x408] ss:$16 sps:$4 sm:$0xff]   ;;  %v112_v12 = vpack.c.bf16 %v93_v8, %v93_v8  ;;  %v6754_v8 = vld [vmem:[#allocation3 + $0x5ec] ss:$16 sps:$4 sm:$0xff]  }
  0xa2   :  { %3728 = vmatprep.subr.bf16.mxu0 %v6577_v13  ;;  %4138 = vmatprep.subr.bf16.mxu1 %v6580_v14  ;;  %v6667_v13 = vld [vmem:[#allocation3 + $0x424] ss:$16 sps:$4 sm:$0xff]   ;;  %v6670_v14 = vld [vmem:[#allocation3 + $0x42c] ss:$16 sps:$4 sm:$0xff]  }
  0xa5   :  { %3729 = vmatpush1.bf16.msra.mxu0 %v6575_v15  ;;  %4139 = vmatpush1.bf16.msra.mxu1 %v6578_v16  ;;  %v96_v15 = vld [vmem:[%s7867_s0 + $0x28] sm:$0xff] }
  0xa6   :  { %3730 = vmatprep.subr.bf16.mxu0 %v6583_v17  ;;  %4140 = vmatprep.subr.bf16.mxu1 %v6586_v18  ;;  %v115_v16 = vpack.c.bf16 %v96_v15, %v96_v15  ;;  %v6665_v17 = vld [vmem:[#allocation3 + $0x420] ss:$16 sps:$4 sm:$0xff]   ;;  %v6668_v18 = vld [vmem:[#allocation3 + $0x428] ss:$16 sps:$4 sm:$0xff]  }
  0xa7   :  { %v6758_v15 = vld [vmem:[#allocation3 + $0x608] ss:$16 sps:$4 sm:$0xff]  }
  0xa9   :  { %3731 = vmatpush1.bf16.msra.mxu0 %v6581_v19  ;;  %4141 = vmatpush1.bf16.msra.mxu1 %v6584_v20  ;;  %v6673_v19 = vld [vmem:[#allocation3 + $0x444] ss:$16 sps:$4 sm:$0xff]   ;;  %v6676_v20 = vld [vmem:[#allocation3 + $0x44c] ss:$16 sps:$4 sm:$0xff]  }
  0xaa   :  { %3732 = vmatprep.subr.bf16.mxu0 %v6589_v21  ;;  %4142 = vmatprep.subr.bf16.mxu1 %v6592_v22  ;;  %v6671_v21 = vld [vmem:[#allocation3 + $0x440] ss:$16 sps:$4 sm:$0xff]   ;;  %v6674_v22 = vld [vmem:[#allocation3 + $0x448] ss:$16 sps:$4 sm:$0xff]  }
  0xad   :  { %3733 = vmatpush1.bf16.msra.mxu0 %v6587_v23  ;;  %4143 = vmatpush1.bf16.msra.mxu1 %v6590_v24  ;;  %v6679_v23 = vld [vmem:[#allocation3 + $0x464] ss:$16 sps:$4 sm:$0xff]   ;;  %v6682_v24 = vld [vmem:[#allocation3 + $0x46c] ss:$16 sps:$4 sm:$0xff]  }
  0xae   :  { %3734 = vmatprep.subr.bf16.mxu0 %v6595_v25  ;;  %4144 = vmatprep.subr.bf16.mxu1 %v6598_v26  ;;  %v6677_v25 = vld [vmem:[#allocation3 + $0x460] ss:$16 sps:$4 sm:$0xff]   ;;  %v6680_v26 = vld [vmem:[#allocation3 + $0x468] ss:$16 sps:$4 sm:$0xff]  }
  0xb1   :  { %3735 = vmatpush1.bf16.msra.mxu0 %v6593_v27  ;;  %4145 = vmatpush1.bf16.msra.mxu1 %v6596_v28  ;;  %v6685_v27 = vld [vmem:[#allocation3 + $0x484] ss:$16 sps:$4 sm:$0xff]   ;;  %v6688_v28 = vld [vmem:[#allocation3 + $0x48c] ss:$16 sps:$4 sm:$0xff]  }
  0xb2   :  { %3736 = vmatprep.subr.bf16.mxu0 %v6601_v29  ;;  %4146 = vmatprep.subr.bf16.mxu1 %v6604_v30  ;;  %v6683_v29 = vld [vmem:[#allocation3 + $0x480] ss:$16 sps:$4 sm:$0xff]   ;;  %v6686_v30 = vld [vmem:[#allocation3 + $0x488] ss:$16 sps:$4 sm:$0xff]  }
  0xb5   :  { %3737 = vmatpush1.bf16.msra.mxu0 %v6599_v32  ;;  %4147 = vmatpush1.bf16.msra.mxu1 %v6602_v34  ;;  %v6694_v32 = vld [vmem:[#allocation3 + $0x4ac] ss:$16 sps:$4 sm:$0xff]   ;;  %v6692_v34 = vld [vmem:[#allocation3 + $0x4a8] ss:$16 sps:$4 sm:$0xff]  }
  0xb6   :  { %3738 = vmatprep.subr.bf16.mxu0 %v6607_v35  ;;  %4148 = vmatprep.subr.bf16.mxu1 %v6610_v36  ;;  %v6697_v35 = vld [vmem:[#allocation3 + $0x4c4] ss:$16 sps:$4 sm:$0xff]   ;;  %v6700_v36 = vld [vmem:[#allocation3 + $0x4cc] ss:$16 sps:$4 sm:$0xff]  }
  0xb9   :  { %3739 = vmatpush1.bf16.msra.mxu0 %v6605_v37  ;;  %4149 = vmatpush1.bf16.msra.mxu1 %v6608_v38  ;;  %v6695_v37 = vld [vmem:[#allocation3 + $0x4c0] ss:$16 sps:$4 sm:$0xff]   ;;  %v6698_v38 = vld [vmem:[#allocation3 + $0x4c8] ss:$16 sps:$4 sm:$0xff]  }
  0xba   :  { %3740 = vmatprep.subr.bf16.mxu0 %v6613_v39  ;;  %4150 = vmatprep.subr.bf16.mxu1 %v6616_v40  ;;  %v6703_v39 = vld [vmem:[#allocation3 + $0x4e4] ss:$16 sps:$4 sm:$0xff]   ;;  %v6706_v40 = vld [vmem:[#allocation3 + $0x4ec] ss:$16 sps:$4 sm:$0xff]  }
  0xbd   :  { %3741 = vmatpush1.bf16.msra.mxu0 %v6611_v41  ;;  %4151 = vmatpush1.bf16.msra.mxu1 %v6614_v42  ;;  %v6701_v41 = vld [vmem:[#allocation3 + $0x4e0] ss:$16 sps:$4 sm:$0xff]   ;;  %v6704_v42 = vld [vmem:[#allocation3 + $0x4e8] ss:$16 sps:$4 sm:$0xff]  }
  0xbe   :  { %3742 = vmatprep.subr.bf16.mxu0 %v6619_v43  ;;  %4152 = vmatprep.subr.bf16.mxu1 %v6622_v44  ;;  %v6709_v43 = vld [vmem:[#allocation3 + $0x504] ss:$16 sps:$4 sm:$0xff]   ;;  %v6712_v44 = vld [vmem:[#allocation3 + $0x50c] ss:$16 sps:$4 sm:$0xff]  }
  0xc1   :  { %3743 = vmatpush1.bf16.msra.mxu0 %v6617_v45  ;;  %4153 = vmatpush1.bf16.msra.mxu1 %v6620_v46  ;;  %v6707_v45 = vld [vmem:[#allocation3 + $0x500] ss:$16 sps:$4 sm:$0xff]   ;;  %v6710_v46 = vld [vmem:[#allocation3 + $0x508] ss:$16 sps:$4 sm:$0xff]  }
  0xc2   :  { %3744 = vmatprep.subr.bf16.mxu0 %v6625_v47  ;;  %4154 = vmatprep.subr.bf16.mxu1 %v6628_v48  ;;  %v6715_v47 = vld [vmem:[#allocation3 + $0x524] ss:$16 sps:$4 sm:$0xff]   ;;  %v6718_v48 = vld [vmem:[#allocation3 + $0x52c] ss:$16 sps:$4 sm:$0xff]  }
  0xc5   :  { %3745 = vmatpush1.bf16.msra.mxu0 %v6623_v49  ;;  %4155 = vmatpush1.bf16.msra.mxu1 %v6626_v50  ;;  %v6713_v49 = vld [vmem:[#allocation3 + $0x520] ss:$16 sps:$4 sm:$0xff]   ;;  %v6716_v50 = vld [vmem:[#allocation3 + $0x528] ss:$16 sps:$4 sm:$0xff]  }
  0xc6   :  { %3746 = vmatprep.subr.bf16.mxu0 %v6631_v51  ;;  %4156 = vmatprep.subr.bf16.mxu1 %v6634_v52  ;;  %v6721_v51 = vld [vmem:[#allocation3 + $0x544] ss:$16 sps:$4 sm:$0xff]   ;;  %v6724_v52 = vld [vmem:[#allocation3 + $0x54c] ss:$16 sps:$4 sm:$0xff]  }
  0xc9   :  { %3747 = vmatpush1.bf16.msra.mxu0 %v6629_v53  ;;  %4157 = vmatpush1.bf16.msra.mxu1 %v6632_v54  ;;  %v6719_v53 = vld [vmem:[#allocation3 + $0x540] ss:$16 sps:$4 sm:$0xff]   ;;  %v6722_v54 = vld [vmem:[#allocation3 + $0x548] ss:$16 sps:$4 sm:$0xff]  }
  0xca   :  { %3748 = vmatprep.subr.bf16.mxu0 %v6637_v55  ;;  %4158 = vmatprep.subr.bf16.mxu1 %v6640_v56  ;;  %v6727_v55 = vld [vmem:[#allocation3 + $0x564] ss:$16 sps:$4 sm:$0xff]   ;;  %v6730_v56 = vld [vmem:[#allocation3 + $0x56c] ss:$16 sps:$4 sm:$0xff]  }
  0xcd   :  { %3749 = vmatpush1.bf16.msra.mxu0 %v6635_v57  ;;  %4159 = vmatpush1.bf16.msra.mxu1 %v6638_v58  ;;  %v6725_v57 = vld [vmem:[#allocation3 + $0x560] ss:$16 sps:$4 sm:$0xff]   ;;  %v6728_v58 = vld [vmem:[#allocation3 + $0x568] ss:$16 sps:$4 sm:$0xff]  }
  0xce   :  { %3750 = vmatprep.subr.bf16.mxu0 %v6643_v59  ;;  %4160 = vmatprep.subr.bf16.mxu1 %v6646_v60  ;;  %v6733_v59 = vld [vmem:[#allocation3 + $0x584] ss:$16 sps:$4 sm:$0xff]   ;;  %v6736_v60 = vld [vmem:[#allocation3 + $0x58c] ss:$16 sps:$4 sm:$0xff]  }
  0xd1   :  { %3751 = vmatpush1.bf16.msra.mxu0 %v6641_v61  ;;  %4161 = vmatpush1.bf16.msra.mxu1 %v6644_v62  ;;  %v6731_v61 = vld [vmem:[#allocation3 + $0x580] ss:$16 sps:$4 sm:$0xff]   ;;  %v6734_v62 = vld [vmem:[#allocation3 + $0x588] ss:$16 sps:$4 sm:$0xff]  }
  0xd2   :  { %3752 = vmatprep.subr.bf16.mxu0 %v6649_v63  ;;  %4162 = vmatprep.subr.bf16.mxu1 %v6652_v0  ;;  %v6739_v63 = vld [vmem:[#allocation3 + $0x5a4] ss:$16 sps:$4 sm:$0xff]   ;;  %v6742_v0 = vld [vmem:[#allocation3 + $0x5ac] ss:$16 sps:$4 sm:$0xff]  }
  0xd5   :  { %3753 = vmatpush1.bf16.msra.mxu0 %v6647_v1  ;;  %4163 = vmatpush1.bf16.msra.mxu1 %v6650_v2  ;;  %v6737_v1 = vld [vmem:[#allocation3 + $0x5a0] ss:$16 sps:$4 sm:$0xff]   ;;  %v6740_v2 = vld [vmem:[#allocation3 + $0x5a8] ss:$16 sps:$4 sm:$0xff]  }
  0xd6   :  { %3754 = vmatprep.subr.bf16.mxu0 %v6655_v3  ;;  %4164 = vmatprep.subr.bf16.mxu1 %v6658_v4  ;;  %v6745_v3 = vld [vmem:[#allocation3 + $0x5c4] ss:$16 sps:$4 sm:$0xff]   ;;  %v6748_v4 = vld [vmem:[#allocation3 + $0x5cc] ss:$16 sps:$4 sm:$0xff]  }
  0xd9   :  { %3755 = vmatpush1.bf16.msra.mxu0 %v6653_v5  ;;  %4165 = vmatpush1.bf16.msra.mxu1 %v6656_v6  ;;  %v6743_v5 = vld [vmem:[#allocation3 + $0x5c0] ss:$16 sps:$4 sm:$0xff]   ;;  %v6746_v6 = vld [vmem:[#allocation3 + $0x5c8] ss:$16 sps:$4 sm:$0xff]  }
  0xda   :  { %3765 = vmatprep.subr.bf16.mxu0 %v6661_v7  ;;  %4175 = vmatprep.subr.bf16.mxu1 %v6664_v9  ;;  %v6751_v7 = vld [vmem:[#allocation3 + $0x5e4] ss:$16 sps:$4 sm:$0xff]   ;;  %v6749_v9 = vld [vmem:[#allocation3 + $0x5e0] ss:$16 sps:$4 sm:$0xff]  }
  0xdc   :  { %3757 = vmatmul.mubr.bf16.vlgmr.msra.gmra.mrb[0].mxu0 %v112_v12  ;;  %4167 = vmatmul.mubr.bf16.vlgmr.msra.gmra.mrb[0].mxu1 %v112_v12  ;;  %v95_v12 = vld [vmem:[%s7867_s0 + $0x20] sm:$0xff] }
  0xdd   :  { %3766 = vmatpush1.bf16.msra.mxu0 %v6659_v10  ;;  %4176 = vmatpush1.bf16.msra.mxu1 %v6662_v11  ;;  %v6752_v10 = vld [vmem:[#allocation3 + $0x5e8] ss:$16 sps:$4 sm:$0xff]   ;;  %v6757_v11 = vld [vmem:[#allocation3 + $0x604] ss:$16 sps:$4 sm:$0xff]  }
  0xde   :  { %3767 = vmatprep.subr.bf16.mxu0 %v6667_v13  ;;  %4177 = vmatprep.subr.bf16.mxu1 %v6670_v14  ;;  %v6760_v13 = vld [vmem:[#allocation3 + $0x60c] ss:$16 sps:$4 sm:$0xff]   ;;  %v6755_v14 = vld [vmem:[#allocation3 + $0x600] ss:$16 sps:$4 sm:$0xff]  }
  0xdf   :  { %3797 = vmatprep.mubr.bf16.mxu0 %v115_v16  ;;  %4207 = vmatprep.mubr.bf16.mxu1 %v115_v16  ;;  %v114_v16 = vpack.c.bf16 %v95_v12, %v95_v12  ;;  %v6850_v12 = vld [vmem:[#allocation3 + $0x7ec] ss:$16 sps:$4 sm:$0xff]  }
  0xe1   :  { %3768 = vmatpush1.bf16.msra.mxu0 %v6665_v17  ;;  %4178 = vmatpush1.bf16.msra.mxu1 %v6668_v18  ;;  %v98_v17 = vld [vmem:[%s7867_s0 + $0x38] sm:$0xff] }
  0xe2   :  { %3769 = vmatprep.subr.bf16.mxu0 %v6673_v19  ;;  %4179 = vmatprep.subr.bf16.mxu1 %v6676_v20  ;;  %v6763_v18 = vld [vmem:[#allocation3 + $0x624] ss:$16 sps:$4 sm:$0xff]   ;;  %v6766_v19 = vld [vmem:[#allocation3 + $0x62c] ss:$16 sps:$4 sm:$0xff]   ;;  %v117_v20 = vpack.c.bf16 %v98_v17, %v98_v17 }
  0xe3   :  { %v6856_v17 = vld [vmem:[#allocation3 + $0x80c] ss:$16 sps:$4 sm:$0xff]  }
  0xe5   :  { %3770 = vmatpush1.bf16.msra.mxu0 %v6671_v21  ;;  %4180 = vmatpush1.bf16.msra.mxu1 %v6674_v22  ;;  %v6761_v21 = vld [vmem:[#allocation3 + $0x620] ss:$16 sps:$4 sm:$0xff]   ;;  %v6764_v22 = vld [vmem:[#allocation3 + $0x628] ss:$16 sps:$4 sm:$0xff]  }
  0xe6   :  { %3771 = vmatprep.subr.bf16.mxu0 %v6679_v23  ;;  %4181 = vmatprep.subr.bf16.mxu1 %v6682_v24  ;;  %v6769_v23 = vld [vmem:[#allocation3 + $0x644] ss:$16 sps:$4 sm:$0xff]   ;;  %v6772_v24 = vld [vmem:[#allocation3 + $0x64c] ss:$16 sps:$4 sm:$0xff]  }
  0xe9   :  { %3772 = vmatpush1.bf16.msra.mxu0 %v6677_v25  ;;  %4182 = vmatpush1.bf16.msra.mxu1 %v6680_v26  ;;  %v6767_v25 = vld [vmem:[#allocation3 + $0x640] ss:$16 sps:$4 sm:$0xff]   ;;  %v6770_v26 = vld [vmem:[#allocation3 + $0x648] ss:$16 sps:$4 sm:$0xff]  }
  0xea   :  { %3773 = vmatprep.subr.bf16.mxu0 %v6685_v27  ;;  %4183 = vmatprep.subr.bf16.mxu1 %v6688_v28  ;;  %v6775_v27 = vld [vmem:[#allocation3 + $0x664] ss:$16 sps:$4 sm:$0xff]   ;;  %v6778_v28 = vld [vmem:[#allocation3 + $0x66c] ss:$16 sps:$4 sm:$0xff]  }
  0xed   :  { %3774 = vmatpush1.bf16.msra.mxu0 %v6683_v29  ;;  %4184 = vmatpush1.bf16.msra.mxu1 %v6686_v30  ;;  %v6773_v29 = vld [vmem:[#allocation3 + $0x660] ss:$16 sps:$4 sm:$0xff]   ;;  %v6776_v30 = vld [vmem:[#allocation3 + $0x668] ss:$16 sps:$4 sm:$0xff]  }
  0xee   :  { %3775 = vmatprep.subr.bf16.mxu0 %v6691_v31  ;;  %4185 = vmatprep.subr.bf16.mxu1 %v6694_v32  ;;  %v6781_v31 = vld [vmem:[#allocation3 + $0x684] ss:$16 sps:$4 sm:$0xff]   ;;  %v6784_v32 = vld [vmem:[#allocation3 + $0x68c] ss:$16 sps:$4 sm:$0xff]  }
  0xf1   :  { %3776 = vmatpush1.bf16.msra.mxu0 %v6689_v33  ;;  %4186 = vmatpush1.bf16.msra.mxu1 %v6692_v34  ;;  %v6779_v33 = vld [vmem:[#allocation3 + $0x680] ss:$16 sps:$4 sm:$0xff]   ;;  %v6782_v34 = vld [vmem:[#allocation3 + $0x688] ss:$16 sps:$4 sm:$0xff]  }
  0xf2   :  { %3777 = vmatprep.subr.bf16.mxu0 %v6697_v35  ;;  %4187 = vmatprep.subr.bf16.mxu1 %v6700_v36  ;;  %v6787_v35 = vld [vmem:[#allocation3 + $0x6a4] ss:$16 sps:$4 sm:$0xff]   ;;  %v6790_v36 = vld [vmem:[#allocation3 + $0x6ac] ss:$16 sps:$4 sm:$0xff]  }
  0xf5   :  { %3778 = vmatpush1.bf16.msra.mxu0 %v6695_v37  ;;  %4188 = vmatpush1.bf16.msra.mxu1 %v6698_v38  ;;  %v6785_v37 = vld [vmem:[#allocation3 + $0x6a0] ss:$16 sps:$4 sm:$0xff]   ;;  %v6788_v38 = vld [vmem:[#allocation3 + $0x6a8] ss:$16 sps:$4 sm:$0xff]  }
  0xf6   :  { %3779 = vmatprep.subr.bf16.mxu0 %v6703_v39  ;;  %4189 = vmatprep.subr.bf16.mxu1 %v6706_v40  ;;  %v6793_v39 = vld [vmem:[#allocation3 + $0x6c4] ss:$16 sps:$4 sm:$0xff]   ;;  %v6796_v40 = vld [vmem:[#allocation3 + $0x6cc] ss:$16 sps:$4 sm:$0xff]  }
  0xf9   :  { %3780 = vmatpush1.bf16.msra.mxu0 %v6701_v41  ;;  %4190 = vmatpush1.bf16.msra.mxu1 %v6704_v42  ;;  %v6791_v41 = vld [vmem:[#allocation3 + $0x6c0] ss:$16 sps:$4 sm:$0xff]   ;;  %v6794_v42 = vld [vmem:[#allocation3 + $0x6c8] ss:$16 sps:$4 sm:$0xff]  }
  0xfa   :  { %3781 = vmatprep.subr.bf16.mxu0 %v6709_v43  ;;  %4191 = vmatprep.subr.bf16.mxu1 %v6712_v44  ;;  %v6799_v43 = vld [vmem:[#allocation3 + $0x6e4] ss:$16 sps:$4 sm:$0xff]   ;;  %v6802_v44 = vld [vmem:[#allocation3 + $0x6ec] ss:$16 sps:$4 sm:$0xff]  }
  0xfd   :  { %3782 = vmatpush1.bf16.msra.mxu0 %v6707_v45  ;;  %4192 = vmatpush1.bf16.msra.mxu1 %v6710_v46  ;;  %v6797_v45 = vld [vmem:[#allocation3 + $0x6e0] ss:$16 sps:$4 sm:$0xff]   ;;  %v6800_v46 = vld [vmem:[#allocation3 + $0x6e8] ss:$16 sps:$4 sm:$0xff]  }
  0xfe   :  { %3783 = vmatprep.subr.bf16.mxu0 %v6715_v47  ;;  %4193 = vmatprep.subr.bf16.mxu1 %v6718_v48  ;;  %v6805_v47 = vld [vmem:[#allocation3 + $0x704] ss:$16 sps:$4 sm:$0xff]   ;;  %v6808_v48 = vld [vmem:[#allocation3 + $0x70c] ss:$16 sps:$4 sm:$0xff]  }
 0x101   :  { %3784 = vmatpush1.bf16.msra.mxu0 %v6713_v49  ;;  %4194 = vmatpush1.bf16.msra.mxu1 %v6716_v50  ;;  %v6803_v49 = vld [vmem:[#allocation3 + $0x700] ss:$16 sps:$4 sm:$0xff]   ;;  %v6806_v50 = vld [vmem:[#allocation3 + $0x708] ss:$16 sps:$4 sm:$0xff]  }
 0x102   :  { %3785 = vmatprep.subr.bf16.mxu0 %v6721_v51  ;;  %4195 = vmatprep.subr.bf16.mxu1 %v6724_v52  ;;  %v6811_v51 = vld [vmem:[#allocation3 + $0x724] ss:$16 sps:$4 sm:$0xff]   ;;  %v6814_v52 = vld [vmem:[#allocation3 + $0x72c] ss:$16 sps:$4 sm:$0xff]  }
 0x105   :  { %3786 = vmatpush1.bf16.msra.mxu0 %v6719_v53  ;;  %4196 = vmatpush1.bf16.msra.mxu1 %v6722_v54  ;;  %v6809_v53 = vld [vmem:[#allocation3 + $0x720] ss:$16 sps:$4 sm:$0xff]   ;;  %v6812_v54 = vld [vmem:[#allocation3 + $0x728] ss:$16 sps:$4 sm:$0xff]  }
 0x106   :  { %3787 = vmatprep.subr.bf16.mxu0 %v6727_v55  ;;  %4197 = vmatprep.subr.bf16.mxu1 %v6730_v56  ;;  %v6817_v55 = vld [vmem:[#allocation3 + $0x744] ss:$16 sps:$4 sm:$0xff]   ;;  %v6820_v56 = vld [vmem:[#allocation3 + $0x74c] ss:$16 sps:$4 sm:$0xff]  }
 0x109   :  { %3788 = vmatpush1.bf16.msra.mxu0 %v6725_v57  ;;  %4198 = vmatpush1.bf16.msra.mxu1 %v6728_v58  ;;  %v6815_v57 = vld [vmem:[#allocation3 + $0x740] ss:$16 sps:$4 sm:$0xff]   ;;  %v6818_v58 = vld [vmem:[#allocation3 + $0x748] ss:$16 sps:$4 sm:$0xff]  }
 0x10a   :  { %3789 = vmatprep.subr.bf16.mxu0 %v6733_v59  ;;  %4199 = vmatprep.subr.bf16.mxu1 %v6736_v60  ;;  %v6823_v59 = vld [vmem:[#allocation3 + $0x764] ss:$16 sps:$4 sm:$0xff]   ;;  %v6826_v60 = vld [vmem:[#allocation3 + $0x76c] ss:$16 sps:$4 sm:$0xff]  }
 0x10d   :  { %3790 = vmatpush1.bf16.msra.mxu0 %v6731_v61  ;;  %4200 = vmatpush1.bf16.msra.mxu1 %v6734_v62  ;;  %v6821_v61 = vld [vmem:[#allocation3 + $0x760] ss:$16 sps:$4 sm:$0xff]   ;;  %v6824_v62 = vld [vmem:[#allocation3 + $0x768] ss:$16 sps:$4 sm:$0xff]  }
 0x10e   :  { %3791 = vmatprep.subr.bf16.mxu0 %v6739_v63  ;;  %4201 = vmatprep.subr.bf16.mxu1 %v6742_v0  ;;  %v6829_v63 = vld [vmem:[#allocation3 + $0x784] ss:$16 sps:$4 sm:$0xff]   ;;  %v6832_v0 = vld [vmem:[#allocation3 + $0x78c] ss:$16 sps:$4 sm:$0xff]  }
 0x111   :  { %3792 = vmatpush1.bf16.msra.mxu0 %v6737_v1  ;;  %4202 = vmatpush1.bf16.msra.mxu1 %v6740_v2  ;;  %v6827_v1 = vld [vmem:[#allocation3 + $0x780] ss:$16 sps:$4 sm:$0xff]   ;;  %v6830_v2 = vld [vmem:[#allocation3 + $0x788] ss:$16 sps:$4 sm:$0xff]  }
 0x112   :  { %3793 = vmatprep.subr.bf16.mxu0 %v6745_v3  ;;  %4203 = vmatprep.subr.bf16.mxu1 %v6748_v4  ;;  %v6835_v3 = vld [vmem:[#allocation3 + $0x7a4] ss:$16 sps:$4 sm:$0xff]   ;;  %v6838_v4 = vld [vmem:[#allocation3 + $0x7ac] ss:$16 sps:$4 sm:$0xff]  }
 0x115   :  { %3794 = vmatpush1.bf16.msra.mxu0 %v6743_v5  ;;  %4204 = vmatpush1.bf16.msra.mxu1 %v6746_v6  ;;  %v6833_v5 = vld [vmem:[#allocation3 + $0x7a0] ss:$16 sps:$4 sm:$0xff]   ;;  %v6836_v6 = vld [vmem:[#allocation3 + $0x7a8] ss:$16 sps:$4 sm:$0xff]  }
 0x116   :  { %3795 = vmatprep.subr.bf16.mxu0 %v6751_v7  ;;  %4205 = vmatprep.subr.bf16.mxu1 %v6754_v8  ;;  %v6841_v7 = vld [vmem:[#allocation3 + $0x7c4] ss:$16 sps:$4 sm:$0xff]   ;;  %v6844_v8 = vld [vmem:[#allocation3 + $0x7cc] ss:$16 sps:$4 sm:$0xff]  }
 0x119   :  { %3796 = vmatpush1.bf16.msra.mxu0 %v6749_v9  ;;  %4206 = vmatpush1.bf16.msra.mxu1 %v6752_v10  ;;  %v6839_v9 = vld [vmem:[#allocation3 + $0x7c0] ss:$16 sps:$4 sm:$0xff]   ;;  %v6842_v10 = vld [vmem:[#allocation3 + $0x7c8] ss:$16 sps:$4 sm:$0xff]  }
 0x11a   :  { %3806 = vmatprep.subr.bf16.mxu0 %v6757_v11  ;;  %4216 = vmatprep.subr.bf16.mxu1 %v6760_v13  ;;  %v6847_v11 = vld [vmem:[#allocation3 + $0x7e4] ss:$16 sps:$4 sm:$0xff]   ;;  %v6845_v13 = vld [vmem:[#allocation3 + $0x7e0] ss:$16 sps:$4 sm:$0xff]  }
 0x11c   :  { %3798 = vmatmul.mubr.bf16.vlgmr.msra.gmra.mrb[0].mxu0 %v114_v16  ;;  %4208 = vmatmul.mubr.bf16.vlgmr.msra.gmra.mrb[0].mxu1 %v114_v16  ;;  %v6853_v16 = vld [vmem:[#allocation3 + $0x804] ss:$16 sps:$4 sm:$0xff]  }
 0x11d   :  { %3807 = vmatpush1.bf16.msra.mxu0 %v6755_v14  ;;  %4217 = vmatpush1.bf16.msra.mxu1 %v6758_v15  ;;  %v6848_v14 = vld [vmem:[#allocation3 + $0x7e8] ss:$16 sps:$4 sm:$0xff]   ;;  %v97_v15 = vld [vmem:[%s7867_s0 + $0x30] sm:$0xff] }
 0x11e   :  { %3808 = vmatprep.subr.bf16.mxu0 %v6763_v18  ;;  %4218 = vmatprep.subr.bf16.mxu1 %v6766_v19  ;;  %v116_v18 = vpack.c.bf16 %v97_v15, %v97_v15  ;;  %v100_v19 = vld [vmem:[%s7867_s0 + $0x48] sm:$0xff] }
 0x11f   :  { %3838 = vmatprep.mubr.bf16.mxu0 %v117_v20  ;;  %4248 = vmatprep.mubr.bf16.mxu1 %v117_v20  ;;  %v6851_v20 = vld [vmem:[#allocation3 + $0x800] ss:$16 sps:$4 sm:$0xff]   ;;  %v6943_v15 = vld [vmem:[#allocation3 + $0x9e4] ss:$16 sps:$4 sm:$0xff]  }
 0x121   :  { %3809 = vmatpush1.bf16.msra.mxu0 %v6761_v21  ;;  %4219 = vmatpush1.bf16.msra.mxu1 %v6764_v22  ;;  %v6854_v21 = vld [vmem:[#allocation3 + $0x808] ss:$16 sps:$4 sm:$0xff]   ;;  %v6859_v22 = vld [vmem:[#allocation3 + $0x824] ss:$16 sps:$4 sm:$0xff]  }
 0x122   :  { %3810 = vmatprep.subr.bf16.mxu0 %v6769_v23  ;;  %4220 = vmatprep.subr.bf16.mxu1 %v6772_v24  ;;  %v6862_v23 = vld [vmem:[#allocation3 + $0x82c] ss:$16 sps:$4 sm:$0xff]   ;;  %v119_v24 = vpack.c.bf16 %v100_v19, %v100_v19  ;;  %v6949_v19 = vld [vmem:[#allocation3 + $0xa04] ss:$16 sps:$4 sm:$0xff]  }
 0x125   :  { %3811 = vmatpush1.bf16.msra.mxu0 %v6767_v25  ;;  %4221 = vmatpush1.bf16.msra.mxu1 %v6770_v26  ;;  %v6857_v25 = vld [vmem:[#allocation3 + $0x820] ss:$16 sps:$4 sm:$0xff]   ;;  %v6860_v26 = vld [vmem:[#allocation3 + $0x828] ss:$16 sps:$4 sm:$0xff]  }
 0x126   :  { %3812 = vmatprep.subr.bf16.mxu0 %v6775_v27  ;;  %4222 = vmatprep.subr.bf16.mxu1 %v6778_v28  ;;  %v6865_v27 = vld [vmem:[#allocation3 + $0x844] ss:$16 sps:$4 sm:$0xff]   ;;  %v6868_v28 = vld [vmem:[#allocation3 + $0x84c] ss:$16 sps:$4 sm:$0xff]  }
 0x129   :  { %3813 = vmatpush1.bf16.msra.mxu0 %v6773_v29  ;;  %4223 = vmatpush1.bf16.msra.mxu1 %v6776_v30  ;;  %v6863_v29 = vld [vmem:[#allocation3 + $0x840] ss:$16 sps:$4 sm:$0xff]   ;;  %v6866_v30 = vld [vmem:[#allocation3 + $0x848] ss:$16 sps:$4 sm:$0xff]  }
 0x12a   :  { %3814 = vmatprep.subr.bf16.mxu0 %v6781_v31  ;;  %4224 = vmatprep.subr.bf16.mxu1 %v6784_v32  ;;  %v6871_v31 = vld [vmem:[#allocation3 + $0x864] ss:$16 sps:$4 sm:$0xff]   ;;  %v6874_v32 = vld [vmem:[#allocation3 + $0x86c] ss:$16 sps:$4 sm:$0xff]  }
 0x12d   :  { %3815 = vmatpush1.bf16.msra.mxu0 %v6779_v33  ;;  %4225 = vmatpush1.bf16.msra.mxu1 %v6782_v34  ;;  %v6869_v33 = vld [vmem:[#allocation3 + $0x860] ss:$16 sps:$4 sm:$0xff]   ;;  %v6872_v34 = vld [vmem:[#allocation3 + $0x868] ss:$16 sps:$4 sm:$0xff]  }
 0x12e   :  { %3816 = vmatprep.subr.bf16.mxu0 %v6787_v35  ;;  %4226 = vmatprep.subr.bf16.mxu1 %v6790_v36  ;;  %v6877_v35 = vld [vmem:[#allocation3 + $0x884] ss:$16 sps:$4 sm:$0xff]   ;;  %v6880_v36 = vld [vmem:[#allocation3 + $0x88c] ss:$16 sps:$4 sm:$0xff]  }
 0x131   :  { %3817 = vmatpush1.bf16.msra.mxu0 %v6785_v37  ;;  %4227 = vmatpush1.bf16.msra.mxu1 %v6788_v38  ;;  %v6875_v37 = vld [vmem:[#allocation3 + $0x880] ss:$16 sps:$4 sm:$0xff]   ;;  %v6878_v38 = vld [vmem:[#allocation3 + $0x888] ss:$16 sps:$4 sm:$0xff]  }
 0x132   :  { %3818 = vmatprep.subr.bf16.mxu0 %v6793_v39  ;;  %4228 = vmatprep.subr.bf16.mxu1 %v6796_v40  ;;  %v6883_v39 = vld [vmem:[#allocation3 + $0x8a4] ss:$16 sps:$4 sm:$0xff]   ;;  %v6886_v40 = vld [vmem:[#allocation3 + $0x8ac] ss:$16 sps:$4 sm:$0xff]  }
 0x135   :  { %3819 = vmatpush1.bf16.msra.mxu0 %v6791_v41  ;;  %4229 = vmatpush1.bf16.msra.mxu1 %v6794_v42  ;;  %v6881_v41 = vld [vmem:[#allocation3 + $0x8a0] ss:$16 sps:$4 sm:$0xff]   ;;  %v6884_v42 = vld [vmem:[#allocation3 + $0x8a8] ss:$16 sps:$4 sm:$0xff]  }
 0x136   :  { %3820 = vmatprep.subr.bf16.mxu0 %v6799_v43  ;;  %4230 = vmatprep.subr.bf16.mxu1 %v6802_v44  ;;  %v6889_v43 = vld [vmem:[#allocation3 + $0x8c4] ss:$16 sps:$4 sm:$0xff]   ;;  %v6892_v44 = vld [vmem:[#allocation3 + $0x8cc] ss:$16 sps:$4 sm:$0xff]  }
 0x139   :  { %3821 = vmatpush1.bf16.msra.mxu0 %v6797_v45  ;;  %4231 = vmatpush1.bf16.msra.mxu1 %v6800_v46  ;;  %v6887_v45 = vld [vmem:[#allocation3 + $0x8c0] ss:$16 sps:$4 sm:$0xff]   ;;  %v6890_v46 = vld [vmem:[#allocation3 + $0x8c8] ss:$16 sps:$4 sm:$0xff]  }
 0x13a   :  { %3822 = vmatprep.subr.bf16.mxu0 %v6805_v47  ;;  %4232 = vmatprep.subr.bf16.mxu1 %v6808_v48  ;;  %v6895_v47 = vld [vmem:[#allocation3 + $0x8e4] ss:$16 sps:$4 sm:$0xff]   ;;  %v6898_v48 = vld [vmem:[#allocation3 + $0x8ec] ss:$16 sps:$4 sm:$0xff]  }
 0x13d   :  { %3823 = vmatpush1.bf16.msra.mxu0 %v6803_v49  ;;  %4233 = vmatpush1.bf16.msra.mxu1 %v6806_v50  ;;  %v6893_v49 = vld [vmem:[#allocation3 + $0x8e0] ss:$16 sps:$4 sm:$0xff]   ;;  %v6896_v50 = vld [vmem:[#allocation3 + $0x8e8] ss:$16 sps:$4 sm:$0xff]  }
 0x13e   :  { %3824 = vmatprep.subr.bf16.mxu0 %v6811_v51  ;;  %4234 = vmatprep.subr.bf16.mxu1 %v6814_v52  ;;  %v6901_v51 = vld [vmem:[#allocation3 + $0x904] ss:$16 sps:$4 sm:$0xff]   ;;  %v6904_v52 = vld [vmem:[#allocation3 + $0x90c] ss:$16 sps:$4 sm:$0xff]  }
 0x141   :  { %3825 = vmatpush1.bf16.msra.mxu0 %v6809_v53  ;;  %4235 = vmatpush1.bf16.msra.mxu1 %v6812_v54  ;;  %v6899_v53 = vld [vmem:[#allocation3 + $0x900] ss:$16 sps:$4 sm:$0xff]   ;;  %v6902_v54 = vld [vmem:[#allocation3 + $0x908] ss:$16 sps:$4 sm:$0xff]  }
 0x142   :  { %3826 = vmatprep.subr.bf16.mxu0 %v6817_v55  ;;  %4236 = vmatprep.subr.bf16.mxu1 %v6820_v56  ;;  %v6907_v55 = vld [vmem:[#allocation3 + $0x924] ss:$16 sps:$4 sm:$0xff]   ;;  %v6910_v56 = vld [vmem:[#allocation3 + $0x92c] ss:$16 sps:$4 sm:$0xff]  }
 0x145   :  { %3827 = vmatpush1.bf16.msra.mxu0 %v6815_v57  ;;  %4237 = vmatpush1.bf16.msra.mxu1 %v6818_v58  ;;  %v6905_v57 = vld [vmem:[#allocation3 + $0x920] ss:$16 sps:$4 sm:$0xff]   ;;  %v6908_v58 = vld [vmem:[#allocation3 + $0x928] ss:$16 sps:$4 sm:$0xff]  }
 0x146   :  { %3828 = vmatprep.subr.bf16.mxu0 %v6823_v59  ;;  %4238 = vmatprep.subr.bf16.mxu1 %v6826_v60  ;;  %v6913_v59 = vld [vmem:[#allocation3 + $0x944] ss:$16 sps:$4 sm:$0xff]   ;;  %v6916_v60 = vld [vmem:[#allocation3 + $0x94c] ss:$16 sps:$4 sm:$0xff]  }
 0x149   :  { %3829 = vmatpush1.bf16.msra.mxu0 %v6821_v61  ;;  %4239 = vmatpush1.bf16.msra.mxu1 %v6824_v62  ;;  %v6911_v61 = vld [vmem:[#allocation3 + $0x940] ss:$16 sps:$4 sm:$0xff]   ;;  %v6914_v62 = vld [vmem:[#allocation3 + $0x948] ss:$16 sps:$4 sm:$0xff]  }
 0x14a   :  { %3830 = vmatprep.subr.bf16.mxu0 %v6829_v63  ;;  %4240 = vmatprep.subr.bf16.mxu1 %v6832_v0  ;;  %v6919_v63 = vld [vmem:[#allocation3 + $0x964] ss:$16 sps:$4 sm:$0xff]   ;;  %v6922_v0 = vld [vmem:[#allocation3 + $0x96c] ss:$16 sps:$4 sm:$0xff]  }
 0x14d   :  { %3831 = vmatpush1.bf16.msra.mxu0 %v6827_v1  ;;  %4241 = vmatpush1.bf16.msra.mxu1 %v6830_v2  ;;  %v6917_v1 = vld [vmem:[#allocation3 + $0x960] ss:$16 sps:$4 sm:$0xff]   ;;  %v6920_v2 = vld [vmem:[#allocation3 + $0x968] ss:$16 sps:$4 sm:$0xff]  }
 0x14e   :  { %3832 = vmatprep.subr.bf16.mxu0 %v6835_v3  ;;  %4242 = vmatprep.subr.bf16.mxu1 %v6838_v4  ;;  %v6925_v3 = vld [vmem:[#allocation3 + $0x984] ss:$16 sps:$4 sm:$0xff]   ;;  %v6928_v4 = vld [vmem:[#allocation3 + $0x98c] ss:$16 sps:$4 sm:$0xff]  }
 0x151   :  { %3833 = vmatpush1.bf16.msra.mxu0 %v6833_v5  ;;  %4243 = vmatpush1.bf16.msra.mxu1 %v6836_v6  ;;  %v6923_v5 = vld [vmem:[#allocation3 + $0x980] ss:$16 sps:$4 sm:$0xff]   ;;  %v6926_v6 = vld [vmem:[#allocation3 + $0x988] ss:$16 sps:$4 sm:$0xff]  }
 0x152   :  { %3834 = vmatprep.subr.bf16.mxu0 %v6841_v7  ;;  %4244 = vmatprep.subr.bf16.mxu1 %v6844_v8  ;;  %v6931_v7 = vld [vmem:[#allocation3 + $0x9a4] ss:$16 sps:$4 sm:$0xff]   ;;  %v6934_v8 = vld [vmem:[#allocation3 + $0x9ac] ss:$16 sps:$4 sm:$0xff]  }
 0x155   :  { %3835 = vmatpush1.bf16.msra.mxu0 %v6839_v9  ;;  %4245 = vmatpush1.bf16.msra.mxu1 %v6842_v10  ;;  %v6929_v9 = vld [vmem:[#allocation3 + $0x9a0] ss:$16 sps:$4 sm:$0xff]   ;;  %v6932_v10 = vld [vmem:[#allocation3 + $0x9a8] ss:$16 sps:$4 sm:$0xff]  }
 0x156   :  { %3836 = vmatprep.subr.bf16.mxu0 %v6847_v11  ;;  %4246 = vmatprep.subr.bf16.mxu1 %v6850_v12  ;;  %v6937_v11 = vld [vmem:[#allocation3 + $0x9c4] ss:$16 sps:$4 sm:$0xff]   ;;  %v6940_v12 = vld [vmem:[#allocation3 + $0x9cc] ss:$16 sps:$4 sm:$0xff]  }
 0x159   :  { %3837 = vmatpush1.bf16.msra.mxu0 %v6845_v13  ;;  %4247 = vmatpush1.bf16.msra.mxu1 %v6848_v14  ;;  %v6935_v13 = vld [vmem:[#allocation3 + $0x9c0] ss:$16 sps:$4 sm:$0xff]   ;;  %v6938_v14 = vld [vmem:[#allocation3 + $0x9c8] ss:$16 sps:$4 sm:$0xff]  }
 0x15a   :  { %3847 = vmatprep.subr.bf16.mxu0 %v6853_v16  ;;  %4257 = vmatprep.subr.bf16.mxu1 %v6856_v17  ;;  %v6946_v16 = vld [vmem:[#allocation3 + $0x9ec] ss:$16 sps:$4 sm:$0xff]   ;;  %v6941_v17 = vld [vmem:[#allocation3 + $0x9e0] ss:$16 sps:$4 sm:$0xff]  }
 0x15c   :  { %3839 = vmatmul.mubr.bf16.vlgmr.msra.gmra.mrb[0].mxu0 %v116_v18  ;;  %4249 = vmatmul.mubr.bf16.vlgmr.msra.gmra.mrb[0].mxu1 %v116_v18  ;;  %v6944_v18 = vld [vmem:[#allocation3 + $0x9e8] ss:$16 sps:$4 sm:$0xff]  }
 0x15d   :  { %3848 = vmatpush1.bf16.msra.mxu0 %v6851_v20  ;;  %4258 = vmatpush1.bf16.msra.mxu1 %v6854_v21  ;;  %v99_v20 = vld [vmem:[%s7867_s0 + $0x40] sm:$0xff] }
 0x15e   :  { %3849 = vmatprep.subr.bf16.mxu0 %v6859_v22  ;;  %4259 = vmatprep.subr.bf16.mxu1 %v6862_v23  ;;  %v6952_v21 = vld [vmem:[#allocation3 + $0xa0c] ss:$16 sps:$4 sm:$0xff]   ;;  %v118_v23 = vpack.c.bf16 %v99_v20, %v99_v20 }
 0x15f   :  { %3879 = vmatprep.mubr.bf16.mxu0 %v119_v24  ;;  %4289 = vmatprep.mubr.bf16.mxu1 %v119_v24  ;;  %v102_v22 = vld [vmem:[%s7867_s0 + $0x58] sm:$0xff]  ;;  %v6947_v24 = vld [vmem:[#allocation3 + $0xa00] ss:$16 sps:$4 sm:$0xff]  }
 0x160   :  { %v7042_v20 = vld [vmem:[#allocation3 + $0xbec] ss:$16 sps:$4 sm:$0xff]  }
 0x161   :  { %3850 = vmatpush1.bf16.msra.mxu0 %v6857_v25  ;;  %4260 = vmatpush1.bf16.msra.mxu1 %v6860_v26  ;;  %v6950_v25 = vld [vmem:[#allocation3 + $0xa08] ss:$16 sps:$4 sm:$0xff]   ;;  %v6955_v26 = vld [vmem:[#allocation3 + $0xa24] ss:$16 sps:$4 sm:$0xff]  }
 0x162   :  { %3851 = vmatprep.subr.bf16.mxu0 %v6865_v27  ;;  %4261 = vmatprep.subr.bf16.mxu1 %v6868_v28  ;;  %v6958_v27 = vld [vmem:[#allocation3 + $0xa2c] ss:$16 sps:$4 sm:$0xff]   ;;  %v121_v28 = vpack.c.bf16 %v102_v22, %v102_v22  ;;  %v7040_v22 = vld [vmem:[#allocation3 + $0xbe8] ss:$16 sps:$4 sm:$0xff]  }
 0x165   :  { %3852 = vmatpush1.bf16.msra.mxu0 %v6863_v29  ;;  %4262 = vmatpush1.bf16.msra.mxu1 %v6866_v30  ;;  %v6953_v29 = vld [vmem:[#allocation3 + $0xa20] ss:$16 sps:$4 sm:$0xff]   ;;  %v6956_v30 = vld [vmem:[#allocation3 + $0xa28] ss:$16 sps:$4 sm:$0xff]  }
 0x166   :  { %3853 = vmatprep.subr.bf16.mxu0 %v6871_v31  ;;  %4263 = vmatprep.subr.bf16.mxu1 %v6874_v32  ;;  %v6961_v31 = vld [vmem:[#allocation3 + $0xa44] ss:$16 sps:$4 sm:$0xff]   ;;  %v6964_v32 = vld [vmem:[#allocation3 + $0xa4c] ss:$16 sps:$4 sm:$0xff]  }
 0x169   :  { %3854 = vmatpush1.bf16.msra.mxu0 %v6869_v33  ;;  %4264 = vmatpush1.bf16.msra.mxu1 %v6872_v34  ;;  %v6959_v33 = vld [vmem:[#allocation3 + $0xa40] ss:$16 sps:$4 sm:$0xff]   ;;  %v6962_v34 = vld [vmem:[#allocation3 + $0xa48] ss:$16 sps:$4 sm:$0xff]  }
 0x16a   :  { %3855 = vmatprep.subr.bf16.mxu0 %v6877_v35  ;;  %4265 = vmatprep.subr.bf16.mxu1 %v6880_v36  ;;  %v6967_v35 = vld [vmem:[#allocation3 + $0xa64] ss:$16 sps:$4 sm:$0xff]   ;;  %v6970_v36 = vld [vmem:[#allocation3 + $0xa6c] ss:$16 sps:$4 sm:$0xff]  }
 0x16d   :  { %3856 = vmatpush1.bf16.msra.mxu0 %v6875_v37  ;;  %4266 = vmatpush1.bf16.msra.mxu1 %v6878_v38  ;;  %v6965_v37 = vld [vmem:[#allocation3 + $0xa60] ss:$16 sps:$4 sm:$0xff]   ;;  %v6968_v38 = vld [vmem:[#allocation3 + $0xa68] ss:$16 sps:$4 sm:$0xff]  }
 0x16e   :  { %3857 = vmatprep.subr.bf16.mxu0 %v6883_v39  ;;  %4267 = vmatprep.subr.bf16.mxu1 %v6886_v40  ;;  %v6973_v39 = vld [vmem:[#allocation3 + $0xa84] ss:$16 sps:$4 sm:$0xff]   ;;  %v6976_v40 = vld [vmem:[#allocation3 + $0xa8c] ss:$16 sps:$4 sm:$0xff]  }
 0x171   :  { %3858 = vmatpush1.bf16.msra.mxu0 %v6881_v41  ;;  %4268 = vmatpush1.bf16.msra.mxu1 %v6884_v42  ;;  %v6971_v41 = vld [vmem:[#allocation3 + $0xa80] ss:$16 sps:$4 sm:$0xff]   ;;  %v6974_v42 = vld [vmem:[#allocation3 + $0xa88] ss:$16 sps:$4 sm:$0xff]  }
 0x172   :  { %3859 = vmatprep.subr.bf16.mxu0 %v6889_v43  ;;  %4269 = vmatprep.subr.bf16.mxu1 %v6892_v44  ;;  %v6979_v43 = vld [vmem:[#allocation3 + $0xaa4] ss:$16 sps:$4 sm:$0xff]   ;;  %v6982_v44 = vld [vmem:[#allocation3 + $0xaac] ss:$16 sps:$4 sm:$0xff]  }
 0x175   :  { %3860 = vmatpush1.bf16.msra.mxu0 %v6887_v45  ;;  %4270 = vmatpush1.bf16.msra.mxu1 %v6890_v46  ;;  %v6977_v45 = vld [vmem:[#allocation3 + $0xaa0] ss:$16 sps:$4 sm:$0xff]   ;;  %v6980_v46 = vld [vmem:[#allocation3 + $0xaa8] ss:$16 sps:$4 sm:$0xff]  }
 0x176   :  { %3861 = vmatprep.subr.bf16.mxu0 %v6895_v47  ;;  %4271 = vmatprep.subr.bf16.mxu1 %v6898_v48  ;;  %v6985_v47 = vld [vmem:[#allocation3 + $0xac4] ss:$16 sps:$4 sm:$0xff]   ;;  %v6988_v48 = vld [vmem:[#allocation3 + $0xacc] ss:$16 sps:$4 sm:$0xff]  }
 0x179   :  { %3862 = vmatpush1.bf16.msra.mxu0 %v6893_v49  ;;  %4272 = vmatpush1.bf16.msra.mxu1 %v6896_v50  ;;  %v6983_v49 = vld [vmem:[#allocation3 + $0xac0] ss:$16 sps:$4 sm:$0xff]   ;;  %v6986_v50 = vld [vmem:[#allocation3 + $0xac8] ss:$16 sps:$4 sm:$0xff]  }
 0x17a   :  { %3863 = vmatprep.subr.bf16.mxu0 %v6901_v51  ;;  %4273 = vmatprep.subr.bf16.mxu1 %v6904_v52  ;;  %v6991_v51 = vld [vmem:[#allocation3 + $0xae4] ss:$16 sps:$4 sm:$0xff]   ;;  %v6994_v52 = vld [vmem:[#allocation3 + $0xaec] ss:$16 sps:$4 sm:$0xff]  }
 0x17d   :  { %3864 = vmatpush1.bf16.msra.mxu0 %v6899_v53  ;;  %4274 = vmatpush1.bf16.msra.mxu1 %v6902_v54  ;;  %v6989_v53 = vld [vmem:[#allocation3 + $0xae0] ss:$16 sps:$4 sm:$0xff]   ;;  %v6992_v54 = vld [vmem:[#allocation3 + $0xae8] ss:$16 sps:$4 sm:$0xff]  }
 0x17e   :  { %3865 = vmatprep.subr.bf16.mxu0 %v6907_v55  ;;  %4275 = vmatprep.subr.bf16.mxu1 %v6910_v56  ;;  %v6997_v55 = vld [vmem:[#allocation3 + $0xb04] ss:$16 sps:$4 sm:$0xff]   ;;  %v7000_v56 = vld [vmem:[#allocation3 + $0xb0c] ss:$16 sps:$4 sm:$0xff]  }
 0x181   :  { %3866 = vmatpush1.bf16.msra.mxu0 %v6905_v57  ;;  %4276 = vmatpush1.bf16.msra.mxu1 %v6908_v58  ;;  %v6995_v57 = vld [vmem:[#allocation3 + $0xb00] ss:$16 sps:$4 sm:$0xff]   ;;  %v6998_v58 = vld [vmem:[#allocation3 + $0xb08] ss:$16 sps:$4 sm:$0xff]  }
 0x182   :  { %3867 = vmatprep.subr.bf16.mxu0 %v6913_v59  ;;  %4277 = vmatprep.subr.bf16.mxu1 %v6916_v60  ;;  %v7003_v59 = vld [vmem:[#allocation3 + $0xb24] ss:$16 sps:$4 sm:$0xff]   ;;  %v7006_v60 = vld [vmem:[#allocation3 + $0xb2c] ss:$16 sps:$4 sm:$0xff]  }
 0x185   :  { %3868 = vmatpush1.bf16.msra.mxu0 %v6911_v61  ;;  %4278 = vmatpush1.bf16.msra.mxu1 %v6914_v62  ;;  %v7001_v61 = vld [vmem:[#allocation3 + $0xb20] ss:$16 sps:$4 sm:$0xff]   ;;  %v7004_v62 = vld [vmem:[#allocation3 + $0xb28] ss:$16 sps:$4 sm:$0xff]  }
 0x186   :  { %3869 = vmatprep.subr.bf16.mxu0 %v6919_v63  ;;  %4279 = vmatprep.subr.bf16.mxu1 %v6922_v0  ;;  %v7009_v63 = vld [vmem:[#allocation3 + $0xb44] ss:$16 sps:$4 sm:$0xff]   ;;  %v7012_v0 = vld [vmem:[#allocation3 + $0xb4c] ss:$16 sps:$4 sm:$0xff]  }
 0x189   :  { %3870 = vmatpush1.bf16.msra.mxu0 %v6917_v1  ;;  %4280 = vmatpush1.bf16.msra.mxu1 %v6920_v2  ;;  %v7007_v1 = vld [vmem:[#allocation3 + $0xb40] ss:$16 sps:$4 sm:$0xff]   ;;  %v7010_v2 = vld [vmem:[#allocation3 + $0xb48] ss:$16 sps:$4 sm:$0xff]  }
 0x18a   :  { %3871 = vmatprep.subr.bf16.mxu0 %v6925_v3  ;;  %4281 = vmatprep.subr.bf16.mxu1 %v6928_v4  ;;  %v7015_v3 = vld [vmem:[#allocation3 + $0xb64] ss:$16 sps:$4 sm:$0xff]   ;;  %v7018_v4 = vld [vmem:[#allocation3 + $0xb6c] ss:$16 sps:$4 sm:$0xff]  }
 0x18d   :  { %3872 = vmatpush1.bf16.msra.mxu0 %v6923_v5  ;;  %4282 = vmatpush1.bf16.msra.mxu1 %v6926_v6  ;;  %v7013_v5 = vld [vmem:[#allocation3 + $0xb60] ss:$16 sps:$4 sm:$0xff]   ;;  %v7016_v6 = vld [vmem:[#allocation3 + $0xb68] ss:$16 sps:$4 sm:$0xff]  }
 0x18e   :  { %3873 = vmatprep.subr.bf16.mxu0 %v6931_v7  ;;  %4283 = vmatprep.subr.bf16.mxu1 %v6934_v8  ;;  %v7021_v7 = vld [vmem:[#allocation3 + $0xb84] ss:$16 sps:$4 sm:$0xff]   ;;  %v7024_v8 = vld [vmem:[#allocation3 + $0xb8c] ss:$16 sps:$4 sm:$0xff]  }
 0x191   :  { %3874 = vmatpush1.bf16.msra.mxu0 %v6929_v9  ;;  %4284 = vmatpush1.bf16.msra.mxu1 %v6932_v10  ;;  %v7019_v9 = vld [vmem:[#allocation3 + $0xb80] ss:$16 sps:$4 sm:$0xff]   ;;  %v7022_v10 = vld [vmem:[#allocation3 + $0xb88] ss:$16 sps:$4 sm:$0xff]  }
 0x192   :  { %3875 = vmatprep.subr.bf16.mxu0 %v6937_v11  ;;  %4285 = vmatprep.subr.bf16.mxu1 %v6940_v12  ;;  %v7027_v11 = vld [vmem:[#allocation3 + $0xba4] ss:$16 sps:$4 sm:$0xff]   ;;  %v7030_v12 = vld [vmem:[#allocation3 + $0xbac] ss:$16 sps:$4 sm:$0xff]  }
 0x195   :  { %3876 = vmatpush1.bf16.msra.mxu0 %v6935_v13  ;;  %4286 = vmatpush1.bf16.msra.mxu1 %v6938_v14  ;;  %v7025_v13 = vld [vmem:[#allocation3 + $0xba0] ss:$16 sps:$4 sm:$0xff]   ;;  %v7028_v14 = vld [vmem:[#allocation3 + $0xba8] ss:$16 sps:$4 sm:$0xff]  }
 0x196   :  { %3877 = vmatprep.subr.bf16.mxu0 %v6943_v15  ;;  %4287 = vmatprep.subr.bf16.mxu1 %v6946_v16  ;;  %v7033_v15 = vld [vmem:[#allocation3 + $0xbc4] ss:$16 sps:$4 sm:$0xff]   ;;  %v7036_v16 = vld [vmem:[#allocation3 + $0xbcc] ss:$16 sps:$4 sm:$0xff]  }
 0x199   :  { %3878 = vmatpush1.bf16.msra.mxu0 %v6941_v17  ;;  %4288 = vmatpush1.bf16.msra.mxu1 %v6944_v18  ;;  %v7031_v17 = vld [vmem:[#allocation3 + $0xbc0] ss:$16 sps:$4 sm:$0xff]   ;;  %v7034_v18 = vld [vmem:[#allocation3 + $0xbc8] ss:$16 sps:$4 sm:$0xff]  }
 0x19a   :  { %3888 = vmatprep.subr.bf16.mxu0 %v6949_v19  ;;  %4298 = vmatprep.subr.bf16.mxu1 %v6952_v21  ;;  %v7039_v19 = vld [vmem:[#allocation3 + $0xbe4] ss:$16 sps:$4 sm:$0xff]   ;;  %v7037_v21 = vld [vmem:[#allocation3 + $0xbe0] ss:$16 sps:$4 sm:$0xff]  }
 0x19c   :  { %3880 = vmatmul.mubr.bf16.vlgmr.msra.gmra.mrb[0].mxu0 %v118_v23  ;;  %4290 = vmatmul.mubr.bf16.vlgmr.msra.gmra.mrb[0].mxu1 %v118_v23  ;;  %v7045_v23 = vld [vmem:[#allocation3 + $0xc04] ss:$16 sps:$4 sm:$0xff]  }
 0x19d   :  { %3889 = vmatpush1.bf16.msra.mxu0 %v6947_v24  ;;  %4299 = vmatpush1.bf16.msra.mxu1 %v6950_v25  ;;  %v101_v24 = vld [vmem:[%s7867_s0 + $0x50] sm:$0xff] }
 0x19e   :  { %3890 = vmatprep.subr.bf16.mxu0 %v6955_v26  ;;  %4300 = vmatprep.subr.bf16.mxu1 %v6958_v27  ;;  %v7048_v25 = vld [vmem:[#allocation3 + $0xc0c] ss:$16 sps:$4 sm:$0xff]   ;;  %v120_v27 = vpack.c.bf16 %v101_v24, %v101_v24 }
 0x19f   :  { %3920 = vmatprep.mubr.bf16.mxu0 %v121_v28  ;;  %4330 = vmatprep.mubr.bf16.mxu1 %v121_v28  ;;  %v104_v26 = vld [vmem:[%s7867_s0 + $0x68] sm:$0xff]  ;;  %v7043_v28 = vld [vmem:[#allocation3 + $0xc00] ss:$16 sps:$4 sm:$0xff]  }
 0x1a0   :  { %v7138_v24 = vld [vmem:[#allocation3 + $0xdec] ss:$16 sps:$4 sm:$0xff]  }
 0x1a1   :  { %3891 = vmatpush1.bf16.msra.mxu0 %v6953_v29  ;;  %4301 = vmatpush1.bf16.msra.mxu1 %v6956_v30  ;;  %v7046_v29 = vld [vmem:[#allocation3 + $0xc08] ss:$16 sps:$4 sm:$0xff]   ;;  %v7051_v30 = vld [vmem:[#allocation3 + $0xc24] ss:$16 sps:$4 sm:$0xff]  }
 0x1a2   :  { %3892 = vmatprep.subr.bf16.mxu0 %v6961_v31  ;;  %4302 = vmatprep.subr.bf16.mxu1 %v6964_v32  ;;  %v7054_v31 = vld [vmem:[#allocation3 + $0xc2c] ss:$16 sps:$4 sm:$0xff]   ;;  %v123_v32 = vpack.c.bf16 %v104_v26, %v104_v26  ;;  %v7136_v26 = vld [vmem:[#allocation3 + $0xde8] ss:$16 sps:$4 sm:$0xff]  }
 0x1a5   :  { %3893 = vmatpush1.bf16.msra.mxu0 %v6959_v33  ;;  %4303 = vmatpush1.bf16.msra.mxu1 %v6962_v34  ;;  %v7049_v33 = vld [vmem:[#allocation3 + $0xc20] ss:$16 sps:$4 sm:$0xff]   ;;  %v7052_v34 = vld [vmem:[#allocation3 + $0xc28] ss:$16 sps:$4 sm:$0xff]  }
 0x1a6   :  { %3894 = vmatprep.subr.bf16.mxu0 %v6967_v35  ;;  %4304 = vmatprep.subr.bf16.mxu1 %v6970_v36  ;;  %v7057_v35 = vld [vmem:[#allocation3 + $0xc44] ss:$16 sps:$4 sm:$0xff]   ;;  %v7060_v36 = vld [vmem:[#allocation3 + $0xc4c] ss:$16 sps:$4 sm:$0xff]  }
 0x1a9   :  { %3895 = vmatpush1.bf16.msra.mxu0 %v6965_v37  ;;  %4305 = vmatpush1.bf16.msra.mxu1 %v6968_v38  ;;  %v7055_v37 = vld [vmem:[#allocation3 + $0xc40] ss:$16 sps:$4 sm:$0xff]   ;;  %v7058_v38 = vld [vmem:[#allocation3 + $0xc48] ss:$16 sps:$4 sm:$0xff]  }
 0x1aa   :  { %3896 = vmatprep.subr.bf16.mxu0 %v6973_v39  ;;  %4306 = vmatprep.subr.bf16.mxu1 %v6976_v40  ;;  %v7063_v39 = vld [vmem:[#allocation3 + $0xc64] ss:$16 sps:$4 sm:$0xff]   ;;  %v7066_v40 = vld [vmem:[#allocation3 + $0xc6c] ss:$16 sps:$4 sm:$0xff]  }
 0x1ad   :  { %3897 = vmatpush1.bf16.msra.mxu0 %v6971_v41  ;;  %4307 = vmatpush1.bf16.msra.mxu1 %v6974_v42  ;;  %v7061_v41 = vld [vmem:[#allocation3 + $0xc60] ss:$16 sps:$4 sm:$0xff]   ;;  %v7064_v42 = vld [vmem:[#allocation3 + $0xc68] ss:$16 sps:$4 sm:$0xff]  }
 0x1ae   :  { %3898 = vmatprep.subr.bf16.mxu0 %v6979_v43  ;;  %4308 = vmatprep.subr.bf16.mxu1 %v6982_v44  ;;  %v7069_v43 = vld [vmem:[#allocation3 + $0xc84] ss:$16 sps:$4 sm:$0xff]   ;;  %v7072_v44 = vld [vmem:[#allocation3 + $0xc8c] ss:$16 sps:$4 sm:$0xff]  }
 0x1b1   :  { %3899 = vmatpush1.bf16.msra.mxu0 %v6977_v45  ;;  %4309 = vmatpush1.bf16.msra.mxu1 %v6980_v46  ;;  %v7067_v45 = vld [vmem:[#allocation3 + $0xc80] ss:$16 sps:$4 sm:$0xff]   ;;  %v7070_v46 = vld [vmem:[#allocation3 + $0xc88] ss:$16 sps:$4 sm:$0xff]  }
 0x1b2   :  { %3900 = vmatprep.subr.bf16.mxu0 %v6985_v47  ;;  %4310 = vmatprep.subr.bf16.mxu1 %v6988_v48  ;;  %v7075_v47 = vld [vmem:[#allocation3 + $0xca4] ss:$16 sps:$4 sm:$0xff]   ;;  %v7078_v48 = vld [vmem:[#allocation3 + $0xcac] ss:$16 sps:$4 sm:$0xff]  }
 0x1b5   :  { %3901 = vmatpush1.bf16.msra.mxu0 %v6983_v49  ;;  %4311 = vmatpush1.bf16.msra.mxu1 %v6986_v50  ;;  %v7073_v49 = vld [vmem:[#allocation3 + $0xca0] ss:$16 sps:$4 sm:$0xff]   ;;  %v7076_v50 = vld [vmem:[#allocation3 + $0xca8] ss:$16 sps:$4 sm:$0xff]  }
 0x1b6   :  { %3902 = vmatprep.subr.bf16.mxu0 %v6991_v51  ;;  %4312 = vmatprep.subr.bf16.mxu1 %v6994_v52  ;;  %v7081_v51 = vld [vmem:[#allocation3 + $0xcc4] ss:$16 sps:$4 sm:$0xff]   ;;  %v7084_v52 = vld [vmem:[#allocation3 + $0xccc] ss:$16 sps:$4 sm:$0xff]  }
 0x1b9   :  { %3903 = vmatpush1.bf16.msra.mxu0 %v6989_v53  ;;  %4313 = vmatpush1.bf16.msra.mxu1 %v6992_v54  ;;  %v7079_v53 = vld [vmem:[#allocation3 + $0xcc0] ss:$16 sps:$4 sm:$0xff]   ;;  %v7082_v54 = vld [vmem:[#allocation3 + $0xcc8] ss:$16 sps:$4 sm:$0xff]  }
 0x1ba   :  { %3904 = vmatprep.subr.bf16.mxu0 %v6997_v55  ;;  %4314 = vmatprep.subr.bf16.mxu1 %v7000_v56  ;;  %v7087_v55 = vld [vmem:[#allocation3 + $0xce4] ss:$16 sps:$4 sm:$0xff]   ;;  %v7090_v56 = vld [vmem:[#allocation3 + $0xcec] ss:$16 sps:$4 sm:$0xff]  }
 0x1bd   :  { %3905 = vmatpush1.bf16.msra.mxu0 %v6995_v57  ;;  %4315 = vmatpush1.bf16.msra.mxu1 %v6998_v58  ;;  %v7085_v57 = vld [vmem:[#allocation3 + $0xce0] ss:$16 sps:$4 sm:$0xff]   ;;  %v7088_v58 = vld [vmem:[#allocation3 + $0xce8] ss:$16 sps:$4 sm:$0xff]  }
 0x1be   :  { %3906 = vmatprep.subr.bf16.mxu0 %v7003_v59  ;;  %4316 = vmatprep.subr.bf16.mxu1 %v7006_v60  ;;  %v7093_v59 = vld [vmem:[#allocation3 + $0xd04] ss:$16 sps:$4 sm:$0xff]   ;;  %v7096_v60 = vld [vmem:[#allocation3 + $0xd0c] ss:$16 sps:$4 sm:$0xff]  }
 0x1c1   :  { %3907 = vmatpush1.bf16.msra.mxu0 %v7001_v61  ;;  %4317 = vmatpush1.bf16.msra.mxu1 %v7004_v62  ;;  %v7091_v61 = vld [vmem:[#allocation3 + $0xd00] ss:$16 sps:$4 sm:$0xff]   ;;  %v7094_v62 = vld [vmem:[#allocation3 + $0xd08] ss:$16 sps:$4 sm:$0xff]  }
 0x1c2   :  { %3908 = vmatprep.subr.bf16.mxu0 %v7009_v63  ;;  %4318 = vmatprep.subr.bf16.mxu1 %v7012_v0  ;;  %v7099_v63 = vld [vmem:[#allocation3 + $0xd24] ss:$16 sps:$4 sm:$0xff]   ;;  %v7102_v0 = vld [vmem:[#allocation3 + $0xd2c] ss:$16 sps:$4 sm:$0xff]  }
 0x1c5   :  { %3909 = vmatpush1.bf16.msra.mxu0 %v7007_v1  ;;  %4319 = vmatpush1.bf16.msra.mxu1 %v7010_v2  ;;  %v7097_v1 = vld [vmem:[#allocation3 + $0xd20] ss:$16 sps:$4 sm:$0xff]   ;;  %v7100_v2 = vld [vmem:[#allocation3 + $0xd28] ss:$16 sps:$4 sm:$0xff]  }
 0x1c6   :  { %3910 = vmatprep.subr.bf16.mxu0 %v7015_v3  ;;  %4320 = vmatprep.subr.bf16.mxu1 %v7018_v4  ;;  %v7105_v3 = vld [vmem:[#allocation3 + $0xd44] ss:$16 sps:$4 sm:$0xff]   ;;  %v7108_v4 = vld [vmem:[#allocation3 + $0xd4c] ss:$16 sps:$4 sm:$0xff]  }
 0x1c9   :  { %3911 = vmatpush1.bf16.msra.mxu0 %v7013_v5  ;;  %4321 = vmatpush1.bf16.msra.mxu1 %v7016_v6  ;;  %v7103_v5 = vld [vmem:[#allocation3 + $0xd40] ss:$16 sps:$4 sm:$0xff]   ;;  %v7106_v6 = vld [vmem:[#allocation3 + $0xd48] ss:$16 sps:$4 sm:$0xff]  }
 0x1ca   :  { %3912 = vmatprep.subr.bf16.mxu0 %v7021_v7  ;;  %4322 = vmatprep.subr.bf16.mxu1 %v7024_v8  ;;  %v7111_v7 = vld [vmem:[#allocation3 + $0xd64] ss:$16 sps:$4 sm:$0xff]   ;;  %v7114_v8 = vld [vmem:[#allocation3 + $0xd6c] ss:$16 sps:$4 sm:$0xff]  }
 0x1cd   :  { %3913 = vmatpush1.bf16.msra.mxu0 %v7019_v9  ;;  %4323 = vmatpush1.bf16.msra.mxu1 %v7022_v10  ;;  %v7109_v9 = vld [vmem:[#allocation3 + $0xd60] ss:$16 sps:$4 sm:$0xff]   ;;  %v7112_v10 = vld [vmem:[#allocation3 + $0xd68] ss:$16 sps:$4 sm:$0xff]  }
 0x1ce   :  { %3914 = vmatprep.subr.bf16.mxu0 %v7027_v11  ;;  %4324 = vmatprep.subr.bf16.mxu1 %v7030_v12  ;;  %v7117_v11 = vld [vmem:[#allocation3 + $0xd84] ss:$16 sps:$4 sm:$0xff]   ;;  %v7120_v12 = vld [vmem:[#allocation3 + $0xd8c] ss:$16 sps:$4 sm:$0xff]  }
 0x1d1   :  { %3915 = vmatpush1.bf16.msra.mxu0 %v7025_v13  ;;  %4325 = vmatpush1.bf16.msra.mxu1 %v7028_v14  ;;  %v7115_v13 = vld [vmem:[#allocation3 + $0xd80] ss:$16 sps:$4 sm:$0xff]   ;;  %v7118_v14 = vld [vmem:[#allocation3 + $0xd88] ss:$16 sps:$4 sm:$0xff]  }
 0x1d2   :  { %3916 = vmatprep.subr.bf16.mxu0 %v7033_v15  ;;  %4326 = vmatprep.subr.bf16.mxu1 %v7036_v16  ;;  %v7123_v15 = vld [vmem:[#allocation3 + $0xda4] ss:$16 sps:$4 sm:$0xff]   ;;  %v7126_v16 = vld [vmem:[#allocation3 + $0xdac] ss:$16 sps:$4 sm:$0xff]  }
 0x1d5   :  { %3917 = vmatpush1.bf16.msra.mxu0 %v7031_v17  ;;  %4327 = vmatpush1.bf16.msra.mxu1 %v7034_v18  ;;  %v7121_v17 = vld [vmem:[#allocation3 + $0xda0] ss:$16 sps:$4 sm:$0xff]   ;;  %v7124_v18 = vld [vmem:[#allocation3 + $0xda8] ss:$16 sps:$4 sm:$0xff]  }
 0x1d6   :  { %3918 = vmatprep.subr.bf16.mxu0 %v7039_v19  ;;  %4328 = vmatprep.subr.bf16.mxu1 %v7042_v20  ;;  %v7129_v19 = vld [vmem:[#allocation3 + $0xdc4] ss:$16 sps:$4 sm:$0xff]   ;;  %v7132_v20 = vld [vmem:[#allocation3 + $0xdcc] ss:$16 sps:$4 sm:$0xff]  }
 0x1d9   :  { %3919 = vmatpush1.bf16.msra.mxu0 %v7037_v21  ;;  %4329 = vmatpush1.bf16.msra.mxu1 %v7040_v22  ;;  %v7127_v21 = vld [vmem:[#allocation3 + $0xdc0] ss:$16 sps:$4 sm:$0xff]   ;;  %v7130_v22 = vld [vmem:[#allocation3 + $0xdc8] ss:$16 sps:$4 sm:$0xff]  }
 0x1da   :  { %3929 = vmatprep.subr.bf16.mxu0 %v7045_v23  ;;  %4339 = vmatprep.subr.bf16.mxu1 %v7048_v25  ;;  %v7135_v23 = vld [vmem:[#allocation3 + $0xde4] ss:$16 sps:$4 sm:$0xff]   ;;  %v7133_v25 = vld [vmem:[#allocation3 + $0xde0] ss:$16 sps:$4 sm:$0xff]  }
 0x1dc   :  { %3921 = vmatmul.mubr.bf16.vlgmr.msra.gmra.mrb[0].mxu0 %v120_v27  ;;  %4331 = vmatmul.mubr.bf16.vlgmr.msra.gmra.mrb[0].mxu1 %v120_v27  ;;  %v103_v27 = vld [vmem:[%s7867_s0 + $0x60] sm:$0xff] }
 0x1dd   :  { %3930 = vmatpush1.bf16.msra.mxu0 %v7043_v28  ;;  %4340 = vmatpush1.bf16.msra.mxu1 %v7046_v29  ;;  %v7141_v28 = vld [vmem:[#allocation3 + $0xe04] ss:$16 sps:$4 sm:$0xff]   ;;  %v7144_v29 = vld [vmem:[#allocation3 + $0xe0c] ss:$16 sps:$4 sm:$0xff]  }
 0x1de   :  { %3931 = vmatprep.subr.bf16.mxu0 %v7051_v30  ;;  %4341 = vmatprep.subr.bf16.mxu1 %v7054_v31  ;;  %v122_v30 = vpack.c.bf16 %v103_v27, %v103_v27  ;;  %v106_v31 = vld [vmem:[%s7867_s0 + $0x78] sm:$0xff] }
 0x1df   :  { %3961 = vmatprep.mubr.bf16.mxu0 %v123_v32  ;;  %4371 = vmatprep.mubr.bf16.mxu1 %v123_v32  ;;  %v7139_v32 = vld [vmem:[#allocation3 + $0xe00] ss:$16 sps:$4 sm:$0xff]   ;;  %v7226_v27 = vld [vmem:[#allocation3 + $0xfc8] ss:$16 sps:$4 sm:$0xff]  }
 0x1e1   :  { %3932 = vmatpush1.bf16.msra.mxu0 %v7049_v33  ;;  %4342 = vmatpush1.bf16.msra.mxu1 %v7052_v34  ;;  %v7142_v33 = vld [vmem:[#allocation3 + $0xe08] ss:$16 sps:$4 sm:$0xff]   ;;  %v7147_v34 = vld [vmem:[#allocation3 + $0xe24] ss:$16 sps:$4 sm:$0xff]  }
 0x1e2   :  { %3933 = vmatprep.subr.bf16.mxu0 %v7057_v35  ;;  %4343 = vmatprep.subr.bf16.mxu1 %v7060_v36  ;;  %v7150_v35 = vld [vmem:[#allocation3 + $0xe2c] ss:$16 sps:$4 sm:$0xff]   ;;  %v125_v36 = vpack.c.bf16 %v106_v31, %v106_v31  ;;  %v7232_v31 = vld [vmem:[#allocation3 + $0xfe8] ss:$16 sps:$4 sm:$0xff]  }
 0x1e5   :  { %3934 = vmatpush1.bf16.msra.mxu0 %v7055_v37  ;;  %4344 = vmatpush1.bf16.msra.mxu1 %v7058_v38  ;;  %v7145_v37 = vld [vmem:[#allocation3 + $0xe20] ss:$16 sps:$4 sm:$0xff]   ;;  %v7148_v38 = vld [vmem:[#allocation3 + $0xe28] ss:$16 sps:$4 sm:$0xff]  }
 0x1e6   :  { %3935 = vmatprep.subr.bf16.mxu0 %v7063_v39  ;;  %4345 = vmatprep.subr.bf16.mxu1 %v7066_v40  ;;  %v7153_v39 = vld [vmem:[#allocation3 + $0xe44] ss:$16 sps:$4 sm:$0xff]   ;;  %v7156_v40 = vld [vmem:[#allocation3 + $0xe4c] ss:$16 sps:$4 sm:$0xff]  }
 0x1e9   :  { %3936 = vmatpush1.bf16.msra.mxu0 %v7061_v41  ;;  %4346 = vmatpush1.bf16.msra.mxu1 %v7064_v42  ;;  %v7151_v41 = vld [vmem:[#allocation3 + $0xe40] ss:$16 sps:$4 sm:$0xff]   ;;  %v7154_v42 = vld [vmem:[#allocation3 + $0xe48] ss:$16 sps:$4 sm:$0xff]  }
 0x1ea   :  { %3937 = vmatprep.subr.bf16.mxu0 %v7069_v43  ;;  %4347 = vmatprep.subr.bf16.mxu1 %v7072_v44  ;;  %v7159_v43 = vld [vmem:[#allocation3 + $0xe64] ss:$16 sps:$4 sm:$0xff]   ;;  %v7162_v44 = vld [vmem:[#allocation3 + $0xe6c] ss:$16 sps:$4 sm:$0xff]  }
 0x1ed   :  { %3938 = vmatpush1.bf16.msra.mxu0 %v7067_v45  ;;  %4348 = vmatpush1.bf16.msra.mxu1 %v7070_v46  ;;  %v7157_v45 = vld [vmem:[#allocation3 + $0xe60] ss:$16 sps:$4 sm:$0xff]   ;;  %v7160_v46 = vld [vmem:[#allocation3 + $0xe68] ss:$16 sps:$4 sm:$0xff]  }
 0x1ee   :  { %3939 = vmatprep.subr.bf16.mxu0 %v7075_v47  ;;  %4349 = vmatprep.subr.bf16.mxu1 %v7078_v48  ;;  %v7165_v47 = vld [vmem:[#allocation3 + $0xe84] ss:$16 sps:$4 sm:$0xff]   ;;  %v7168_v48 = vld [vmem:[#allocation3 + $0xe8c] ss:$16 sps:$4 sm:$0xff]  }
 0x1f1   :  { %3940 = vmatpush1.bf16.msra.mxu0 %v7073_v49  ;;  %4350 = vmatpush1.bf16.msra.mxu1 %v7076_v50  ;;  %v7664_v49 = vmov 0   ;;  %v7163_v50 = vld [vmem:[#allocation3 + $0xe80] ss:$16 sps:$4 sm:$0xff]  }
 0x1f2   :  { %3941 = vmatprep.subr.bf16.mxu0 %v7081_v51  ;;  %4351 = vmatprep.subr.bf16.mxu1 %v7084_v52  ;;  %v7166_v51 = vld [vmem:[#allocation3 + $0xe88] ss:$16 sps:$4 sm:$0xff]   ;;  %v7171_v52 = vld [vmem:[#allocation3 + $0xea4] ss:$16 sps:$4 sm:$0xff]  }
 0x1f3   :  { %6466 = vset.pattern.permute.xlu0 %v7664_v49 }
 0x1f5   :  { %3942 = vmatpush1.bf16.msra.mxu0 %v7079_v53  ;;  %4352 = vmatpush1.bf16.msra.mxu1 %v7082_v54  ;;  %v7174_v53 = vld [vmem:[#allocation3 + $0xeac] ss:$16 sps:$4 sm:$0xff]   ;;  %v7169_v54 = vld [vmem:[#allocation3 + $0xea0] ss:$16 sps:$4 sm:$0xff]  }
 0x1f6   :  { %3943 = vmatprep.subr.bf16.mxu0 %v7087_v55  ;;  %4353 = vmatprep.subr.bf16.mxu1 %v7090_v56  ;;  %v7172_v55 = vld [vmem:[#allocation3 + $0xea8] ss:$16 sps:$4 sm:$0xff]   ;;  %v7177_v56 = vld [vmem:[#allocation3 + $0xec4] ss:$16 sps:$4 sm:$0xff]  }
 0x1f9   :  { %3944 = vmatpush1.bf16.msra.mxu0 %v7085_v57  ;;  %4354 = vmatpush1.bf16.msra.mxu1 %v7088_v58  ;;  %v7180_v57 = vld [vmem:[#allocation3 + $0xecc] ss:$16 sps:$4 sm:$0xff]   ;;  %v7175_v58 = vld [vmem:[#allocation3 + $0xec0] ss:$16 sps:$4 sm:$0xff]  }
 0x1fa   :  { %3945 = vmatprep.subr.bf16.mxu0 %v7093_v59  ;;  %4355 = vmatprep.subr.bf16.mxu1 %v7096_v60  ;;  %v7178_v59 = vld [vmem:[#allocation3 + $0xec8] ss:$16 sps:$4 sm:$0xff]   ;;  %v7183_v60 = vld [vmem:[#allocation3 + $0xee4] ss:$16 sps:$4 sm:$0xff]  }
 0x1fd   :  { %3946 = vmatpush1.bf16.msra.mxu0 %v7091_v61  ;;  %4356 = vmatpush1.bf16.msra.mxu1 %v7094_v62  ;;  %v7186_v61 = vld [vmem:[#allocation3 + $0xeec] ss:$16 sps:$4 sm:$0xff]   ;;  %v7181_v62 = vld [vmem:[#allocation3 + $0xee0] ss:$16 sps:$4 sm:$0xff]  }
 0x1fe   :  { %3947 = vmatprep.subr.bf16.mxu0 %v7099_v63  ;;  %4357 = vmatprep.subr.bf16.mxu1 %v7102_v0  ;;  %v7184_v63 = vld [vmem:[#allocation3 + $0xee8] ss:$16 sps:$4 sm:$0xff]   ;;  %v7189_v0 = vld [vmem:[#allocation3 + $0xf04] ss:$16 sps:$4 sm:$0xff]  }
 0x201   :  { %3948 = vmatpush1.bf16.msra.mxu0 %v7097_v1  ;;  %4358 = vmatpush1.bf16.msra.mxu1 %v7100_v2  ;;  %v7192_v1 = vld [vmem:[#allocation3 + $0xf0c] ss:$16 sps:$4 sm:$0xff]   ;;  %v7187_v2 = vld [vmem:[#allocation3 + $0xf00] ss:$16 sps:$4 sm:$0xff]  }
 0x202   :  { %3949 = vmatprep.subr.bf16.mxu0 %v7105_v3  ;;  %4359 = vmatprep.subr.bf16.mxu1 %v7108_v4  ;;  %v7190_v3 = vld [vmem:[#allocation3 + $0xf08] ss:$16 sps:$4 sm:$0xff]   ;;  %v7195_v4 = vld [vmem:[#allocation3 + $0xf24] ss:$16 sps:$4 sm:$0xff]  }
 0x205   :  { %3950 = vmatpush1.bf16.msra.mxu0 %v7103_v5  ;;  %4360 = vmatpush1.bf16.msra.mxu1 %v7106_v6  ;;  %v7198_v5 = vld [vmem:[#allocation3 + $0xf2c] ss:$16 sps:$4 sm:$0xff]   ;;  %v7193_v6 = vld [vmem:[#allocation3 + $0xf20] ss:$16 sps:$4 sm:$0xff]  }
 0x206   :  { %3951 = vmatprep.subr.bf16.mxu0 %v7111_v7  ;;  %4361 = vmatprep.subr.bf16.mxu1 %v7114_v8  ;;  %v7196_v7 = vld [vmem:[#allocation3 + $0xf28] ss:$16 sps:$4 sm:$0xff]   ;;  %v7201_v8 = vld [vmem:[#allocation3 + $0xf44] ss:$16 sps:$4 sm:$0xff]  }
 0x209   :  { %3952 = vmatpush1.bf16.msra.mxu0 %v7109_v9  ;;  %4362 = vmatpush1.bf16.msra.mxu1 %v7112_v10  ;;  %v7204_v9 = vld [vmem:[#allocation3 + $0xf4c] ss:$16 sps:$4 sm:$0xff]   ;;  %v7199_v10 = vld [vmem:[#allocation3 + $0xf40] ss:$16 sps:$4 sm:$0xff]  }
 0x20a   :  { %3953 = vmatprep.subr.bf16.mxu0 %v7117_v11  ;;  %4363 = vmatprep.subr.bf16.mxu1 %v7120_v12  ;;  %v7202_v11 = vld [vmem:[#allocation3 + $0xf48] ss:$16 sps:$4 sm:$0xff]   ;;  %v7207_v12 = vld [vmem:[#allocation3 + $0xf64] ss:$16 sps:$4 sm:$0xff]  }
 0x20d   :  { %3954 = vmatpush1.bf16.msra.mxu0 %v7115_v13  ;;  %4364 = vmatpush1.bf16.msra.mxu1 %v7118_v14  ;;  %v7210_v13 = vld [vmem:[#allocation3 + $0xf6c] ss:$16 sps:$4 sm:$0xff]   ;;  %v7205_v14 = vld [vmem:[#allocation3 + $0xf60] ss:$16 sps:$4 sm:$0xff]  }
 0x20e   :  { %3955 = vmatprep.subr.bf16.mxu0 %v7123_v15  ;;  %4365 = vmatprep.subr.bf16.mxu1 %v7126_v16  ;;  %v7208_v15 = vld [vmem:[#allocation3 + $0xf68] ss:$16 sps:$4 sm:$0xff]   ;;  %v7213_v16 = vld [vmem:[#allocation3 + $0xf84] ss:$16 sps:$4 sm:$0xff]  }
 0x211   :  { %3956 = vmatpush1.bf16.msra.mxu0 %v7121_v17  ;;  %4366 = vmatpush1.bf16.msra.mxu1 %v7124_v18  ;;  %v7216_v17 = vld [vmem:[#allocation3 + $0xf8c] ss:$16 sps:$4 sm:$0xff]   ;;  %v7211_v18 = vld [vmem:[#allocation3 + $0xf80] ss:$16 sps:$4 sm:$0xff]  }
 0x212   :  { %3957 = vmatprep.subr.bf16.mxu0 %v7129_v19  ;;  %4367 = vmatprep.subr.bf16.mxu1 %v7132_v20  ;;  %v7214_v19 = vld [vmem:[#allocation3 + $0xf88] ss:$16 sps:$4 sm:$0xff]   ;;  %v7219_v20 = vld [vmem:[#allocation3 + $0xfa4] ss:$16 sps:$4 sm:$0xff]  }
 0x215   :  { %3958 = vmatpush1.bf16.msra.mxu0 %v7127_v21  ;;  %4368 = vmatpush1.bf16.msra.mxu1 %v7130_v22  ;;  %v7222_v21 = vld [vmem:[#allocation3 + $0xfac] ss:$16 sps:$4 sm:$0xff]   ;;  %v7217_v22 = vld [vmem:[#allocation3 + $0xfa0] ss:$16 sps:$4 sm:$0xff]  }
 0x216   :  { %3959 = vmatprep.subr.bf16.mxu0 %v7135_v23  ;;  %4369 = vmatprep.subr.bf16.mxu1 %v7138_v24  ;;  %v7220_v23 = vld [vmem:[#allocation3 + $0xfa8] ss:$16 sps:$4 sm:$0xff]   ;;  %v7225_v24 = vld [vmem:[#allocation3 + $0xfc4] ss:$16 sps:$4 sm:$0xff]  }
 0x219   :  { %3960 = vmatpush1.bf16.msra.mxu0 %v7133_v25  ;;  %4370 = vmatpush1.bf16.msra.mxu1 %v7136_v26  ;;  %v7228_v25 = vld [vmem:[#allocation3 + $0xfcc] ss:$16 sps:$4 sm:$0xff]   ;;  %v7223_v26 = vld [vmem:[#allocation3 + $0xfc0] ss:$16 sps:$4 sm:$0xff]  }
 0x21a   :  { %3970 = vmatprep.subr.bf16.mxu0 %v7141_v28  ;;  %4380 = vmatprep.subr.bf16.mxu1 %v7144_v29  ;;  %v7231_v28 = vld [vmem:[#allocation3 + $0xfe4] ss:$16 sps:$4 sm:$0xff]   ;;  %v7234_v29 = vld [vmem:[#allocation3 + $0xfec] ss:$16 sps:$4 sm:$0xff]  }
 0x21c   :  { %3962 = vmatmul.mubr.bf16.vlgmr.msra.gmra.mrb[0].mxu0 %v122_v30  ;;  %4372 = vmatmul.mubr.bf16.vlgmr.msra.gmra.mrb[0].mxu1 %v122_v30  ;;  %v7229_v30 = vld [vmem:[#allocation3 + $0xfe0] ss:$16 sps:$4 sm:$0xff]  }
 0x21d   :  { %3971 = vmatpush1.bf16.msra.mxu0 %v7139_v32  ;;  %4381 = vmatpush1.bf16.msra.mxu1 %v7142_v33  ;;  %v105_v32 = vld [vmem:[%s7867_s0 + $0x70] sm:$0xff] }
 0x21e   :  { %3972 = vmatprep.subr.bf16.mxu0 %v7147_v34  ;;  %4382 = vmatprep.subr.bf16.mxu1 %v7150_v35  ;;  %v7237_v33 = vld [vmem:[#allocation3 + $0x1004] ss:$16 sps:$4 sm:$0xff]   ;;  %v7240_v34 = vld [vmem:[#allocation3 + $0x100c] ss:$16 sps:$4 sm:$0xff]   ;;  %v124_v35 = vpack.c.bf16 %v105_v32, %v105_v32  ;;  %v7322_v32 = vld [vmem:[#allocation3 + $0x11c8] ss:$16 sps:$4 sm:$0xff]  }
 0x21f   :  { %4002 = vmatprep.mubr.bf16.mxu0 %v125_v36  ;;  %4412 = vmatprep.mubr.bf16.mxu1 %v125_v36  ;;  %v108_v36 = vld [vmem:[%s7867_s0 + $0x88] sm:$0xff] }
 0x221   :  { %3973 = vmatpush1.bf16.msra.mxu0 %v7145_v37  ;;  %4383 = vmatpush1.bf16.msra.mxu1 %v7148_v38  ;;  %v7235_v37 = vld [vmem:[#allocation3 + $0x1000] ss:$16 sps:$4 sm:$0xff]   ;;  %v7238_v38 = vld [vmem:[#allocation3 + $0x1008] ss:$16 sps:$4 sm:$0xff]  }
 0x222   :  { %3974 = vmatprep.subr.bf16.mxu0 %v7153_v39  ;;  %4384 = vmatprep.subr.bf16.mxu1 %v7156_v40  ;;  %v7243_v39 = vld [vmem:[#allocation3 + $0x1024] ss:$16 sps:$4 sm:$0xff]   ;;  %v7246_v40 = vld [vmem:[#allocation3 + $0x102c] ss:$16 sps:$4 sm:$0xff]  }
 0x225   :  { %3975 = vmatpush1.bf16.msra.mxu0 %v7151_v41  ;;  %4385 = vmatpush1.bf16.msra.mxu1 %v7154_v42  ;;  %v127_v41 = vpack.c.bf16 %v108_v36, %v108_v36  ;;  %v7241_v42 = vld [vmem:[#allocation3 + $0x1020] ss:$16 sps:$4 sm:$0xff]   ;;  %v7328_v36 = vld [vmem:[#allocation3 + $0x11e8] ss:$16 sps:$4 sm:$0xff]  }
 0x226   :  { %3976 = vmatprep.subr.bf16.mxu0 %v7159_v43  ;;  %4386 = vmatprep.subr.bf16.mxu1 %v7162_v44  ;;  %v7244_v43 = vld [vmem:[#allocation3 + $0x1028] ss:$16 sps:$4 sm:$0xff]   ;;  %v7249_v44 = vld [vmem:[#allocation3 + $0x1044] ss:$16 sps:$4 sm:$0xff]  }
 0x229   :  { %3977 = vmatpush1.bf16.msra.mxu0 %v7157_v45  ;;  %4387 = vmatpush1.bf16.msra.mxu1 %v7160_v46  ;;  %v7252_v45 = vld [vmem:[#allocation3 + $0x104c] ss:$16 sps:$4 sm:$0xff]   ;;  %v7247_v46 = vld [vmem:[#allocation3 + $0x1040] ss:$16 sps:$4 sm:$0xff]  }
 0x22a   :  { %3978 = vmatprep.subr.bf16.mxu0 %v7165_v47  ;;  %4388 = vmatprep.subr.bf16.mxu1 %v7168_v48  ;;  %v7250_v47 = vld [vmem:[#allocation3 + $0x1048] ss:$16 sps:$4 sm:$0xff]   ;;  %v7255_v48 = vld [vmem:[#allocation3 + $0x1064] ss:$16 sps:$4 sm:$0xff]  }
 0x22d   :  { %3979 = vmatpush1.bf16.msra.mxu0 %v7163_v50  ;;  %4389 = vmatpush1.bf16.msra.mxu1 %v7166_v51  ;;  %v7258_v50 = vld [vmem:[#allocation3 + $0x106c] ss:$16 sps:$4 sm:$0xff]   ;;  %v7253_v51 = vld [vmem:[#allocation3 + $0x1060] ss:$16 sps:$4 sm:$0xff]  }
 0x22e   :  { %3980 = vmatprep.subr.bf16.mxu0 %v7171_v52  ;;  %4390 = vmatprep.subr.bf16.mxu1 %v7174_v53  ;;  %v7256_v52 = vld [vmem:[#allocation3 + $0x1068] ss:$16 sps:$4 sm:$0xff]   ;;  %v7261_v53 = vld [vmem:[#allocation3 + $0x1084] ss:$16 sps:$4 sm:$0xff]  }
 0x231   :  { %3981 = vmatpush1.bf16.msra.mxu0 %v7169_v54  ;;  %4391 = vmatpush1.bf16.msra.mxu1 %v7172_v55  ;;  %v7264_v54 = vld [vmem:[#allocation3 + $0x108c] ss:$16 sps:$4 sm:$0xff]   ;;  %v7259_v55 = vld [vmem:[#allocation3 + $0x1080] ss:$16 sps:$4 sm:$0xff]  }
 0x232   :  { %3982 = vmatprep.subr.bf16.mxu0 %v7177_v56  ;;  %4392 = vmatprep.subr.bf16.mxu1 %v7180_v57  ;;  %v7262_v56 = vld [vmem:[#allocation3 + $0x1088] ss:$16 sps:$4 sm:$0xff]   ;;  %v7267_v57 = vld [vmem:[#allocation3 + $0x10a4] ss:$16 sps:$4 sm:$0xff]  }
 0x235   :  { %3983 = vmatpush1.bf16.msra.mxu0 %v7175_v58  ;;  %4393 = vmatpush1.bf16.msra.mxu1 %v7178_v59  ;;  %v7270_v58 = vld [vmem:[#allocation3 + $0x10ac] ss:$16 sps:$4 sm:$0xff]   ;;  %v7265_v59 = vld [vmem:[#allocation3 + $0x10a0] ss:$16 sps:$4 sm:$0xff]  }
 0x236   :  { %3984 = vmatprep.subr.bf16.mxu0 %v7183_v60  ;;  %4394 = vmatprep.subr.bf16.mxu1 %v7186_v61  ;;  %v7268_v60 = vld [vmem:[#allocation3 + $0x10a8] ss:$16 sps:$4 sm:$0xff]   ;;  %v7273_v61 = vld [vmem:[#allocation3 + $0x10c4] ss:$16 sps:$4 sm:$0xff]  }
 0x239   :  { %3985 = vmatpush1.bf16.msra.mxu0 %v7181_v62  ;;  %4395 = vmatpush1.bf16.msra.mxu1 %v7184_v63  ;;  %v7276_v62 = vld [vmem:[#allocation3 + $0x10cc] ss:$16 sps:$4 sm:$0xff]   ;;  %v7271_v63 = vld [vmem:[#allocation3 + $0x10c0] ss:$16 sps:$4 sm:$0xff]  }
 0x23a   :  { %3986 = vmatprep.subr.bf16.mxu0 %v7189_v0  ;;  %4396 = vmatprep.subr.bf16.mxu1 %v7192_v1  ;;  %v7274_v0 = vld [vmem:[#allocation3 + $0x10c8] ss:$16 sps:$4 sm:$0xff]   ;;  %v7279_v1 = vld [vmem:[#allocation3 + $0x10e4] ss:$16 sps:$4 sm:$0xff]  }
 0x23d   :  { %3987 = vmatpush1.bf16.msra.mxu0 %v7187_v2  ;;  %4397 = vmatpush1.bf16.msra.mxu1 %v7190_v3  ;;  %v7282_v2 = vld [vmem:[#allocation3 + $0x10ec] ss:$16 sps:$4 sm:$0xff]   ;;  %v7277_v3 = vld [vmem:[#allocation3 + $0x10e0] ss:$16 sps:$4 sm:$0xff]  }
 0x23e   :  { %3988 = vmatprep.subr.bf16.mxu0 %v7195_v4  ;;  %4398 = vmatprep.subr.bf16.mxu1 %v7198_v5  ;;  %v7280_v4 = vld [vmem:[#allocation3 + $0x10e8] ss:$16 sps:$4 sm:$0xff]   ;;  %v7285_v5 = vld [vmem:[#allocation3 + $0x1104] ss:$16 sps:$4 sm:$0xff]  }
 0x241   :  { %3989 = vmatpush1.bf16.msra.mxu0 %v7193_v6  ;;  %4399 = vmatpush1.bf16.msra.mxu1 %v7196_v7  ;;  %v7288_v6 = vld [vmem:[#allocation3 + $0x110c] ss:$16 sps:$4 sm:$0xff]   ;;  %v7283_v7 = vld [vmem:[#allocation3 + $0x1100] ss:$16 sps:$4 sm:$0xff]  }
 0x242   :  { %3990 = vmatprep.subr.bf16.mxu0 %v7201_v8  ;;  %4400 = vmatprep.subr.bf16.mxu1 %v7204_v9  ;;  %v7286_v8 = vld [vmem:[#allocation3 + $0x1108] ss:$16 sps:$4 sm:$0xff]   ;;  %v7291_v9 = vld [vmem:[#allocation3 + $0x1124] ss:$16 sps:$4 sm:$0xff]  }
 0x245   :  { %3991 = vmatpush1.bf16.msra.mxu0 %v7199_v10  ;;  %4401 = vmatpush1.bf16.msra.mxu1 %v7202_v11  ;;  %v7294_v10 = vld [vmem:[#allocation3 + $0x112c] ss:$16 sps:$4 sm:$0xff]   ;;  %v7289_v11 = vld [vmem:[#allocation3 + $0x1120] ss:$16 sps:$4 sm:$0xff]  }
 0x246   :  { %3992 = vmatprep.subr.bf16.mxu0 %v7207_v12  ;;  %4402 = vmatprep.subr.bf16.mxu1 %v7210_v13  ;;  %v7292_v12 = vld [vmem:[#allocation3 + $0x1128] ss:$16 sps:$4 sm:$0xff]   ;;  %v7297_v13 = vld [vmem:[#allocation3 + $0x1144] ss:$16 sps:$4 sm:$0xff]  }
 0x249   :  { %3993 = vmatpush1.bf16.msra.mxu0 %v7205_v14  ;;  %4403 = vmatpush1.bf16.msra.mxu1 %v7208_v15  ;;  %v7300_v14 = vld [vmem:[#allocation3 + $0x114c] ss:$16 sps:$4 sm:$0xff]   ;;  %v7295_v15 = vld [vmem:[#allocation3 + $0x1140] ss:$16 sps:$4 sm:$0xff]  }
 0x24a   :  { %3994 = vmatprep.subr.bf16.mxu0 %v7213_v16  ;;  %4404 = vmatprep.subr.bf16.mxu1 %v7216_v17  ;;  %v7298_v16 = vld [vmem:[#allocation3 + $0x1148] ss:$16 sps:$4 sm:$0xff]   ;;  %v7303_v17 = vld [vmem:[#allocation3 + $0x1164] ss:$16 sps:$4 sm:$0xff]  }
 0x24d   :  { %3995 = vmatpush1.bf16.msra.mxu0 %v7211_v18  ;;  %4405 = vmatpush1.bf16.msra.mxu1 %v7214_v19  ;;  %v7306_v18 = vld [vmem:[#allocation3 + $0x116c] ss:$16 sps:$4 sm:$0xff]   ;;  %v7301_v19 = vld [vmem:[#allocation3 + $0x1160] ss:$16 sps:$4 sm:$0xff]  }
 0x24e   :  { %3996 = vmatprep.subr.bf16.mxu0 %v7219_v20  ;;  %4406 = vmatprep.subr.bf16.mxu1 %v7222_v21  ;;  %v7304_v20 = vld [vmem:[#allocation3 + $0x1168] ss:$16 sps:$4 sm:$0xff]   ;;  %v7309_v21 = vld [vmem:[#allocation3 + $0x1184] ss:$16 sps:$4 sm:$0xff]  }
 0x251   :  { %3997 = vmatpush1.bf16.msra.mxu0 %v7217_v22  ;;  %4407 = vmatpush1.bf16.msra.mxu1 %v7220_v23  ;;  %v7312_v22 = vld [vmem:[#allocation3 + $0x118c] ss:$16 sps:$4 sm:$0xff]   ;;  %v7307_v23 = vld [vmem:[#allocation3 + $0x1180] ss:$16 sps:$4 sm:$0xff]  }
 0x252   :  { %3998 = vmatprep.subr.bf16.mxu0 %v7225_v24  ;;  %4408 = vmatprep.subr.bf16.mxu1 %v7228_v25  ;;  %v7310_v24 = vld [vmem:[#allocation3 + $0x1188] ss:$16 sps:$4 sm:$0xff]   ;;  %v7315_v25 = vld [vmem:[#allocation3 + $0x11a4] ss:$16 sps:$4 sm:$0xff]  }
 0x255   :  { %3999 = vmatpush1.bf16.msra.mxu0 %v7223_v26  ;;  %4409 = vmatpush1.bf16.msra.mxu1 %v7226_v27  ;;  %v7318_v26 = vld [vmem:[#allocation3 + $0x11ac] ss:$16 sps:$4 sm:$0xff]   ;;  %v7313_v27 = vld [vmem:[#allocation3 + $0x11a0] ss:$16 sps:$4 sm:$0xff]  }
 0x256   :  { %4000 = vmatprep.subr.bf16.mxu0 %v7231_v28  ;;  %4410 = vmatprep.subr.bf16.mxu1 %v7234_v29  ;;  %v7316_v28 = vld [vmem:[#allocation3 + $0x11a8] ss:$16 sps:$4 sm:$0xff]   ;;  %v7321_v29 = vld [vmem:[#allocation3 + $0x11c4] ss:$16 sps:$4 sm:$0xff]  }
 0x259   :  { %4001 = vmatpush1.bf16.msra.mxu0 %v7229_v30  ;;  %4411 = vmatpush1.bf16.msra.mxu1 %v7232_v31  ;;  %v7324_v30 = vld [vmem:[#allocation3 + $0x11cc] ss:$16 sps:$4 sm:$0xff]   ;;  %v7319_v31 = vld [vmem:[#allocation3 + $0x11c0] ss:$16 sps:$4 sm:$0xff]  }
 0x25a   :  { %4011 = vmatprep.subr.bf16.mxu0 %v7237_v33  ;;  %4421 = vmatprep.subr.bf16.mxu1 %v7240_v34  ;;  %v7327_v33 = vld [vmem:[#allocation3 + $0x11e4] ss:$16 sps:$4 sm:$0xff]   ;;  %v7330_v34 = vld [vmem:[#allocation3 + $0x11ec] ss:$16 sps:$4 sm:$0xff]  }
 0x25c   :  { %4003 = vmatmul.mubr.bf16.vlgmr.msra.gmra.mrb[0].mxu0 %v124_v35  ;;  %4413 = vmatmul.mubr.bf16.vlgmr.msra.gmra.mrb[0].mxu1 %v124_v35  ;;  %v7325_v35 = vld [vmem:[#allocation3 + $0x11e0] ss:$16 sps:$4 sm:$0xff]  }
 0x25d   :  { %4012 = vmatpush1.bf16.msra.mxu0 %v7235_v37  ;;  %4422 = vmatpush1.bf16.msra.mxu1 %v7238_v38  ;;  %v107_v37 = vld [vmem:[%s7867_s0 + $0x80] sm:$0xff] }
 0x25e   :  { %4013 = vmatprep.subr.bf16.mxu0 %v7243_v39  ;;  %4423 = vmatprep.subr.bf16.mxu1 %v7246_v40  ;;  %v7333_v38 = vld [vmem:[#allocation3 + $0x1204] ss:$16 sps:$4 sm:$0xff]   ;;  %v7336_v39 = vld [vmem:[#allocation3 + $0x120c] ss:$16 sps:$4 sm:$0xff]   ;;  %v126_v40 = vpack.c.bf16 %v107_v37, %v107_v37  ;;  %v7423_v37 = vld [vmem:[#allocation7 + $0x184] ss:$16 sps:$4 sm:$0xff]  }
 0x25f   :  { %4043 = vmatprep.mubr.bf16.mxu0 %v127_v41  ;;  %4453 = vmatprep.mubr.bf16.mxu1 %v127_v41  ;;  %v7331_v41 = vld [vmem:[#allocation3 + $0x1200] ss:$16 sps:$4 sm:$0xff]  }
 0x261   :  { %4014 = vmatpush1.bf16.msra.mxu0 %v7241_v42  ;;  %4424 = vmatpush1.bf16.msra.mxu1 %v7244_v43  ;;  %v7334_v42 = vld [vmem:[#allocation3 + $0x1208] ss:$16 sps:$4 sm:$0xff]   ;;  %v7339_v43 = vld [vmem:[#allocation3 + $0x1224] ss:$16 sps:$4 sm:$0xff]  }
 0x262   :  { %4015 = vmatprep.subr.bf16.mxu0 %v7249_v44  ;;  %4425 = vmatprep.subr.bf16.mxu1 %v7252_v45  ;;  %v7342_v44 = vld [vmem:[#allocation3 + $0x122c] ss:$16 sps:$4 sm:$0xff]   ;;  %v7337_v45 = vld [vmem:[#allocation3 + $0x1220] ss:$16 sps:$4 sm:$0xff]  }
 0x265   :  { %4016 = vmatpush1.bf16.msra.mxu0 %v7247_v46  ;;  %4426 = vmatpush1.bf16.msra.mxu1 %v7250_v47  ;;  %v7340_v46 = vld [vmem:[#allocation3 + $0x1228] ss:$16 sps:$4 sm:$0xff]   ;;  %v7345_v47 = vld [vmem:[#allocation3 + $0x1244] ss:$16 sps:$4 sm:$0xff]  }
 0x266   :  { %4017 = vmatprep.subr.bf16.mxu0 %v7255_v48  ;;  %4427 = vmatprep.subr.bf16.mxu1 %v7258_v50  ;;  %v7348_v48 = vld [vmem:[#allocation3 + $0x124c] ss:$16 sps:$4 sm:$0xff]   ;;  %v7343_v50 = vld [vmem:[#allocation3 + $0x1240] ss:$16 sps:$4 sm:$0xff]  }
 0x269   :  { %4018 = vmatpush1.bf16.msra.mxu0 %v7253_v51  ;;  %4428 = vmatpush1.bf16.msra.mxu1 %v7256_v52  ;;  %v7346_v51 = vld [vmem:[#allocation3 + $0x1248] ss:$16 sps:$4 sm:$0xff]   ;;  %v109_v52 = vld [vmem:[%s7867_s0 + $0x90] sm:$0xff] }
 0x26a   :  { %4019 = vmatprep.subr.bf16.mxu0 %v7261_v53  ;;  %4429 = vmatprep.subr.bf16.mxu1 %v7264_v54  ;;  %v7351_v53 = vld [vmem:[#allocation7 + $0x4] ss:$16 sps:$4 sm:$0xff]   ;;  %v7354_v54 = vld [vmem:[#allocation7 + $0xc] ss:$16 sps:$4 sm:$0xff]  }
 0x26d   :  { %4020 = vmatpush1.bf16.msra.mxu0 %v7259_v55  ;;  %4430 = vmatpush1.bf16.msra.mxu1 %v7262_v56  ;;  %v128_v55 = vpack.c.bf16 %v109_v52, %v109_v52  ;;  %v7349_v56 = vld [vmem:[#allocation7] ss:$16 sps:$4 sm:$0xff]  }
 0x26e   :  { %4021 = vmatprep.subr.bf16.mxu0 %v7267_v57  ;;  %4431 = vmatprep.subr.bf16.mxu1 %v7270_v58  ;;  %v7352_v57 = vld [vmem:[#allocation7 + $0x8] ss:$16 sps:$4 sm:$0xff]   ;;  %v7360_v58 = vld [vmem:[#allocation7 + $0x2c] ss:$16 sps:$4 sm:$0xff]   ;;  %v7439_v52 = vld [vmem:[#allocation7 + $0x1e0] ss:$16 sps:$4 sm:$0xff]  }
 0x271   :  { %4022 = vmatpush1.bf16.msra.mxu0 %v7265_v59  ;;  %4432 = vmatpush1.bf16.msra.mxu1 %v7268_v60  ;;  %v7355_v59 = vld [vmem:[#allocation7 + $0x20] ss:$16 sps:$4 sm:$0xff]   ;;  %v7358_v60 = vld [vmem:[#allocation7 + $0x28] ss:$16 sps:$4 sm:$0xff]  }
 0x272   :  { %4023 = vmatprep.subr.bf16.mxu0 %v7273_v61  ;;  %4433 = vmatprep.subr.bf16.mxu1 %v7276_v62  ;;  %v7363_v61 = vld [vmem:[#allocation7 + $0x44] ss:$16 sps:$4 sm:$0xff]   ;;  %v7366_v62 = vld [vmem:[#allocation7 + $0x4c] ss:$16 sps:$4 sm:$0xff]  }
 0x275   :  { %4024 = vmatpush1.bf16.msra.mxu0 %v7271_v63  ;;  %4434 = vmatpush1.bf16.msra.mxu1 %v7274_v0  ;;  %v7361_v63 = vld [vmem:[#allocation7 + $0x40] ss:$16 sps:$4 sm:$0xff]   ;;  %v7364_v0 = vld [vmem:[#allocation7 + $0x48] ss:$16 sps:$4 sm:$0xff]  }
 0x276   :  { %4025 = vmatprep.subr.bf16.mxu0 %v7279_v1  ;;  %4435 = vmatprep.subr.bf16.mxu1 %v7282_v2  ;;  %v7369_v1 = vld [vmem:[#allocation7 + $0x64] ss:$16 sps:$4 sm:$0xff]   ;;  %v7372_v2 = vld [vmem:[#allocation7 + $0x6c] ss:$16 sps:$4 sm:$0xff]  }
 0x279   :  { %4026 = vmatpush1.bf16.msra.mxu0 %v7277_v3  ;;  %4436 = vmatpush1.bf16.msra.mxu1 %v7280_v4  ;;  %v7367_v3 = vld [vmem:[#allocation7 + $0x60] ss:$16 sps:$4 sm:$0xff]   ;;  %v7370_v4 = vld [vmem:[#allocation7 + $0x68] ss:$16 sps:$4 sm:$0xff]  }
 0x27a   :  { %4027 = vmatprep.subr.bf16.mxu0 %v7285_v5  ;;  %4437 = vmatprep.subr.bf16.mxu1 %v7288_v6  ;;  %v7375_v5 = vld [vmem:[#allocation7 + $0x84] ss:$16 sps:$4 sm:$0xff]   ;;  %v7378_v6 = vld [vmem:[#allocation7 + $0x8c] ss:$16 sps:$4 sm:$0xff]  }
 0x27d   :  { %4028 = vmatpush1.bf16.msra.mxu0 %v7283_v7  ;;  %4438 = vmatpush1.bf16.msra.mxu1 %v7286_v8  ;;  %v7373_v7 = vld [vmem:[#allocation7 + $0x80] ss:$16 sps:$4 sm:$0xff]   ;;  %v7376_v8 = vld [vmem:[#allocation7 + $0x88] ss:$16 sps:$4 sm:$0xff]  }
 0x27e   :  { %4029 = vmatprep.subr.bf16.mxu0 %v7291_v9  ;;  %4439 = vmatprep.subr.bf16.mxu1 %v7294_v10  ;;  %v7381_v9 = vld [vmem:[#allocation7 + $0xa4] ss:$16 sps:$4 sm:$0xff]   ;;  %v7384_v10 = vld [vmem:[#allocation7 + $0xac] ss:$16 sps:$4 sm:$0xff]  }
 0x281   :  { %4030 = vmatpush1.bf16.msra.mxu0 %v7289_v11  ;;  %4440 = vmatpush1.bf16.msra.mxu1 %v7292_v12  ;;  %v7379_v11 = vld [vmem:[#allocation7 + $0xa0] ss:$16 sps:$4 sm:$0xff]   ;;  %v7382_v12 = vld [vmem:[#allocation7 + $0xa8] ss:$16 sps:$4 sm:$0xff]  }
 0x282   :  { %4031 = vmatprep.subr.bf16.mxu0 %v7297_v13  ;;  %4441 = vmatprep.subr.bf16.mxu1 %v7300_v14  ;;  %v7387_v13 = vld [vmem:[#allocation7 + $0xc4] ss:$16 sps:$4 sm:$0xff]   ;;  %v7390_v14 = vld [vmem:[#allocation7 + $0xcc] ss:$16 sps:$4 sm:$0xff]  }
 0x285   :  { %4032 = vmatpush1.bf16.msra.mxu0 %v7295_v15  ;;  %4442 = vmatpush1.bf16.msra.mxu1 %v7298_v16  ;;  %v7385_v15 = vld [vmem:[#allocation7 + $0xc0] ss:$16 sps:$4 sm:$0xff]   ;;  %v7388_v16 = vld [vmem:[#allocation7 + $0xc8] ss:$16 sps:$4 sm:$0xff]  }
 0x286   :  { %4033 = vmatprep.subr.bf16.mxu0 %v7303_v17  ;;  %4443 = vmatprep.subr.bf16.mxu1 %v7306_v18  ;;  %v7393_v17 = vld [vmem:[#allocation7 + $0xe4] ss:$16 sps:$4 sm:$0xff]   ;;  %v7396_v18 = vld [vmem:[#allocation7 + $0xec] ss:$16 sps:$4 sm:$0xff]  }
 0x289   :  { %4034 = vmatpush1.bf16.msra.mxu0 %v7301_v19  ;;  %4444 = vmatpush1.bf16.msra.mxu1 %v7304_v20  ;;  %v7391_v19 = vld [vmem:[#allocation7 + $0xe0] ss:$16 sps:$4 sm:$0xff]   ;;  %v7394_v20 = vld [vmem:[#allocation7 + $0xe8] ss:$16 sps:$4 sm:$0xff]  }
 0x28a   :  { %4035 = vmatprep.subr.bf16.mxu0 %v7309_v21  ;;  %4445 = vmatprep.subr.bf16.mxu1 %v7312_v22  ;;  %v7399_v21 = vld [vmem:[#allocation7 + $0x104] ss:$16 sps:$4 sm:$0xff]   ;;  %v7402_v22 = vld [vmem:[#allocation7 + $0x10c] ss:$16 sps:$4 sm:$0xff]  }
 0x28d   :  { %4036 = vmatpush1.bf16.msra.mxu0 %v7307_v23  ;;  %4446 = vmatpush1.bf16.msra.mxu1 %v7310_v24  ;;  %v7397_v23 = vld [vmem:[#allocation7 + $0x100] ss:$16 sps:$4 sm:$0xff]   ;;  %v7400_v24 = vld [vmem:[#allocation7 + $0x108] ss:$16 sps:$4 sm:$0xff]  }
 0x28e   :  { %4037 = vmatprep.subr.bf16.mxu0 %v7315_v25  ;;  %4447 = vmatprep.subr.bf16.mxu1 %v7318_v26  ;;  %v7405_v25 = vld [vmem:[#allocation7 + $0x124] ss:$16 sps:$4 sm:$0xff]   ;;  %v7408_v26 = vld [vmem:[#allocation7 + $0x12c] ss:$16 sps:$4 sm:$0xff]  }
 0x291   :  { %4038 = vmatpush1.bf16.msra.mxu0 %v7313_v27  ;;  %4448 = vmatpush1.bf16.msra.mxu1 %v7316_v28  ;;  %v7403_v27 = vld [vmem:[#allocation7 + $0x120] ss:$16 sps:$4 sm:$0xff]   ;;  %v7406_v28 = vld [vmem:[#allocation7 + $0x128] ss:$16 sps:$4 sm:$0xff]  }
 0x292   :  { %4039 = vmatprep.subr.bf16.mxu0 %v7321_v29  ;;  %4449 = vmatprep.subr.bf16.mxu1 %v7324_v30  ;;  %v7411_v29 = vld [vmem:[#allocation7 + $0x144] ss:$16 sps:$4 sm:$0xff]   ;;  %v7414_v30 = vld [vmem:[#allocation7 + $0x14c] ss:$16 sps:$4 sm:$0xff]  }
 0x295   :  { %4040 = vmatpush1.bf16.msra.mxu0 %v7319_v31  ;;  %4450 = vmatpush1.bf16.msra.mxu1 %v7322_v32  ;;  %v7409_v31 = vld [vmem:[#allocation7 + $0x140] ss:$16 sps:$4 sm:$0xff]   ;;  %v7412_v32 = vld [vmem:[#allocation7 + $0x148] ss:$16 sps:$4 sm:$0xff]  }
 0x296   :  { %4041 = vmatprep.subr.bf16.mxu0 %v7327_v33  ;;  %4451 = vmatprep.subr.bf16.mxu1 %v7330_v34  ;;  %v7417_v33 = vld [vmem:[#allocation7 + $0x164] ss:$16 sps:$4 sm:$0xff]   ;;  %v7420_v34 = vld [vmem:[#allocation7 + $0x16c] ss:$16 sps:$4 sm:$0xff]  }
 0x299   :  { %4042 = vmatpush1.bf16.msra.mxu0 %v7325_v35  ;;  %4452 = vmatpush1.bf16.msra.mxu1 %v7328_v36  ;;  %v7415_v35 = vld [vmem:[#allocation7 + $0x160] ss:$16 sps:$4 sm:$0xff]   ;;  %v7418_v36 = vld [vmem:[#allocation7 + $0x168] ss:$16 sps:$4 sm:$0xff]  }
 0x29a   :  { %4052 = vmatprep.subr.bf16.mxu0 %v7333_v38  ;;  %4462 = vmatprep.subr.bf16.mxu1 %v7336_v39  ;;  %v7426_v38 = vld [vmem:[#allocation7 + $0x18c] ss:$16 sps:$4 sm:$0xff]   ;;  %v7421_v39 = vld [vmem:[#allocation7 + $0x180] ss:$16 sps:$4 sm:$0xff]  }
 0x29c   :  { %4044 = vmatmul.mubr.bf16.vlgmr.msra.gmra.mrb[0].mxu0 %v126_v40  ;;  %4454 = vmatmul.mubr.bf16.vlgmr.msra.gmra.mrb[0].mxu1 %v126_v40  ;;  %v7424_v40 = vld [vmem:[#allocation7 + $0x188] ss:$16 sps:$4 sm:$0xff]  }
 0x29d   :  { %4053 = vmatpush1.bf16.msra.mxu0 %v7331_v41  ;;  %4463 = vmatpush1.bf16.msra.mxu1 %v7334_v42  ;;  %v7429_v41 = vld [vmem:[#allocation7 + $0x1a4] ss:$16 sps:$4 sm:$0xff]   ;;  %v7432_v42 = vld [vmem:[#allocation7 + $0x1ac] ss:$16 sps:$4 sm:$0xff]  }
 0x29e   :  { %4054 = vmatprep.subr.bf16.mxu0 %v7339_v43  ;;  %4464 = vmatprep.subr.bf16.mxu1 %v7342_v44  ;;  %v7427_v43 = vld [vmem:[#allocation7 + $0x1a0] ss:$16 sps:$4 sm:$0xff]   ;;  %v7430_v44 = vld [vmem:[#allocation7 + $0x1a8] ss:$16 sps:$4 sm:$0xff]  }
 0x29f   :  { %4084 = vmatprep.mubr.bf16.mxu0 %v7664_v49  ;;  %4494 = vmatprep.mubr.bf16.mxu1 %v7664_v49  ;;  %v7357_v49 = vld [vmem:[#allocation7 + $0x24] ss:$16 sps:$4 sm:$0xff]  }
 0x2a1   :  { %4055 = vmatpush1.bf16.msra.mxu0 %v7337_v45  ;;  %4465 = vmatpush1.bf16.msra.mxu1 %v7340_v46  ;;  %v7435_v45 = vld [vmem:[#allocation7 + $0x1c4] ss:$16 sps:$4 sm:$0xff]   ;;  %v7438_v46 = vld [vmem:[#allocation7 + $0x1cc] ss:$16 sps:$4 sm:$0xff]  }
 0x2a2   :  { %4056 = vmatprep.subr.bf16.mxu0 %v7345_v47  ;;  %4466 = vmatprep.subr.bf16.mxu1 %v7348_v48  ;;  %v7433_v47 = vld [vmem:[#allocation7 + $0x1c0] ss:$16 sps:$4 sm:$0xff]   ;;  %v7436_v48 = vld [vmem:[#allocation7 + $0x1c8] ss:$16 sps:$4 sm:$0xff]  }
 0x2a5   :  { %4057 = vmatpush1.bf16.msra.mxu0 %v7343_v50  ;;  %4467 = vmatpush1.bf16.msra.mxu1 %v7346_v51  ;;  %v7441_v50 = vld [vmem:[#allocation7 + $0x1e4] ss:$16 sps:$4 sm:$0xff]   ;;  %v7444_v51 = vld [vmem:[#allocation7 + $0x1ec] ss:$16 sps:$4 sm:$0xff]  }
 0x2a6   :  { %5301 = vmatprep.subr.bf16.mxu0 %v7351_v53  ;;  %5383 = vmatprep.subr.bf16.mxu1 %v7354_v54  ;;  %v7442_v53 = vld [vmem:[#allocation7 + $0x1e8] ss:$16 sps:$4 sm:$0xff]   ;;  %v7447_v54 = vld [vmem:[#allocation7 + $0x204] ss:$16 sps:$4 sm:$0xff]  }
 0x2a8   :  { %6238 = vmatmul.mubr.msk.bf16.vlgmr.msra.gmra.mrb[0].mxu0 %vm3679_vm0, %v128_v55  ;;  %6239 = vmatmul.mubr.msk.bf16.vlgmr.msra.gmra.mrb[0].mxu1 %vm3679_vm0, %v128_v55  ;;  %v7450_v55 = vld [vmem:[#allocation7 + $0x20c] ss:$16 sps:$4 sm:$0xff]  }
 0x2a9   :  { %5302 = vmatpush1.bf16.msra.mxu0 %v7349_v56  ;;  %5384 = vmatpush1.bf16.msra.mxu1 %v7352_v57  ;;  %v719_v56 = vlaneseq }
 0x2aa   :  { %5303 = vmatprep.subr.bf16.mxu0 %v7357_v49  ;;  %5385 = vmatprep.subr.bf16.mxu1 %v7360_v58  ;;  %v7833_v58 = vld [vmem:[#allocation5] sm:$0xf] }
 0x2ab   :  { %v7828_v57 = vshrl.u32 %v719_v56, 7  ;;  %v7507_v56 = vld [vmem:[#allocation7 + $0x344] ss:$16 sps:$4 sm:$0xff]  }
 0x2ad   :  { %5304 = vmatpush1.bf16.msra.mxu0 %v7355_v59  ;;  %5386 = vmatpush1.bf16.msra.mxu1 %v7358_v60  ;;  %v7831_v49 = vsub.s32 0, %v7828_v57  ;;  %v7836_v59 = vsub.s32 1, %v7828_v57  ;;  %v7839_v60 = vsub.s32 3, %v7828_v57 }
 0x2ae   :  { %5305 = vmatprep.subr.bf16.mxu0 %v7363_v61  ;;  %5387 = vmatprep.subr.bf16.mxu1 %v7366_v62 }
 0x2af   :  { %v722_v61 = vrot.slane %v7833_v58, %v7831_v49  ;;  %v726_v62 = vrot.slane %v7833_v58, %v7836_v59 }
 0x2b1   :  { %5306 = vmatpush1.bf16.msra.mxu0 %v7361_v63  ;;  %5388 = vmatpush1.bf16.msra.mxu1 %v7364_v0  ;;  %v734_v63 = vrot.slane %v7833_v58, %v7839_v60 }
 0x2b2   :  { %5307 = vmatprep.subr.bf16.mxu0 %v7369_v1  ;;  %5389 = vmatprep.subr.bf16.mxu1 %v7372_v2 }
 0x2b5   :  { %5308 = vmatpush1.bf16.msra.mxu0 %v7367_v3  ;;  %5390 = vmatpush1.bf16.msra.mxu1 %v7370_v4 }
 0x2b6   :  { %5309 = vmatprep.subr.bf16.mxu0 %v7375_v5  ;;  %5391 = vmatprep.subr.bf16.mxu1 %v7378_v6 }
 0x2b9   :  { %5310 = vmatpush1.bf16.msra.mxu0 %v7373_v7  ;;  %5392 = vmatpush1.bf16.msra.mxu1 %v7376_v8 }
 0x2ba   :  { %5311 = vmatprep.subr.bf16.mxu0 %v7381_v9  ;;  %5393 = vmatprep.subr.bf16.mxu1 %v7384_v10 }
 0x2bd   :  { %5312 = vmatpush1.bf16.msra.mxu0 %v7379_v11  ;;  %5394 = vmatpush1.bf16.msra.mxu1 %v7382_v12 }
 0x2be   :  { %5313 = vmatprep.subr.bf16.mxu0 %v7387_v13  ;;  %5395 = vmatprep.subr.bf16.mxu1 %v7390_v14 }
 0x2c1   :  { %5314 = vmatpush1.bf16.msra.mxu0 %v7385_v15  ;;  %5396 = vmatpush1.bf16.msra.mxu1 %v7388_v16  ;;  %v7445_v15 = vld [vmem:[#allocation7 + $0x200] ss:$16 sps:$4 sm:$0xff]   ;;  %v7448_v16 = vld [vmem:[#allocation7 + $0x208] ss:$16 sps:$4 sm:$0xff]  }
 0x2c2   :  { %5315 = vmatprep.subr.bf16.mxu0 %v7393_v17  ;;  %5397 = vmatprep.subr.bf16.mxu1 %v7396_v18  ;;  %v7453_v18 = vld [vmem:[#allocation7 + $0x224] ss:$16 sps:$4 sm:$0xff]  }
 0x2c5   :  { %5316 = vmatpush1.bf16.msra.mxu0 %v7391_v19  ;;  %5398 = vmatpush1.bf16.msra.mxu1 %v7394_v20  ;;  %v7456_v19 = vld [vmem:[#allocation7 + $0x22c] ss:$16 sps:$4 sm:$0xff]  }
 0x2c6   :  { %5317 = vmatprep.subr.bf16.mxu0 %v7399_v21  ;;  %5399 = vmatprep.subr.bf16.mxu1 %v7402_v22  ;;  %v7451_v21 = vld [vmem:[#allocation7 + $0x220] ss:$16 sps:$4 sm:$0xff]   ;;  %v7454_v22 = vld [vmem:[#allocation7 + $0x228] ss:$16 sps:$4 sm:$0xff]  }
 0x2c9   :  { %5318 = vmatpush1.bf16.msra.mxu0 %v7397_v23  ;;  %5400 = vmatpush1.bf16.msra.mxu1 %v7400_v24  ;;  %v7459_v23 = vld [vmem:[#allocation7 + $0x244] ss:$16 sps:$4 sm:$0xff]   ;;  %v7462_v24 = vld [vmem:[#allocation7 + $0x24c] ss:$16 sps:$4 sm:$0xff]  }
 0x2ca   :  { %5319 = vmatprep.subr.bf16.mxu0 %v7405_v25  ;;  %5401 = vmatprep.subr.bf16.mxu1 %v7408_v26  ;;  %v7457_v25 = vld [vmem:[#allocation7 + $0x240] ss:$16 sps:$4 sm:$0xff]   ;;  %v7460_v26 = vld [vmem:[#allocation7 + $0x248] ss:$16 sps:$4 sm:$0xff]  }
 0x2cd   :  { %5320 = vmatpush1.bf16.msra.mxu0 %v7403_v27  ;;  %5402 = vmatpush1.bf16.msra.mxu1 %v7406_v28  ;;  %v7465_v27 = vld [vmem:[#allocation7 + $0x264] ss:$16 sps:$4 sm:$0xff]   ;;  %v7468_v28 = vld [vmem:[#allocation7 + $0x26c] ss:$16 sps:$4 sm:$0xff]  }
 0x2ce   :  { %5321 = vmatprep.subr.bf16.mxu0 %v7411_v29  ;;  %5403 = vmatprep.subr.bf16.mxu1 %v7414_v30  ;;  %v7463_v29 = vld [vmem:[#allocation7 + $0x260] ss:$16 sps:$4 sm:$0xff]   ;;  %v7466_v30 = vld [vmem:[#allocation7 + $0x268] ss:$16 sps:$4 sm:$0xff]  }
 0x2d1   :  { %5322 = vmatpush1.bf16.msra.mxu0 %v7409_v31  ;;  %5404 = vmatpush1.bf16.msra.mxu1 %v7412_v32  ;;  %v7471_v31 = vld [vmem:[#allocation7 + $0x284] ss:$16 sps:$4 sm:$0xff]   ;;  %v7474_v32 = vld [vmem:[#allocation7 + $0x28c] ss:$16 sps:$4 sm:$0xff]  }
 0x2d2   :  { %5323 = vmatprep.subr.bf16.mxu0 %v7417_v33  ;;  %5405 = vmatprep.subr.bf16.mxu1 %v7420_v34  ;;  %v7469_v33 = vld [vmem:[#allocation7 + $0x280] ss:$16 sps:$4 sm:$0xff]   ;;  %v7472_v34 = vld [vmem:[#allocation7 + $0x288] ss:$16 sps:$4 sm:$0xff]  }
 0x2d5   :  { %5324 = vmatpush1.bf16.msra.mxu0 %v7415_v35  ;;  %5406 = vmatpush1.bf16.msra.mxu1 %v7418_v36  ;;  %v7477_v35 = vld [vmem:[#allocation7 + $0x2a4] ss:$16 sps:$4 sm:$0xff]   ;;  %v7480_v36 = vld [vmem:[#allocation7 + $0x2ac] ss:$16 sps:$4 sm:$0xff]  }
 0x2d6   :  { %5325 = vmatprep.subr.bf16.mxu0 %v7423_v37  ;;  %5407 = vmatprep.subr.bf16.mxu1 %v7426_v38  ;;  %v7475_v37 = vld [vmem:[#allocation7 + $0x2a0] ss:$16 sps:$4 sm:$0xff]   ;;  %v7478_v38 = vld [vmem:[#allocation7 + $0x2a8] ss:$16 sps:$4 sm:$0xff]  }
 0x2d9   :  { %5326 = vmatpush1.bf16.msra.mxu0 %v7421_v39  ;;  %5408 = vmatpush1.bf16.msra.mxu1 %v7424_v40  ;;  %v7483_v39 = vld [vmem:[#allocation7 + $0x2c4] ss:$16 sps:$4 sm:$0xff]   ;;  %v7486_v40 = vld [vmem:[#allocation7 + $0x2cc] ss:$16 sps:$4 sm:$0xff]  }
 0x2da   :  { %5327 = vmatprep.subr.bf16.mxu0 %v7429_v41  ;;  %5409 = vmatprep.subr.bf16.mxu1 %v7432_v42  ;;  %v7481_v41 = vld [vmem:[#allocation7 + $0x2c0] ss:$16 sps:$4 sm:$0xff]   ;;  %v7484_v42 = vld [vmem:[#allocation7 + $0x2c8] ss:$16 sps:$4 sm:$0xff]  }
 0x2dd   :  { %5328 = vmatpush1.bf16.msra.mxu0 %v7427_v43  ;;  %5410 = vmatpush1.bf16.msra.mxu1 %v7430_v44  ;;  %v7489_v43 = vld [vmem:[#allocation7 + $0x2e4] ss:$16 sps:$4 sm:$0xff]   ;;  %v7492_v44 = vld [vmem:[#allocation7 + $0x2ec] ss:$16 sps:$4 sm:$0xff]  }
 0x2de   :  { %5329 = vmatprep.subr.bf16.mxu0 %v7435_v45  ;;  %5411 = vmatprep.subr.bf16.mxu1 %v7438_v46  ;;  %v7487_v45 = vld [vmem:[#allocation7 + $0x2e0] ss:$16 sps:$4 sm:$0xff]   ;;  %v7490_v46 = vld [vmem:[#allocation7 + $0x2e8] ss:$16 sps:$4 sm:$0xff]  }
 0x2e1   :  { %5330 = vmatpush1.bf16.msra.mxu0 %v7433_v47  ;;  %5412 = vmatpush1.bf16.msra.mxu1 %v7436_v48  ;;  %v7495_v47 = vld [vmem:[#allocation7 + $0x304] ss:$16 sps:$4 sm:$0xff]   ;;  %v7498_v48 = vld [vmem:[#allocation7 + $0x30c] ss:$16 sps:$4 sm:$0xff]  }
 0x2e2   :  { %5331 = vmatprep.subr.bf16.mxu0 %v7441_v50  ;;  %5413 = vmatprep.subr.bf16.mxu1 %v7444_v51  ;;  %v7493_v50 = vld [vmem:[#allocation7 + $0x300] ss:$16 sps:$4 sm:$0xff]   ;;  %v7496_v51 = vld [vmem:[#allocation7 + $0x308] ss:$16 sps:$4 sm:$0xff]  }
 0x2e5   :  { %5332 = vmatpush1.bf16.msra.mxu0 %v7439_v52  ;;  %5414 = vmatpush1.bf16.msra.mxu1 %v7442_v53  ;;  %v7501_v52 = vld [vmem:[#allocation7 + $0x324] ss:$16 sps:$4 sm:$0xff]   ;;  %v7504_v53 = vld [vmem:[#allocation7 + $0x32c] ss:$16 sps:$4 sm:$0xff]  }
 0x2e6   :  { %5342 = vmatprep.subr.bf16.mxu0 %v7447_v54  ;;  %5424 = vmatprep.subr.bf16.mxu1 %v7450_v55  ;;  %v7499_v54 = vld [vmem:[#allocation7 + $0x320] ss:$16 sps:$4 sm:$0xff]   ;;  %v7502_v55 = vld [vmem:[#allocation7 + $0x328] ss:$16 sps:$4 sm:$0xff]  }
 0x37b   :  { %v4086_v0 = vpop.f32.mrb[0].mxu0  ;;  %v7847_v1 = vpop.f32.mrb[0].mxu1 }
 0x37c   :  { %v6368_v2 = vadd.f32 %v4086_v0, %v722_v61  ;;  %v4088_v3 = vpop.f32.mrb[1].mxu0  ;;  %v4498_v4 = vpop.f32.mrb[1].mxu1  ;;  %v7510_v61 = vld [vmem:[#allocation7 + $0x34c] ss:$16 sps:$4 sm:$0xff]   ;;  %v7513_v0 = vld [vmem:[#allocation7 + $0x364] ss:$16 sps:$4 sm:$0xff]  }
 0x37d   :  { %v6369_v5 = vadd.f32 %v4088_v3, %v726_v62  ;;  %v6371_v6 = vadd.f32 %v4498_v4, %v734_v63  ;;  %v4090_v7 = vpop.f32.mrb[2].mxu0  ;;  %v4500_v8 = vpop.f32.mrb[2].mxu1  ;;  %v7505_v62 = vld [vmem:[#allocation7 + $0x340] ss:$16 sps:$4 sm:$0xff]   ;;  %v7508_v63 = vld [vmem:[#allocation7 + $0x348] ss:$16 sps:$4 sm:$0xff]  }
 0x37e   :  { %v4503_v9 = vmax.f32 %v6368_v2, 0.0  ;;  %v4091_v10 = vpop.f32.mrb[3].mxu0  ;;  %v4501_v11 = vpop.f32.mrb[3].mxu1  ;;  %v7516_v2 = vld [vmem:[#allocation7 + $0x36c] ss:$16 sps:$4 sm:$0xff]  }
 0x37f   :  { %v4504_v12 = vmax.f32 %v6369_v5, 0.0  ;;  %v4506_v13 = vmax.f32 %v6371_v6, 0.0  ;;  %v7511_v3 = vld [vmem:[#allocation7 + $0x360] ss:$16 sps:$4 sm:$0xff]   ;;  %v7514_v4 = vld [vmem:[#allocation7 + $0x368] ss:$16 sps:$4 sm:$0xff]  }
 0x380   :  { %v4507_v17 = vpack.c.bf16 %v4503_v9, %v4503_v9  ;;  %v7519_v5 = vld [vmem:[#allocation7 + $0x384] ss:$16 sps:$4 sm:$0xff]   ;;  %v7522_v6 = vld [vmem:[#allocation7 + $0x38c] ss:$16 sps:$4 sm:$0xff]   ;;  %v7517_v7 = vld [vmem:[#allocation7 + $0x380] ss:$16 sps:$4 sm:$0xff]  }
 0x381   :  { %v4508_v14 = vpack.c.bf16 %v4504_v12, %v4504_v12  ;;  %v4510_v20 = vpack.c.bf16 %v4506_v13, %v4506_v13  ;;  %v7520_v8 = vld [vmem:[#allocation7 + $0x388] ss:$16 sps:$4 sm:$0xff]   ;;  %v7850_v9 = vsub.s32 2, %v7828_v57  ;;  %v7525_v10 = vld [vmem:[#allocation7 + $0x3a4] ss:$16 sps:$4 sm:$0xff]  }
 0x382   :  { %v7528_v11 = vld [vmem:[#allocation7 + $0x3ac] ss:$16 sps:$4 sm:$0xff]   ;;  %v7523_v12 = vld [vmem:[#allocation7 + $0x3a0] ss:$16 sps:$4 sm:$0xff]   ;;  %v7526_v13 = vld [vmem:[#allocation7 + $0x3a8] ss:$16 sps:$4 sm:$0xff]  }
 0x383   :  { %5333 = vmatprep.mubr.bf16.mxu0 %v4508_v14  ;;  %5415 = vmatprep.mubr.bf16.mxu1 %v4508_v14  ;;  %v730_v14 = vrot.slane %v7833_v58, %v7850_v9  ;;  %v7532_v57 = vld [vmem:[#allocation7 + $0x3c8] ss:$16 sps:$4 sm:$0xff]  }
 0x384   :  { %5334 = vmatmul.mubr.bf16.vlgmr.msra.gmra.mrb[4].mxu0 %v4507_v17  ;;  %5416 = vmatmul.mubr.bf16.vlgmr.msra.gmra.mrb[4].mxu1 %v4507_v17  ;;  %v7529_v17 = vld [vmem:[#allocation7 + $0x3c0] ss:$16 sps:$4 sm:$0xff]  }
 0x385   :  { %5343 = vmatpush1.bf16.msra.mxu0 %v7445_v15  ;;  %5425 = vmatpush1.bf16.msra.mxu1 %v7448_v16  ;;  %v7531_v15 = vld [vmem:[#allocation7 + $0x3c4] ss:$16 sps:$4 sm:$0xff]   ;;  %v7534_v16 = vld [vmem:[#allocation7 + $0x3cc] ss:$16 sps:$4 sm:$0xff]  }
 0x386   :  { %5374 = vmatprep.mubr.bf16.mxu0 %v4510_v20  ;;  %5456 = vmatprep.mubr.bf16.mxu1 %v4510_v20  ;;  %v7540_v20 = vld [vmem:[#allocation7 + $0x3ec] ss:$16 sps:$4 sm:$0xff]  }
 0x387   :  { %5344 = vmatprep.subr.bf16.mxu0 %v7453_v18  ;;  %5426 = vmatprep.subr.bf16.mxu1 %v7456_v19  ;;  %v6370_v18 = vadd.f32 %v7847_v1, %v730_v14  ;;  %v7537_v19 = vld [vmem:[#allocation7 + $0x3e4] ss:$16 sps:$4 sm:$0xff]  }
 0x389   :  { %5345 = vmatpush1.bf16.msra.mxu0 %v7451_v21  ;;  %5427 = vmatpush1.bf16.msra.mxu1 %v7454_v22  ;;  %v7535_v21 = vld [vmem:[#allocation7 + $0x3e0] ss:$16 sps:$4 sm:$0xff]   ;;  %v7538_v22 = vld [vmem:[#allocation7 + $0x3e8] ss:$16 sps:$4 sm:$0xff]  }
 0x38a   :  { %5346 = vmatprep.subr.bf16.mxu0 %v7459_v23  ;;  %5428 = vmatprep.subr.bf16.mxu1 %v7462_v24  ;;  %v4505_v23 = vmax.f32 %v6370_v18, 0.0  ;;  %v5469_v24 = vld [vmem:[#allocation10] sm:$0xf] }
 0x38b   :  { %v5496_v1 = vrot.slane %v5469_v24, %v7839_v60 }
 0x38c   :  { %v4509_v58 = vpack.c.bf16 %v4505_v23, %v4505_v23 }
 0x38d   :  { %5347 = vmatpush1.bf16.msra.mxu0 %v7457_v25  ;;  %5429 = vmatpush1.bf16.msra.mxu1 %v7460_v26  ;;  %v5488_v25 = vrot.slane %v5469_v24, %v7836_v59  ;;  %v5470_v26 = vld [vmem:[#allocation2] sm:$0x1] }
 0x38e   :  { %5348 = vmatprep.subr.bf16.mxu0 %v7465_v27  ;;  %5430 = vmatprep.subr.bf16.mxu1 %v7468_v28  ;;  %v4639_v27 = vld [vmem:[#allocation8] sm:$0xf] }
 0x38f   :  { %5473 = vperm.xlu0 %6466, %v5470_v26   ;;  %v4644_v28 = vrot.slane %v4639_v27, %v7831_v49 }
 0x391   :  { %5349 = vmatpush1.bf16.msra.mxu0 %v7463_v29  ;;  %5431 = vmatpush1.bf16.msra.mxu1 %v7466_v30  ;;  %v4652_v29 = vrot.slane %v4639_v27, %v7850_v9  ;;  %v4648_v30 = vrot.slane %v4639_v27, %v7836_v59  ;;  %v5484_v59 = vrot.slane %v5469_v24, %v7831_v49 }
 0x392   :  { %5350 = vmatprep.subr.bf16.mxu0 %v7471_v31  ;;  %5432 = vmatprep.subr.bf16.mxu1 %v7474_v32  ;;  %v4656_v31 = vrot.slane %v4639_v27, %v7839_v60  ;;  %v5492_v60 = vrot.slane %v5469_v24, %v7850_v9 }
 0x395   :  { %5351 = vmatpush1.bf16.msra.mxu0 %v7469_v33  ;;  %5433 = vmatpush1.bf16.msra.mxu1 %v7472_v34 }
 0x396   :  { %5352 = vmatprep.subr.bf16.mxu0 %v7477_v35  ;;  %5434 = vmatprep.subr.bf16.mxu1 %v7480_v36 }
 0x399   :  { %5353 = vmatpush1.bf16.msra.mxu0 %v7475_v37  ;;  %5435 = vmatpush1.bf16.msra.mxu1 %v7478_v38 }
 0x39a   :  { %5354 = vmatprep.subr.bf16.mxu0 %v7483_v39  ;;  %5436 = vmatprep.subr.bf16.mxu1 %v7486_v40 }
 0x39d   :  { %5355 = vmatpush1.bf16.msra.mxu0 %v7481_v41  ;;  %5437 = vmatpush1.bf16.msra.mxu1 %v7484_v42 }
 0x39e   :  { %5356 = vmatprep.subr.bf16.mxu0 %v7489_v43  ;;  %5438 = vmatprep.subr.bf16.mxu1 %v7492_v44 }
 0x3a1   :  { %5357 = vmatpush1.bf16.msra.mxu0 %v7487_v45  ;;  %5439 = vmatpush1.bf16.msra.mxu1 %v7490_v46 }
 0x3a2   :  { %5358 = vmatprep.subr.bf16.mxu0 %v7495_v47  ;;  %5440 = vmatprep.subr.bf16.mxu1 %v7498_v48 }
 0x3a5   :  { %5359 = vmatpush1.bf16.msra.mxu0 %v7493_v50  ;;  %5441 = vmatpush1.bf16.msra.mxu1 %v7496_v51 }
 0x3a6   :  { %5360 = vmatprep.subr.bf16.mxu0 %v7501_v52  ;;  %5442 = vmatprep.subr.bf16.mxu1 %v7504_v53 }
 0x3a9   :  { %5361 = vmatpush1.bf16.msra.mxu0 %v7499_v54  ;;  %5443 = vmatpush1.bf16.msra.mxu1 %v7502_v55 }
 0x3aa   :  { %5362 = vmatprep.subr.bf16.mxu0 %v7507_v56  ;;  %5444 = vmatprep.subr.bf16.mxu1 %v7510_v61 }
 0x3ad   :  { %5363 = vmatpush1.bf16.msra.mxu0 %v7505_v62  ;;  %5445 = vmatpush1.bf16.msra.mxu1 %v7508_v63 }
 0x3ae   :  { %5364 = vmatprep.subr.bf16.mxu0 %v7513_v0  ;;  %5446 = vmatprep.subr.bf16.mxu1 %v7516_v2 }
 0x3b1   :  { %5365 = vmatpush1.bf16.msra.mxu0 %v7511_v3  ;;  %5447 = vmatpush1.bf16.msra.mxu1 %v7514_v4 }
 0x3b2   :  { %5366 = vmatprep.subr.bf16.mxu0 %v7519_v5  ;;  %5448 = vmatprep.subr.bf16.mxu1 %v7522_v6 }
 0x3b5   :  { %5367 = vmatpush1.bf16.msra.mxu0 %v7517_v7  ;;  %5449 = vmatpush1.bf16.msra.mxu1 %v7520_v8 }
 0x3b6   :  { %5368 = vmatprep.subr.bf16.mxu0 %v7525_v10  ;;  %5450 = vmatprep.subr.bf16.mxu1 %v7528_v11 }
 0x3b9   :  { %5369 = vmatpush1.bf16.msra.mxu0 %v7523_v12  ;;  %5451 = vmatpush1.bf16.msra.mxu1 %v7526_v13 }
 0x3ba   :  { %5370 = vmatprep.subr.bf16.mxu0 %v7531_v15  ;;  %5452 = vmatprep.subr.bf16.mxu1 %v7534_v16 }
 0x3bd   :  { %5371 = vmatpush1.bf16.msra.mxu0 %v7529_v17  ;;  %5453 = vmatpush1.bf16.msra.mxu1 %v7532_v57 }
 0x3be   :  { %5372 = vmatprep.subr.bf16.mxu0 %v7537_v19  ;;  %5454 = vmatprep.subr.bf16.mxu1 %v7540_v20 }
 0x3c1   :  { %5373 = vmatpush1.bf16.msra.mxu0 %v7535_v21  ;;  %5455 = vmatpush1.bf16.msra.mxu1 %v7538_v22 }
 0x3c4   :  { %5375 = vmatmul.mubr.bf16.vlgmr.msra.gmra.mrb[4].mxu0 %v4509_v58  ;;  %5457 = vmatmul.mubr.bf16.vlgmr.msra.gmra.mrb[4].mxu1 %v4509_v58 }
 0x3c5   :  { %5565 = vmatprep.mubr.f32.mxu1 %v5488_v25  ;;  %5635 = vmatprep.mubr.f32.mxu0 %v5496_v1 }
 0x40e   :  { %v5474_v48 = vpop.permute.xlu0 %5473 }
 0x40f   :  { %v5479_v50 = vrot.slane %v5474_v48, %v7831_v49 }
 0x497   :  { %v5376_v32 = vpop.f32.mrb[4].mxu0  ;;  %v5458_v33 = vpop.f32.mrb[4].mxu1 }
 0x498   :  { %v6372_v34 = vadd.f32 %v5376_v32, %v4644_v28  ;;  %v6374_v35 = vadd.f32 %v5458_v33, %v4652_v29  ;;  %v5378_v36 = vpop.f32.mrb[5].mxu0  ;;  %v5460_v37 = vpop.f32.mrb[5].mxu1 }
 0x499   :  { %v6373_v38 = vadd.f32 %v5378_v36, %v4648_v30  ;;  %v6375_v39 = vadd.f32 %v5460_v37, %v4656_v31  ;;  %v5380_v40 = vpop.f32.mrb[6].mxu0  ;;  %v5462_v41 = vpop.f32.mrb[6].mxu1 }
 0x49a   :  { %v5381_v42 = vpop.f32.mrb[7].mxu0  ;;  %v5463_v43 = vpop.f32.mrb[7].mxu1  ;;  %v5465_v46 = vmax.f32 %v6372_v34, 0.0  ;;  %v5467_v47 = vmax.f32 %v6374_v35, 0.0 }
 0x49b   :  { %v5466_v44 = vmax.f32 %v6373_v38, 0.0  ;;  %v5468_v45 = vmax.f32 %v6375_v39, 0.0 }
 0x49d   :  { %5501 = vmatprep.subr.mxu1 %v5466_v44  ;;  %5571 = vmatprep.subr.mxu0 %v5468_v45 }
 0x49e   :  { %5502 = vmatpush1.xpose.msra.mxu1 %v5465_v46  ;;  %5572 = vmatpush1.xpose.msra.mxu0 %v5467_v47 }
 0x4a1   :  { %5566 = vmatmul.mubr.f32.vlgmr.msra.gmra.mrb[8].mxu1 %v5484_v59  ;;  %5636 = vmatmul.mubr.f32.vlgmr.msra.gmra.mrb[8].mxu0 %v5492_v60 }
 0x574   :  { %v5567_v51 = vpop.f32.mrb[8].mxu1  ;;  %v5637_v52 = vpop.f32.mrb[8].mxu0 }
 0x575   :  { %v5568_v53 = vadd.f32 %v5567_v51, %v5479_v50  ;;  %v5569_v54 = vpop.f32.mrb[9].mxu1  ;;  %v5639_v55 = vpop.f32.mrb[9].mxu0 }
 0x577   :  { %v5638_v56 = vadd.f32 %v5637_v52, %v5568_v53 }
 0x579   :  { %5642 = vst.msk [vmem:[%s7874_s7] sm:$0x1] %vm5641_vm1, %v5638_v56 }
 0x57a   :  { %5647 = vsyncpa [#allocation4], 1 }
 0x57b   :  { %5648 = vsyncpa [#allocation6], 1 }
 0x57c   :  { %5649 = vsyncpa [#allocation9], 1 }

</bundles_post_ra>
